<compile_context>
chip_gen: v7x
topology: tpu7x:2x2x1
jax: 0.10.0
libtpu: 0.0.40
codegen_flags: <defaults>
</compile_context>

<pallas_src>
import math
import numpy as np
import jax
import jax.numpy as jnp
from jax.experimental import pallas as pl
from jax.experimental.pallas import tpu as pltpu

# normalization constants hardcoded in the module's forward()
NUM_NEIGHBORS = 2
NUM_NODES = 4

DIM_SH = 16
DIM_MID = 368
DIM_MID_PAD = 384          # 3 * 128, lane-dense
DIM_OUT = 7
DIM_KR2 = DIM_SH * DIM_OUT     # 112
DIM_KR2_PAD = 128
OUT_PAD = 128

T_EDGE = 256               # edge tile (MXU-friendly; pick 128 on v5e if preferred)

# packed-constant row offsets (all multiples of 8 sublanes)
_QF_ROW, _R16_ROW, _CR1_ROW, _CT_ROW, _CONST_ROWS = 0, 8, 24, 88, 152

# ----------------------------------------------------------------------------
# Monomials / spherical harmonics (numpy setup + pure-JAX reference)
# ----------------------------------------------------------------------------
_MONO_NAMES = ["1", "x", "y", "z", "xx", "yy", "zz", "xy", "xz", "yz",
               "xxx", "yyy", "zzz", "xxy", "xxz", "yyx", "yyz", "zzx", "zzy",
               "xyz"]


def monomial_features(v, xp):
    """v: (M, 3) -> (M, 20) monomials of degree 0..3 (order = _MONO_NAMES)."""
    x = v[:, 0:1]
    y = v[:, 1:2]
    z = v[:, 2:3]
    one = xp.ones_like(x)
    cols = [one, x, y, z,
            x * x, y * y, z * z, x * y, x * z, y * z,
            x * x * x, y * y * y, z * z * z,
            x * x * y, x * x * z, y * y * x, y * y * z, z * z * x, z * z * y,
            x * y * z]
    return xp.concatenate(cols, axis=1)


SH_OFFSETS = (0, 1, 4, 9)


def build_sh_coeff():
    """(20, 16) matrix mapping monomials -> real SH l=0..3,
    normalization='component', normalize=False (homogeneous polynomials)."""
    idx = {n: i for i, n in enumerate(_MONO_NAMES)}
    C = np.zeros((20, 16), dtype=np.float64)

    def put(col, terms):
        for name, c in terms:
            C[idx[name], col] += c

    put(0, [("1", 1.0)])                                        # l=0
    s3 = math.sqrt(3.0)                                         # l=1: sqrt(3)(y,z,x)
    put(1, [("y", s3)]); put(2, [("z", s3)]); put(3, [("x", s3)])
    s15 = math.sqrt(15.0)                                       # l=2
    c20 = math.sqrt(5.0) / 2.0
    put(4, [("xy", s15)])
    put(5, [("yz", s15)])
    put(6, [("zz", 2 * c20), ("xx", -c20), ("yy", -c20)])
    put(7, [("xz", s15)])
    put(8, [("xx", s15 / 2.0), ("yy", -s15 / 2.0)])
    c3a = math.sqrt(35.0 / 8.0)                                 # l=3
    c3b = math.sqrt(105.0)
    c3c = math.sqrt(21.0 / 8.0)
    c3d = math.sqrt(7.0) / 2.0
    c3e = math.sqrt(105.0) / 2.0
    put(9, [("xxy", 3 * c3a), ("yyy", -c3a)])
    put(10, [("xyz", c3b)])
    put(11, [("zzy", 4 * c3c), ("xxy", -c3c), ("yyy", -c3c)])
    put(12, [("zzz", 2 * c3d), ("xxz", -3 * c3d), ("yyz", -3 * c3d)])
    put(13, [("zzx", 4 * c3c), ("xxx", -c3c), ("yyx", -c3c)])
    put(14, [("xxz", c3e), ("yyz", -c3e)])
    put(15, [("xxx", c3a), ("yyx", -3 * c3a)])
    return C


_CSH_NP = build_sh_coeff()
_ROT_RNG = np.random.default_rng(42)
_W3J_CACHE = {}


def _wigner_D(l, R, pts):
    d = 2 * l + 1
    off = SH_OFFSETS[l]
    Y = monomial_features(pts, np) @ _CSH_NP
    YR = monomial_features(pts @ R.T, np) @ _CSH_NP
    A = Y[:, off:off + d].T
    B = YR[:, off:off + d].T
    return B @ np.linalg.pinv(A)


def real_wigner_3j(l1, l2, l3):
    key = (l1, l2, l3)
    if key in _W3J_CACHE:
        return _W3J_CACHE[key]
    d1, d2, d3 = 2 * l1 + 1, 2 * l2 + 1, 2 * l3 + 1
    pts = _ROT_RNG.normal(size=(64, 3))
    pts /= np.linalg.norm(pts, axis=1, keepdims=True)
    blocks = []
    for _ in range(4):
        A = _ROT_RNG.normal(size=(3, 3))
        Q, _ = np.linalg.qr(A)
        if np.linalg.det(Q) < 0:
            Q[:, 0] = -Q[:, 0]
        K = np.kron(np.kron(_wigner_D(l1, Q, pts), _wigner_D(l2, Q, pts)),
                    _wigner_D(l3, Q, pts))
        blocks.append(K - np.eye(d1 * d2 * d3))
    S_mat = np.concatenate(blocks, axis=0)
    _, s, vt = np.linalg.svd(S_mat)
    assert s[-1] < 1e-6, (key, s[-1])
    if len(s) > 1:
        assert s[-2] > 1e-3, (key, s[-2])      # invariant subspace must be 1-D
    c = vt[-1]
    c = c / np.linalg.norm(c)
    if c[np.argmax(np.abs(c))] < 0:
        c = -c
    C = c.reshape(d1, d2, d3)
    _W3J_CACHE[key] = C
    return C


# ----------------------------------------------------------------------------
# FullyConnectedTensorProduct -> dense bilinear tensor M[i, j, k]
# ----------------------------------------------------------------------------
IRREPS_SH = [(1, 0, +1), (1, 1, -1), (1, 2, +1), (1, 3, -1)]                    # dim 16
IRREPS_MID = [(64, 0, +1), (24, 1, +1), (24, 1, -1), (16, 2, +1), (16, 2, -1)]  # dim 368
IRREPS_OUT = [(1, 0, -1), (6, 0, +1)]                                           # dim 7


def _offsets(irreps):
    offs, o = [], 0
    for mul, l, _ in irreps:
        offs.append(o)
        o += mul * (2 * l + 1)
    return offs, o


def build_fctp_tensor(irr1, irr2, irro, w_rng):
    o1, d1 = _offsets(irr1)
    o2, d2 = _offsets(irr2)
    oo, do = _offsets(irro)
    instructions = []
    for i1, (m1, l1, p1) in enumerate(irr1):
        for i2, (m2, l2, p2) in enumerate(irr2):
            for io, (mo, lo, po) in enumerate(irro):
                if p1 * p2 == po and abs(l1 - l2) <= lo <= l1 + l2:
                    instructions.append((i1, i2, io))
    fan_in = {}
    for i1, i2, io in instructions:
        fan_in[io] = fan_in.get(io, 0) + irr1[i1][0] * irr2[i2][0]
    M = np.zeros((d1, d2, do), dtype=np.float64)
    for i1, i2, io in instructions:
        m1, l1, _ = irr1[i1]
        m2, l2, _ = irr2[i2]
        mo, lo, _ = irro[io]
        C = real_wigner_3j(l1, l2, lo)
        W = w_rng.normal(size=(m1, m2, mo))                 # e3nn internal weights ~ N(0,1)
        alpha = (2 * lo + 1) / fan_in[io]                   # 'component' / 'element' norm
        blk = math.sqrt(alpha) * np.einsum("uvw,mnp->umvnwp", W, C)
        blk = blk.reshape(m1 * (2 * l1 + 1), m2 * (2 * l2 + 1), mo * (2 * lo + 1))
        M[o1[i1]:o1[i1] + blk.shape[0],
          o2[i2]:o2[i2] + blk.shape[1],
          oo[io]:oo[io] + blk.shape[2]] += blk
    return M


# ----------------------------------------------------------------------------
# Host-side constant folding for the kernel
# ----------------------------------------------------------------------------
_EXP_TO_NAME = {
    (0, 0, 0): "1",
    (1, 0, 0): "x", (0, 1, 0): "y", (0, 0, 1): "z",
    (2, 0, 0): "xx", (0, 2, 0): "yy", (0, 0, 2): "zz",
    (1, 1, 0): "xy", (1, 0, 1): "xz", (0, 1, 1): "yz",
    (3, 0, 0): "xxx", (0, 3, 0): "yyy", (0, 0, 3): "zzz",
    (2, 1, 0): "xxy", (2, 0, 1): "xxz", (1, 2, 0): "yyx", (0, 2, 1): "yyz",
    (1, 0, 2): "zzx", (0, 1, 2): "zzy", (1, 1, 1): "xyz",
}


def build_cubic_sh_matrix():
    """(64, 16): maps cubic Khatri-Rao features q_a*q_b*q_c (q=[1,x,y,z]) to SH."""
    idx = {n: i for i, n in enumerate(_MONO_NAMES)}
    names = []
    for a in range(4):
        for b in range(4):
            for c in range(4):
                ex = [0, 0, 0]
                for v in (a, b, c):
                    if v > 0:
                        ex[v - 1] += 1
                names.append(_EXP_TO_NAME[tuple(ex)])
    counts = {}
    for n in names:
        counts[n] = counts.get(n, 0) + 1
    C64 = np.zeros((64, 16), dtype=np.float64)
    for r, n in enumerate(names):
        C64[r] = _CSH_NP[idx[n]] / counts[n]
    return C64


def build_kernel_constants(m1, m2):
    """Fold selector/SH matrices + flattened tp weights into 4 kernel operands."""
    RQ = np.kron(np.eye(4), np.ones((1, 4)))        # (4, 16)   q_a at col a*4+b
    TQ = np.kron(np.ones((1, 4)), np.eye(4))        # (4, 16)   q_b
    T16 = np.kron(np.ones((1, 16)), np.eye(4))      # (4, 64)   q_c at col m*4+c
    R16 = np.kron(np.eye(16), np.ones((1, 4)))      # (16, 64)  (q_a q_b) replicated
    R1 = np.kron(np.eye(16), np.ones((1, 16)))      # (16, 256) x1_i at col i*16+j
    T1 = np.kron(np.ones((1, 16)), np.eye(16))      # (16, 256) sh_j at col i*16+j
    R2 = np.zeros((16, DIM_KR2_PAD))                # (16, 128) sh_j at col j*7+k
    R2[:, :DIM_KR2] = np.kron(np.eye(16), np.ones((1, DIM_OUT)))

    CSH64 = build_cubic_sh_matrix()                 # (64, 16) cubic KR feats -> sh
    csh_r1 = CSH64 @ R1                             # (64, 256)
    csh_t1r2 = np.concatenate([CSH64 @ T1, CSH64 @ R2], axis=1)   # (64, 384)

    qf = np.zeros((4, DIM_MID_PAD))                 # fused [RQ | TQ | T16], 128-aligned
    qf[:, 0:16] = RQ
    qf[:, 128:144] = TQ
    qf[:, 256:320] = T16

    const = np.zeros((_CONST_ROWS, DIM_MID_PAD), np.float32)
    const[_QF_ROW:_QF_ROW + 4, :] = qf
    const[_R16_ROW:_R16_ROW + 16, 0:64] = R16
    const[_CR1_ROW:_CR1_ROW + 64, 0:256] = csh_r1
    const[_CT_ROW:_CT_ROW + 64, :] = csh_t1r2

    s2 = np.zeros((DIM_KR2_PAD, OUT_PAD), np.float32)
    s2[:DIM_KR2, :DIM_OUT] = np.kron(np.ones((DIM_SH, 1)), np.eye(DIM_OUT))

    m1_flat = np.zeros((DIM_SH * DIM_SH, DIM_MID_PAD), np.float32)
    m1_flat[:, :DIM_MID] = m1.reshape(DIM_SH * DIM_SH, DIM_MID)
    m2_flat = np.zeros((DIM_MID_PAD, DIM_KR2_PAD), np.float32)
    m2_flat[:DIM_MID, :DIM_KR2] = m2.reshape(DIM_MID, DIM_KR2)

    return (jnp.asarray(const), jnp.asarray(s2),
            jnp.asarray(m1_flat, jnp.bfloat16),     # exact: m1/m2 values are bf16-snapped
            jnp.asarray(m2_flat, jnp.bfloat16))


# ----------------------------------------------------------------------------
# Pallas kernel: SH + tensor products + graph propagation, matmul-only dataflow
# ----------------------------------------------------------------------------
def _invariant_polynomial_kernel(q_ref, a_ref, aout_ref, const_ref, s2_ref,
                                 m1_ref, m2_ref, out_ref):
    f32 = jnp.float32
    bf16 = jnp.bfloat16

    def dot(a, b):
        return jnp.dot(a, b, preferred_element_type=f32)

    cst = const_ref
    q = q_ref[...]                                          # (T_E, 4) = [1, x, y, z]

    # real SH l=0..3 as cubic Khatri-Rao features; three q-LHS matmuls fused into
    # one (4, 384) constant RHS with 128-lane-aligned blocks (free post-slices).
    qf = dot(q, cst[_QF_ROW:_QF_ROW + 4, :])                # (T_E, 384)
    z2 = qf[:, 0:16] * qf[:, 128:144]                       # (T_E, 16)   q_a*q_b
    z3 = dot(z2, cst[_R16_ROW:_R16_ROW + 16, 0:64]) * qf[:, 256:320]    # (T_E, 64)

    # sh-dependent Khatri-Rao factors for tp1 (cols 0:256) and tp2 (cols 256:384)
    # in ONE matmul; CSH64 is folded into the constants, sh never materialized.
    w = dot(z3, cst[_CT_ROW:_CT_ROW + 64, :])               # (T_E, 384)

    # graph gather-after-scatter #1 (edge mask + 1/sqrt(2) folded into A), then
    # tp1 as ONE (T_E,256)x(256,384) bf16 matmul against the flattened weights.
    az3 = dot(a_ref[...], z3)                               # (T_E, 64)
    z = dot(az3, cst[_CR1_ROW:_CR1_ROW + 64, 0:256]) * w[:, 0:256]      # (T_E, 256)
    edge_f = dot(z.astype(bf16), m1_ref[...])               # (T_E, 384)  (368 + pad)

    # graph #2, then tp2 with the 384-dim mid index contracted first.
    x2 = dot(a_ref[...], edge_f)                            # (T_E, 384)
    t2 = dot(x2.astype(bf16), m2_ref[...])                  # (T_E, 128)  sum_i x2_i*M2[i,j,k]
    u = w[:, 256:384] * t2                                  # (T_E, 128)  * sh_j

    # graph #3 + graph pooling folded into A_out; contract edges first so the
    # final sum_j runs on T_B rows only.  Output is lane-dense (128 lanes).
    out_ref[...] = dot(dot(aout_ref[...], u), s2_ref[...])  # (T_B, 128)


def invariant_polynomial_pallas(q, A, A_out, const, s2, m1_bf16, m2_bf16):
    e_pad = q.shape[0]
    assert e_pad % T_EDGE == 0, "pad edge count to a multiple of T_EDGE"
    n_tiles = e_pad // T_EDGE
    b_pad = A_out.shape[0]
    assert b_pad % n_tiles == 0
    t_b = b_pad // n_tiles
    assert t_b % 8 == 0, "graphs per edge tile must be a multiple of 8"

    def const_spec(shape):
        return pl.BlockSpec(shape, lambda i: (0, 0))        # VMEM-resident across steps

    out_padded = pl.pallas_call(
        _invariant_polynomial_kernel,
        out_shape=jax.ShapeDtypeStruct((b_pad, OUT_PAD), jnp.float32),
        grid_spec=pltpu.PrefetchScalarGridSpec(
            num_scalar_prefetch=0,
            grid=(n_tiles,),
            in_specs=[
                pl.BlockSpec((T_EDGE, 4), lambda i: (i, 0)),        # q (per-edge geometry)
                pl.BlockSpec((T_EDGE, T_EDGE), lambda i: (i, i)),   # A: block-diagonal tiles
                pl.BlockSpec((t_b, T_EDGE), lambda i: (i, i)),      # A_out: block-diagonal
                const_spec(const.shape),                            # packed selector consts
                const_spec(s2.shape),                               # sum-over-j selector
                const_spec(m1_bf16.shape),                          # tp1 weights (bf16)
                const_spec(m2_bf16.shape),                          # tp2 weights (bf16)
            ],
            out_specs=pl.BlockSpec((t_b, OUT_PAD), lambda i: (i, 0)),
        ),
        compiler_params=pltpu.CompilerParams(
            dimension_semantics=("parallel",)),
    )(q, A, A_out, const, s2, m1_bf16, m2_bf16)
    return out_padded[:, :DIM_OUT]


# ----------------------------------------------------------------------------
# Pure-JAX reference of the same math (correctness check)
# ----------------------------------------------------------------------------
def reference_forward(edge_vec, mask, gsrc, sdstT, sbatchT, csh, m1, m2):
    mono = monomial_features(edge_vec, jnp)
    sh = (mono @ csh) * mask
    nf = (sdstT @ sh) * (NUM_NEIGHBORS ** -0.5)
    ef = jnp.einsum("ei,ej,ijk->ek", gsrc @ nf, sh, m1)
    nf = (sdstT @ ef) * (NUM_NEIGHBORS ** -0.5)
    ef = jnp.einsum("ei,ej,ijk->ek", gsrc @ nf, sh, m2)
    nf = (sdstT @ ef) * (NUM_NEIGHBORS ** -0.5)
    return (sbatchT @ nf) * (NUM_NODES ** -0.5)


if __name__ == "__main__":
    # ---- deterministic example inputs: a batch of many small (4-node) systems so
    # the edge-tile grid really has >1 step -----------------------------------
    num_copies = 32                     # copies of the 4-node / 2-graph base system
    nodes_per_copy, graphs_per_copy, edges_per_copy = 4, 2, 16
    num_nodes_total = num_copies * nodes_per_copy      # 128
    num_graphs = num_copies * graphs_per_copy          # 64
    E = num_copies * edges_per_copy                    # 512 = 2 edge tiles of 256

    key = jax.random.PRNGKey(0)
    base = np.array([[0.0, 0.0, 0.0],
                     [0.7, 0.1, 0.0],
                     [3.0, 3.0, 3.0],
                     [3.0, 3.7, 3.1]], np.float32)
    pos = (jnp.asarray(np.tile(base, (num_copies, 1)))
           + 0.15 * jax.random.normal(key, (num_nodes_total, 3), dtype=jnp.float32))
    batch_np = (np.repeat(np.arange(num_copies) * graphs_per_copy, nodes_per_copy)
                + np.tile(np.array([0, 0, 1, 1]), num_copies)).astype(np.int32)
    batch = jnp.asarray(batch_np)

    # ---- radius_graph(r=1.1) as dense masked all-pairs-per-copy edges (glue) ----
    copy_of_edge = np.repeat(np.arange(num_copies), edges_per_copy)
    i_loc = np.tile(np.repeat(np.arange(4), 4), num_copies)
    j_loc = np.tile(np.tile(np.arange(4), 4), num_copies)
    src = jnp.asarray((copy_of_edge * 4 + i_loc).astype(np.int32))
    dst = jnp.asarray((copy_of_edge * 4 + j_loc).astype(np.int32))
    edge_vec = pos[src] - pos[dst]                                   # (E, 3)
    dist2 = jnp.sum(edge_vec * edge_vec, axis=1)
    edge_mask = (src != dst) & (batch[src] == batch[dst]) & (dist2 <= 1.1 ** 2)
    mask = edge_mask.astype(jnp.float32)[:, None]                    # (E, 1)
    gsrc = jax.nn.one_hot(src, num_nodes_total, dtype=jnp.float32)       # (E, N)
    sdstT = jax.nn.one_hot(dst, num_nodes_total, dtype=jnp.float32).T    # (N, E)
    sbatchT = jax.nn.one_hot(batch, num_graphs, dtype=jnp.float32).T     # (B, N)

    # ---- parameters: tp1/tp2 weights folded with 3j tensors; values snapped to
    # bf16 so kernel (bf16) and reference (f32) use identical weights ----------
    w_rng = np.random.default_rng(0)
    m1 = build_fctp_tensor(IRREPS_SH, IRREPS_SH, IRREPS_MID, w_rng)      # (16, 16, 368)
    m2 = build_fctp_tensor(IRREPS_MID, IRREPS_SH, IRREPS_OUT, w_rng)     # (368, 16, 7)
    m1 = m1.astype(jnp.bfloat16).astype(np.float64)
    m2 = m2.astype(jnp.bfloat16).astype(np.float64)

    # ---- host folding: edge mask + 1/sqrt scales into the graph operators ----
    # Edges are grouped by graph, so A (E,E) and A_out (B,E) are block-diagonal
    # over edge tiles; the kernel only ever touches the diagonal blocks.
    q = jnp.concatenate([jnp.ones((E, 1), jnp.float32), edge_vec], axis=1)   # (E, 4)
    sdstT_ms = np.asarray(sdstT) * np.asarray(mask).T * (NUM_NEIGHBORS ** -0.5)
    A_np = np.asarray(gsrc) @ sdstT_ms                                       # (E, E)
    A_out_np = (np.asarray(sbatchT) * (NUM_NODES ** -0.5)) @ sdstT_ms        # (B, E)

    const, s2c, m1_bf16, m2_bf16 = build_kernel_constants(m1, m2)

    out = invariant_polynomial_pallas(
        q, jnp.asarray(A_np, jnp.float32), jnp.asarray(A_out_np, jnp.float32),
        const, s2c, m1_bf16, m2_bf16)
    out = jax.block_until_ready(out)

    with jax.default_matmul_precision("highest"):
        ref = reference_forward(edge_vec, mask, gsrc, sdstT, sbatchT,
                                jnp.asarray(_CSH_NP, jnp.float32),
                                jnp.asarray(m1, jnp.float32),
                                jnp.asarray(m2, jnp.float32))
        ref = jax.block_until_ready(ref)

    out_np = np.asarray(out)
    ref_np = np.asarray(ref)
    # bf16 activation rounding at the two weight matmuls: compare with error
    # measured relative to the output scale (weights themselves are identical).
    scale = float(np.max(np.abs(ref_np)))
    np.testing.assert_allclose(out_np, ref_np, rtol=2e-2, atol=1e-2 * scale)
    print("KERNEL_OK")
</pallas_src>

<mosaic_0001>
module attributes {stable_mosaic.version = 11 : i64} {
  func.func @_invariant_polynomial_kernel(%arg0: i32, %arg1: memref<256x4xf32, #tpu.memory_space<vmem>>, %arg2: memref<256x256xf32, #tpu.memory_space<vmem>>, %arg3: memref<32x256xf32, #tpu.memory_space<vmem>>, %arg4: memref<152x384xf32, #tpu.memory_space<vmem>>, %arg5: memref<128x128xf32, #tpu.memory_space<vmem>>, %arg6: memref<256x384xbf16, #tpu.memory_space<vmem>>, %arg7: memref<384x128xbf16, #tpu.memory_space<vmem>>, %arg8: memref<32x128xf32, #tpu.memory_space<vmem>>) attributes {dimension_semantics = [#tpu.dimension_semantics<parallel>], iteration_bounds = array<i64: 2>, scalar_prefetch = 0 : i64, scratch_operands = 0 : i64, tpu.core_type = #tpu.core_type<tc>, window_params = [{transform_indices = @transform_0, window_bounds = array<i64: 256, 4>}, {transform_indices = @transform_1, window_bounds = array<i64: 256, 256>}, {transform_indices = @transform_2, window_bounds = array<i64: 32, 256>}, {pipeline_mode = #tpu.pipeline_mode<synchronous>, transform_indices = @transform_3, window_bounds = array<i64: 152, 384>}, {pipeline_mode = #tpu.pipeline_mode<synchronous>, transform_indices = @transform_4, window_bounds = array<i64: 128, 128>}, {pipeline_mode = #tpu.pipeline_mode<synchronous>, transform_indices = @transform_5, window_bounds = array<i64: 256, 384>}, {pipeline_mode = #tpu.pipeline_mode<synchronous>, transform_indices = @transform_6, window_bounds = array<i64: 384, 128>}, {transform_indices = @transform_7, window_bounds = array<i64: 32, 128>}]} {
    %c0 = arith.constant 0 : index
    %c0_0 = arith.constant 0 : index
    %0 = vector.load %arg1[%c0, %c0_0] : memref<256x4xf32, #tpu.memory_space<vmem>>, vector<256x4xf32>
    %c0_1 = arith.constant 0 : index
    %c0_2 = arith.constant 0 : index
    %1 = vector.load %arg4[%c0_1, %c0_2] : memref<152x384xf32, #tpu.memory_space<vmem>>, vector<4x384xf32>
    %cst = arith.constant dense<0.000000e+00> : vector<256x384xf32>
    %2 = tpu.matmul %0, %1, %cst {dimension_numbers = #tpu.dot_dimension_numbers<[1], [0], [0], [1], [0, 0, 1, 1], [], []>} : vector<256x4xf32>, vector<4x384xf32>, vector<256x384xf32> -> vector<256x384xf32>
    %3 = vector.extract_strided_slice %2 {offsets = [0, 0], sizes = [256, 16], strides = [1, 1]} : vector<256x384xf32> to vector<256x16xf32>
    %4 = vector.extract_strided_slice %2 {offsets = [0, 128], sizes = [256, 16], strides = [1, 1]} : vector<256x384xf32> to vector<256x16xf32>
    %5 = arith.mulf %3, %4 : vector<256x16xf32>
    %c8 = arith.constant 8 : index
    %c0_3 = arith.constant 0 : index
    %6 = vector.load %arg4[%c8, %c0_3] : memref<152x384xf32, #tpu.memory_space<vmem>>, vector<16x64xf32>
    %cst_4 = arith.constant dense<0.000000e+00> : vector<256x64xf32>
    %7 = tpu.matmul %5, %6, %cst_4 {dimension_numbers = #tpu.dot_dimension_numbers<[1], [0], [0], [1], [0, 0, 1, 1], [], []>} : vector<256x16xf32>, vector<16x64xf32>, vector<256x64xf32> -> vector<256x64xf32>
    %8 = vector.extract_strided_slice %2 {offsets = [0, 256], sizes = [256, 64], strides = [1, 1]} : vector<256x384xf32> to vector<256x64xf32>
    %9 = arith.mulf %7, %8 : vector<256x64xf32>
    %c88 = arith.constant 88 : index
    %c0_5 = arith.constant 0 : index
    %10 = vector.load %arg4[%c88, %c0_5] : memref<152x384xf32, #tpu.memory_space<vmem>>, vector<64x384xf32>
    %cst_6 = arith.constant dense<0.000000e+00> : vector<256x384xf32>
    %11 = tpu.matmul %9, %10, %cst_6 {dimension_numbers = #tpu.dot_dimension_numbers<[1], [0], [0], [1], [0, 0, 1, 1], [], []>} : vector<256x64xf32>, vector<64x384xf32>, vector<256x384xf32> -> vector<256x384xf32>
    %c0_7 = arith.constant 0 : index
    %c0_8 = arith.constant 0 : index
    %12 = vector.load %arg2[%c0_7, %c0_8] : memref<256x256xf32, #tpu.memory_space<vmem>>, vector<256x256xf32>
    %cst_9 = arith.constant dense<0.000000e+00> : vector<256x64xf32>
    %13 = tpu.matmul %12, %9, %cst_9 {dimension_numbers = #tpu.dot_dimension_numbers<[1], [0], [0], [1], [0, 0, 1, 1], [], []>} : vector<256x256xf32>, vector<256x64xf32>, vector<256x64xf32> -> vector<256x64xf32>
    %c24 = arith.constant 24 : index
    %c0_10 = arith.constant 0 : index
    %14 = vector.load %arg4[%c24, %c0_10] : memref<152x384xf32, #tpu.memory_space<vmem>>, vector<64x256xf32>
    %cst_11 = arith.constant dense<0.000000e+00> : vector<256x256xf32>
    %15 = tpu.matmul %13, %14, %cst_11 {dimension_numbers = #tpu.dot_dimension_numbers<[1], [0], [0], [1], [0, 0, 1, 1], [], []>} : vector<256x64xf32>, vector<64x256xf32>, vector<256x256xf32> -> vector<256x256xf32>
    %16 = vector.extract_strided_slice %11 {offsets = [0, 0], sizes = [256, 256], strides = [1, 1]} : vector<256x384xf32> to vector<256x256xf32>
    %17 = arith.mulf %15, %16 : vector<256x256xf32>
    %18 = arith.truncf %17 : vector<256x256xf32> to vector<256x256xbf16>
    %c0_12 = arith.constant 0 : index
    %c0_13 = arith.constant 0 : index
    %19 = vector.load %arg6[%c0_12, %c0_13] : memref<256x384xbf16, #tpu.memory_space<vmem>>, vector<256x384xbf16>
    %cst_14 = arith.constant dense<0.000000e+00> : vector<256x384xf32>
    %20 = tpu.matmul %18, %19, %cst_14 {dimension_numbers = #tpu.dot_dimension_numbers<[1], [0], [0], [1], [0, 0, 1, 1], [], []>} : vector<256x256xbf16>, vector<256x384xbf16>, vector<256x384xf32> -> vector<256x384xf32>
    %c0_15 = arith.constant 0 : index
    %c0_16 = arith.constant 0 : index
    %21 = vector.load %arg2[%c0_15, %c0_16] : memref<256x256xf32, #tpu.memory_space<vmem>>, vector<256x256xf32>
    %cst_17 = arith.constant dense<0.000000e+00> : vector<256x384xf32>
    %22 = tpu.matmul %21, %20, %cst_17 {dimension_numbers = #tpu.dot_dimension_numbers<[1], [0], [0], [1], [0, 0, 1, 1], [], []>} : vector<256x256xf32>, vector<256x384xf32>, vector<256x384xf32> -> vector<256x384xf32>
    %23 = arith.truncf %22 : vector<256x384xf32> to vector<256x384xbf16>
    %c0_18 = arith.constant 0 : index
    %c0_19 = arith.constant 0 : index
    %24 = vector.load %arg7[%c0_18, %c0_19] : memref<384x128xbf16, #tpu.memory_space<vmem>>, vector<384x128xbf16>
    %cst_20 = arith.constant dense<0.000000e+00> : vector<256x128xf32>
    %25 = tpu.matmul %23, %24, %cst_20 {dimension_numbers = #tpu.dot_dimension_numbers<[1], [0], [0], [1], [0, 0, 1, 1], [], []>} : vector<256x384xbf16>, vector<384x128xbf16>, vector<256x128xf32> -> vector<256x128xf32>
    %26 = vector.extract_strided_slice %11 {offsets = [0, 256], sizes = [256, 128], strides = [1, 1]} : vector<256x384xf32> to vector<256x128xf32>
    %27 = arith.mulf %26, %25 : vector<256x128xf32>
    %c0_21 = arith.constant 0 : index
    %c0_22 = arith.constant 0 : index
    %28 = vector.load %arg3[%c0_21, %c0_22] : memref<32x256xf32, #tpu.memory_space<vmem>>, vector<32x256xf32>
    %cst_23 = arith.constant dense<0.000000e+00> : vector<32x128xf32>
    %29 = tpu.matmul %28, %27, %cst_23 {dimension_numbers = #tpu.dot_dimension_numbers<[1], [0], [0], [1], [0, 0, 1, 1], [], []>} : vector<32x256xf32>, vector<256x128xf32>, vector<32x128xf32> -> vector<32x128xf32>
    %c0_24 = arith.constant 0 : index
    %c0_25 = arith.constant 0 : index
    %30 = vector.load %arg5[%c0_24, %c0_25] : memref<128x128xf32, #tpu.memory_space<vmem>>, vector<128x128xf32>
    %cst_26 = arith.constant dense<0.000000e+00> : vector<32x128xf32>
    %31 = tpu.matmul %29, %30, %cst_26 {dimension_numbers = #tpu.dot_dimension_numbers<[1], [0], [0], [1], [0, 0, 1, 1], [], []>} : vector<32x128xf32>, vector<128x128xf32>, vector<32x128xf32> -> vector<32x128xf32>
    %c0_27 = arith.constant 0 : index
    %c0_28 = arith.constant 0 : index
    %32 = vector.load %arg8[%c0_27, %c0_28] : memref<32x128xf32, #tpu.memory_space<vmem>>, vector<32x128xf32>
    tpu.vector_store %arg8[%c0_27, %c0_28], %31 {strides = array<i32>} : memref<32x128xf32, #tpu.memory_space<vmem>>, vector<32x128xf32>,
    return
  }
  func.func @transform_0(%arg0: i32) -> (i32, i32) {
    %c0_i32 = arith.constant 0 : i32
    %c0_i32_0 = arith.constant 0 : i32
    return %arg0, %c0_i32 : i32, i32
  }
  func.func @transform_1(%arg0: i32) -> (i32, i32) {
    %c0_i32 = arith.constant 0 : i32
    return %arg0, %arg0 : i32, i32
  }
  func.func @transform_2(%arg0: i32) -> (i32, i32) {
    %c0_i32 = arith.constant 0 : i32
    return %arg0, %arg0 : i32, i32
  }
  func.func @transform_3(%arg0: i32) -> (i32, i32) {
    %c0_i32 = arith.constant 0 : i32
    %c0_i32_0 = arith.constant 0 : i32
    %c0_i32_1 = arith.constant 0 : i32
    return %c0_i32, %c0_i32_0 : i32, i32
  }
  func.func @transform_4(%arg0: i32) -> (i32, i32) {
    %c0_i32 = arith.constant 0 : i32
    %c0_i32_0 = arith.constant 0 : i32
    %c0_i32_1 = arith.constant 0 : i32
    return %c0_i32, %c0_i32_0 : i32, i32
  }
  func.func @transform_5(%arg0: i32) -> (i32, i32) {
    %c0_i32 = arith.constant 0 : i32
    %c0_i32_0 = arith.constant 0 : i32
    %c0_i32_1 = arith.constant 0 : i32
    return %c0_i32, %c0_i32_0 : i32, i32
  }
  func.func @transform_6(%arg0: i32) -> (i32, i32) {
    %c0_i32 = arith.constant 0 : i32
    %c0_i32_0 = arith.constant 0 : i32
    %c0_i32_1 = arith.constant 0 : i32
    return %c0_i32, %c0_i32_0 : i32, i32
  }
  func.func @transform_7(%arg0: i32) -> (i32, i32) {
    %c0_i32 = arith.constant 0 : i32
    %c0_i32_0 = arith.constant 0 : i32
    return %arg0, %c0_i32 : i32, i32
  }
}

</mosaic_0001>

<bundles_post_ra>
// kernel: tpu_custom_call.1
= control target key start
LH: loop header
LB: loop body
LE: loop exit
PB: predicated region body
PF: predicated region fallthrough
CT: control target
= control target key end

     0   :  { %s8149_s0 = inlined_call_operand.vmem [shape: f32[512,4], index: 0, kind: input, shape index: {}]   ;;  %s8150_s1 = inlined_call_operand.hbm [shape: f32[512,512], index: 1, kind: input, shape index: {}]   ;;  %s8151_s2 = inlined_call_operand.hbm [shape: f32[64,512], index: 2, kind: input, shape index: {}]   ;;  %s8152_s3 = inlined_call_operand.vmem [shape: f32[152,384], index: 3, kind: input, shape index: {}]   ;;  %s8153_s4 = inlined_call_operand.hbm [shape: f32[128,128], index: 4, kind: input, shape index: {}]   ;;  %s8154_s5 = inlined_call_operand.hbm [shape: bf16[256,384], index: 5, kind: input, shape index: {}]   ;;  %s8155_s6 = inlined_call_operand.hbm [shape: bf16[384,128], index: 6, kind: input, shape index: {}]   ;;  %s8156_s7 = inlined_call_operand.hbm [shape: f32[64,128], index: 7, kind: output, shape index: {}]  }
   0x1   :  { %8174 = sst [smem:[#allocation71_spill]] %s8150_s1 }
   0x2   :  { %8175 = sst [smem:[#allocation72_spill]] %s8153_s4 }
   0x3   :  { %8176 = sst [smem:[#allocation73_spill]] %s8156_s7 }
   0x4   :  { %12 = vsyncpa [#allocation3], 0 }
   0x5   :  { %14 = vsyncpa [#allocation3 + $0x1], 0 }
   0x6   :  { %15 = vsyncpa [#allocation6], 0 }
   0x7   :  { %17 = vsyncpa [#allocation6 + $0x1], 0 }
   0x8   :  { %18 = vsyncpa [#allocation9], 0 }
   0x9   :  { %19 = vsyncpa [#allocation4], 0 }
   0xa   :  { %21 = vsyncpa [#allocation4 + $0x1], 0  ;;  %s6718_s24 = smov 0   ;;  %s6720_s25 = smov 0  }
   0xb   :  { %s6722_s26 = smov 0   ;;  %s6724_s27 = smov 0  }
   0xc   :  { %s6726_s28 = smov 0   ;;  %s6728_s29 = smov 0  }
   0xd   :  { %s6730_s30 = smov 0  }
   0xe LB: > { %8177 = sst [smem:[#allocation17_spill]] %s6633_s24  ;;  %s6752_s8 = sadd.s32 4294967295, %s6657_s30   ;;  %s6657_s30 = sphi %s6730_s30, %s8305_s30   ;;  %s6653_s29 = sphi %s6728_s29, %s8313_s29   ;;  %s6649_s28 = sphi %s6726_s28, %s8312_s28   ;;  %s6645_s27 = sphi %s6724_s27, %s8311_s27   ;;  %s6641_s26 = sphi %s6722_s26, %s8307_s26   ;;  %s6637_s25 = sphi %s6720_s25, %s8310_s25   ;;  %s6633_s24 = sphi %s6718_s24, %s8309_s24  }
   0xf   : > { %8178 = sst [smem:[#allocation18_spill]] %s6641_s26  ;;  %s4891_s9 = sadd.s32 4294967294, %s6657_s30  }
  0x10   : > { %s6756_s10 = sadd.s32 1, %s6657_s30   ;;  %s62_s11 = sadd.s32 1, %s6653_s29 }
  0x11   : > { %8179 = sst [smem:[#allocation19_spill]] %s6756_s10  ;;  %s57_s12 = ssub.s32 %s6657_s30, %s6756_s10 }
  0x12   : > { %p69_p0 = scmp.ne.s32.totalorder %s6653_s29, %s6649_s28  ;;  %s59_s13 = sor.u32 %s57_s12, %s57_s12 }
  0x13   : > { %p70_p1 = scmp.eq.s32.totalorder %s6657_s30, 0  ;;  %p60_p2 = scmp.eq.s32.totalorder %s59_s13, 0 }
  0x14   : > { %p75_p3 = scmp.ne.s32.totalorder %s6649_s28, %s6645_s27  ;;  %p8157_p5 = scmp.eq.s32.totalorder %s6752_s8, 0 }
  0x15   : > { %p6765_p4 = por %p70_p1, %p69_p0  ;;  %p198_p7 = scmp.eq.s32.totalorder %s57_s12, 0 }
  0x16   : > { %s6771_s15 = scalar_select %p60_p2, %s6653_s29, %s62_s11  }
  0x17   : > { %p6775_p6 = por %p8157_p5, %p75_p3  ;;  %s200_s17 = sadd.s32 1, %s6641_s26 }
  0x18   : > { %8181 = sst [smem:[#allocation20_spill]] %s6771_s15  ;;  %p210_p8 = scmp.ne.s32.totalorder %s6641_s26, %s6637_s25 }
  0x19   : > { %s8182_s16 = scalar_select %p6775_p6, 1, 0 }
  0x1a   : > { %s6783_s18 = scalar_select %p198_p7, %s6641_s26, %s200_s17  }
  0x1b   : > { %p211_p9 = scmp.eq.s32.totalorder %s6752_s8, 1  ;;  %p216_p10 = scmp.ne.s32.totalorder %s6637_s25, %s6633_s24 }
  0x1c   : > { %8183 = sst [smem:[#allocation21_spill]] %s6783_s18  ;;  %p217_p11 = scmp.eq.s32.totalorder %s4891_s9, 1 }
  0x1d   : > { %p4892_p12 = scmp.ge.s32.totalorder %s6657_s30, 1  ;;  %p6789_p13 = por %p211_p9, %p210_p8 }
  0x1e   : > { %p224_p0 = scmp.lt.s32.totalorder %s6657_s30, 3  ;;  %p6794_p1 = por %p217_p11, %p216_p10 }
  0x1f   : > { %s8184_s19 = scalar_select %p6789_p13, 1, 0 }
  0x20   : > { %s8186_s20 = scalar_select %p6794_p1, 1, 0 }
  0x21   : > { %8185 = sst [smem:[#allocation22_spill]] %s8184_s19  ;;  %p6798_p2 = pnand %p4892_p12, %p224_p0 }
  0x22   : > { %8187 = sst [smem:[#allocation23_spill]] %s8186_s20  ;;  %s6659_s22 = smov [#allocation7]  }
  0x23   : > { %s8188_s21 = scalar_select %p6798_p2, 1, 0 }
  0x24   : > { %s239_s23 = sshll.u32 %s6659_s22, 4  ;;  %p6158_p3 = pneg %p6798_p2  ;;  %s240_s23 = int_to_ptr.vmem [resolvable:$true] %s239_s23 }
  0x25   : > { %p6182_p9 = scmp.lt.s32.totalorder %s6657_s30, 2  ;;  %s8191_s4 = sld [smem:[#allocation72_spill]] }
  0x26   : > { %p6807_p8 = pnand %p6158_p3, %p8157_p5 }
  0x27   : > { %p6814_p10 = pnand %p6182_p9, %p6765_p4 }
  0x28   : > { %p6826_p12 = pneg %p6807_p8 }
  0x29   : > { %s8190_s9 = scalar_select %p6814_p10, 1, 0 }
  0x2b   : > { %s6411_s13 = scalar_lea.hbm %s8191_s4, 2048 }
  0x2c   : > { %p6412_p11 = scmp.ne.s32.totalorder %s8191_s4, %s6411_s13  ;;  %p6418_p3 = scmp.lt.u32.totalorder %s6411_s13, %s8191_s4 }
  0x2e   : > { %p6414_p0 = pnand %p6826_p12, %p6412_p11 }
  0x30   : > { %p6415_p4 = pneg %p6414_p0 }
  0x32   : > { %p6420_p9 = pnand %p6418_p3, %p6415_p4 }
  0x34   : > { %6423 = shalt.err (!%p6420_p9)
}
  0x35   : > { %s6424_s11 = scalar_lea.vmem %s240_s23, 2048  ;;  %p6432_p13 = scmp.lt.s32.totalorder %s240_s23, %s240_s23 }
  0x36   : > { %p6425_p7 = scmp.ne.s32.totalorder %s240_s23, %s6424_s11  ;;  %p6433_p6 = scmp.lt.s32.totalorder %s6424_s11, %s6424_s11 }
  0x38   : > { %p6427_p5 = pnand %p6425_p7, %p6826_p12  ;;  %p6434_p2 = por %p6433_p6, %p6432_p13 }
  0x3a   : > { %p6428_p1 = pneg %p6427_p5 }
  0x3c   : > { %p6435_p10 = pnand %p6434_p2, %p6428_p1 }
  0x3e   : > { %6438 = shalt.err (!%p6435_p10)
}
  0x3f   : > { %s6660_s12 = smov 128   ;;  %s6661_s17 = smov 8  }
  0x40   : > { %6161 = dma.hbm_to_vmem [thread:$0]  (!%p6807_p8), %s8191_s4, 2048, %s240_s23, [#allocation6], %s6660_s12, %s6660_s12, %s6661_s17  }
  0x41   : > { %s6662_s22 = smov [#allocation8]   ;;  %s6439_s20 = scalar_lea.hbm %s8154_s5, 6144 }
  0x42   : > { %s252_s14 = sshll.u32 %s6662_s22, 4  ;;  %p6440_p5 = scmp.ne.s32.totalorder %s8154_s5, %s6439_s20  ;;  %s253_s14 = int_to_ptr.vmem [resolvable:$true] %s252_s14 }
  0x43   : > { %p6446_p1 = scmp.lt.u32.totalorder %s6439_s20, %s8154_s5 }
  0x44   : > { %p6442_p6 = pnand %p6440_p5, %p6826_p12 }
  0x46   : > { %p6443_p13 = pneg %p6442_p6 }
  0x48   : > { %p6448_p2 = pnand %p6446_p1, %p6443_p13 }
  0x4a   : > { %6451 = shalt.err (!%p6448_p2)
}
  0x4b   : > { %s6452_s23 = scalar_lea.vmem %s253_s14, 6144  ;;  %p6460_p0 = scmp.lt.s32.totalorder %s253_s14, %s253_s14 }
  0x4c   : > { %p6453_p7 = scmp.ne.s32.totalorder %s253_s14, %s6452_s23  ;;  %p6461_p4 = scmp.lt.s32.totalorder %s6452_s23, %s6452_s23 }
  0x4e   : > { %p6455_p10 = pnand %p6453_p7, %p6826_p12  ;;  %p6462_p3 = por %p6461_p4, %p6460_p0 }
  0x50   : > { %p6456_p11 = pneg %p6455_p10 }
  0x52   : > { %p6463_p9 = pnand %p6462_p3, %p6456_p11 }
  0x54   : > { %6466 = shalt.err (!%p6463_p9)
}
  0x55   : > { %s6663_s24 = smov 192   ;;  %s6664_s26 = smov 12  }
  0x56   : > { %6164 = dma.hbm_to_vmem [thread:$0]  (!%p6807_p8), %s8154_s5, 6144, %s253_s14, [#allocation9], %s6663_s24, %s6663_s24, %s6664_s26  }
  0x57   : > { %s6665_s19 = smov [#allocation10]   ;;  %s6861_s12 = sand.u32 1, %s6653_s29  }
  0x58   : > { %s265_s20 = sshll.u32 %s6665_s19, 4  ;;  %s6467_s13 = scalar_lea.hbm %s8155_s6, 3072  ;;  %s266_s20 = int_to_ptr.vmem [resolvable:$true] %s265_s20 }
  0x59   : > { %p6468_p5 = scmp.ne.s32.totalorder %s8155_s6, %s6467_s13  ;;  %p6474_p1 = scmp.lt.u32.totalorder %s6467_s13, %s8155_s6 }
  0x5b   : > { %p6470_p6 = pnand %p6468_p5, %p6826_p12 }
  0x5d   : > { %p6471_p13 = pneg %p6470_p6 }
  0x5f   : > { %p6476_p2 = pnand %p6474_p1, %p6471_p13 }
  0x61   : > { %6479 = shalt.err (!%p6476_p2)
}
  0x62   : > { %s6480_s14 = scalar_lea.vmem %s266_s20, 3072  ;;  %p6488_p0 = scmp.lt.s32.totalorder %s266_s20, %s266_s20 }
  0x63   : > { %p6481_p7 = scmp.ne.s32.totalorder %s266_s20, %s6480_s14  ;;  %p6489_p4 = scmp.lt.s32.totalorder %s6480_s14, %s6480_s14 }
  0x65   : > { %p6483_p10 = pnand %p6481_p7, %p6826_p12  ;;  %p6490_p3 = por %p6489_p4, %p6488_p0 }
  0x67   : > { %p6484_p11 = pneg %p6483_p10 }
  0x69   : > { %p6491_p9 = pnand %p6490_p3, %p6484_p11 }
  0x6b   : > { %6494 = shalt.err (!%p6491_p9)
}
  0x6c   : > { %s6666_s24 = smov 64   ;;  %s6667_s4 = smov 4  }
  0x6d   : > { %6167 = dma.hbm_to_vmem [thread:$0]  (!%p6807_p8), %s8155_s6, 3072, %s266_s20, [#allocation9], %s6666_s24, %s6666_s24, %s6667_s4  }
  0x6e   : > { %s4897_s7 = sshll.u32 %s6861_s12, 9  ;;  %s4899_s10 = sshll.u32 %s6657_s30, 1 }
  0x6f   : > { %s5188_s19 = sshll.u32 %s6657_s30, 7  ;;  %s292_s17 = scalar_lea.vmem [#allocation2], %s4897_s7 }
  0x70   : > { %s302_s18 = sshll.u32 %s292_s17, 4  ;;  %s299_s13 = sadd.s32 %s5188_s19, %s4899_s10  ;;  %s6886_s18 = int_to_ptr.vmem [resolvable:$true] %s302_s18 }
  0x71   : > { %s4901_s22 = sshll.u32 %s299_s13, 7  ;;  %s8193_s1 = sld [smem:[#allocation71_spill]] }
  0x72   : > { %s5189_s27 = sshll.u32 %s6657_s30, 4  ;;  %s289_s20 = scalar_lea.sflag [#allocation3], %s6861_s12 }
  0x73   : > { %p8194_p12 = scmp.ne.s32.totalorder %s8190_s9, 0 }
  0x75   : > { %p6497_p5 = pneg %p8194_p12 }
  0x77   : > { %s6891_s14 = scalar_lea.hbm %s8193_s1, %s4901_s22  ;;  %s6500_s15 = scalar_lea.hbm %s8193_s1, 32768 }
  0x78   : > { %s6495_s24 = scalar_lea.hbm %s6891_s14, 8192  ;;  %p6501_p1 = scmp.lt.u32.totalorder %s6891_s14, %s8193_s1 }
  0x79   : > { %p6496_p8 = scmp.ne.s32.totalorder %s6891_s14, %s6495_s24  ;;  %p6502_p2 = scmp.lt.u32.totalorder %s6500_s15, %s6495_s24 }
  0x7a   : > { %p6504_p10 = scmp.lt.u32.totalorder %s6495_s24, %s6891_s14 }
  0x7b   : > { %p6498_p6 = pnand %p6497_p5, %p6496_p8  ;;  %p6503_p7 = por %p6502_p2, %p6501_p1 }
  0x7d   : > { %p6499_p13 = pneg %p6498_p6  ;;  %p6505_p11 = por %p6504_p10, %p6503_p7 }
  0x7f   : > { %p6506_p0 = pnand %p6505_p11, %p6499_p13 }
  0x81   : > { %6509 = shalt.err (!%p6506_p0)
}
  0x82   : > { %s6510_s17 = scalar_lea.vmem %s6886_s18, 8192  ;;  %s6668_s13 = smov [#allocation2]  }
  0x83   : > { %p6511_p4 = scmp.ne.s32.totalorder %s6886_s18, %s6510_s17  ;;  %s6515_s22 = sshll.u32 %s6668_s13, 4  ;;  %s6516_s22 = int_to_ptr.vmem [resolvable:$false] %s6515_s22 }
  0x84   : > { %s6517_s11 = scalar_lea.vmem %s6516_s22, 16384  ;;  %p6518_p8 = scmp.lt.s32.totalorder %s6886_s18, %s6516_s22 }
  0x85   : > { %p6513_p3 = pnand %p6511_p4, %p6497_p5  ;;  %p6519_p6 = scmp.lt.s32.totalorder %s6517_s11, %s6510_s17 }
  0x87   : > { %p6514_p9 = pneg %p6513_p3  ;;  %p6520_p1 = por %p6519_p6, %p6518_p8 }
  0x89   : > { %p6521_p2 = pnand %p6520_p1, %p6514_p9 }
  0x8b   : > { %6524 = shalt.err (!%p6521_p2)
}
  0x8c   : > { %s6669_s23 = smov 512   ;;  %s6670_s24 = smov 256  }
  0x8d   : > { %s6671_s4 = smov 16   ;;  %s323_s26 = sadd.s32 %s5189_s27, %s4899_s10 }
  0x8e   : > { %6171 = dma.hbm_to_vmem [thread:$0]  (!%p8194_p12), %s6891_s14, 8192, %s6886_s18, %s289_s20, %s6669_s23, %s6670_s24, %s6671_s4  }
  0x8f   : > { %s312_s15 = sand.u32 1, %s6657_s30   ;;  %s4906_s7 = sshll.u32 %s323_s26, 7 }
  0x90   : > { %s4902_s19 = sshll.u32 %s6861_s12, 6  ;;  %s6934_s22 = scalar_lea.hbm %s8151_s2, %s4906_s7 }
  0x91   : > { %s316_s11 = scalar_lea.vmem [#allocation5], %s4902_s19  ;;  %s6938_s18 = scalar_lea.sflag [#allocation6], %s312_s15 }
  0x92   : > { %s326_s1 = sshll.u32 %s316_s11, 4  ;;  %s6525_s14 = scalar_lea.hbm %s6934_s22, 1024  ;;  %s6936_s1 = int_to_ptr.vmem [resolvable:$true] %s326_s1 }
  0x93   : > { %p6526_p13 = scmp.ne.s32.totalorder %s6934_s22, %s6525_s14  ;;  %s6530_s27 = scalar_lea.hbm %s8151_s2, 4096 }
  0x94   : > { %p6531_p11 = scmp.lt.u32.totalorder %s6934_s22, %s8151_s2  ;;  %p6532_p0 = scmp.lt.u32.totalorder %s6530_s27, %s6525_s14 }
  0x95   : > { %p6528_p7 = pnand %p6526_p13, %p6497_p5  ;;  %p6534_p3 = scmp.lt.u32.totalorder %s6525_s14, %s6934_s22 }
  0x96   : > { %p6533_p4 = por %p6532_p0, %p6531_p11 }
  0x97   : > { %p6529_p10 = pneg %p6528_p7 }
  0x98   : > { %p6535_p9 = por %p6534_p3, %p6533_p4 }
  0x9a   : > { %p6536_p8 = pnand %p6535_p9, %p6529_p10 }
  0x9c   : > { %6539 = shalt.err (!%p6536_p8)
}
  0x9d   : > { %s6540_s15 = scalar_lea.vmem %s6936_s1, 1024  ;;  %s6672_s7 = smov [#allocation5]  }
  0x9e   : > { %p6541_p6 = scmp.ne.s32.totalorder %s6936_s1, %s6540_s15  ;;  %s6545_s19 = sshll.u32 %s6672_s7, 4  ;;  %s6546_s19 = int_to_ptr.vmem [resolvable:$false] %s6545_s19 }
  0x9f   : > { %s6547_s17 = scalar_lea.vmem %s6546_s19, 2048  ;;  %p6548_p13 = scmp.lt.s32.totalorder %s6936_s1, %s6546_s19 }
  0xa0   : > { %p6543_p1 = pnand %p6541_p6, %p6497_p5  ;;  %p6549_p7 = scmp.lt.s32.totalorder %s6547_s17, %s6540_s15 }
  0xa2   : > { %p6544_p2 = pneg %p6543_p1  ;;  %p6550_p11 = por %p6549_p7, %p6548_p13 }
  0xa4   : > { %p6551_p0 = pnand %p6550_p11, %p6544_p2 }
  0xa6   : > { %6554 = shalt.err (!%p6551_p0)
}
  0xa7   : > { %6174 = dma.hbm_to_vmem [thread:$0]  (!%p8194_p12), %s6934_s22, 1024, %s6936_s1, %s6938_s18, %s6669_s23, %s6670_s24, %s6671_s4  }
  0xa8   : > { %p8195_p5 = scmp.ne.s32.totalorder %s8188_s21, 0 }
  0xaa   : > { %338 = sbr.rel (%p8195_p5) target bundleno = 2552 (0x9f8), region = 48 }
  0xb1   : > { %s340_s13 = sand.u32 1, %s6649_s28   ;;  %p8196_p10 = scmp.ne.s32.totalorder %s8182_s16, 0 }
  0xb2   : > { %s4908_s11 = sshll.u32 %s340_s13, 9  ;;  %s341_s14 = scalar_lea.sflag [#allocation3], %s340_s13 }
  0xb3   : > { %s6970_s12 = scalar_lea.vmem [#allocation2], %s4908_s11 }
  0xb4   : > { %6612 = dma.done.wait (%p8196_p10), %s341_s14, 8192  }
  0xb5   : > { %6614 = vsyncadd (%p8196_p10), %s341_s14, 4294959104  ;;  %s349_s9 = sand.u32 1, %s6752_s8   ;;  %s4909_s10 = sshll.u32 %s340_s13, 6 }
  0xb6   : > { %s350_s1 = scalar_lea.sflag [#allocation6], %s349_s9  ;;  %s6977_s23 = scalar_lea.vmem [#allocation5], %s4909_s10 }
  0xb7   : > { %6616 = dma.done.wait (%p8196_p10), %s350_s1, 1024  }
  0xb8   : > { %6618 = vsyncadd (%p8196_p10), %s350_s1, 4294966272  ;;  %p8197_p12 = scmp.eq.s32.totalorder %s6752_s8, 0 }
  0xba   : > { %6620 = dma.done.wait (%p8197_p12), [#allocation6], 2048   ;;  %p8198_p4 = pmov %p8197_p12 }
  0xbc   : > { %6622 = vsyncadd (%p8198_p4), [#allocation6], 4294965248  ;;  %p8199_p3 = pmov %p8198_p4 }
  0xbe   : > { %6624 = dma.done.wait (%p8199_p3), [#allocation9], 9216   ;;  %p8200_p9 = pmov %p8199_p3 }
  0xbf   : > { %s4914_s21 = sshll.u32 %s6752_s8, 5  ;;  %v8172_v0 = vmov 0.0   ;;  %vm550_vm0 = vcmask 1043456   ;;  %v451_v1 = vld [vmem:[%s8152_s3 + $0x8] sm:$0xf]  ;;  %vm453_vm1 = vcmask 31744  }
  0xc0   : > { %6626 = vsyncadd (%p8200_p9), [#allocation9], 4294958080  ;;  %624 = vmatprep.mubr.f32.mxu0 %v8172_v0  ;;  %p407_p8 = scmp.lt.s32.totalorder %s4914_s21, 63  ;;  %810 = vmatprep.mubr.f32.mxu1 %v8172_v0  ;;  %v450_v2 = vld [vmem:[%s8152_s3] sm:$0xf]  ;;  %v1074_v36 = vld [vmem:[%s8152_s3 + $0x18] sm:$0xff] }
  0xc1   : > { %4916 = vmatprep.subr.msk.mxu0 %vm550_vm0, %v451_v1  ;;  %6138 = vmatprep.subr.msk.mxu1 %vm550_vm0, %v451_v1  ;;  %v452_v8 = vld [vmem:[%s8152_s3 + $0x10] sm:$0xf]  ;;  %v1434_v40 = vld [vmem:[%s8152_s3 + $0x128] sm:$0xff]  ;;  %v1433_v43 = vld [vmem:[%s8152_s3 + $0x120] sm:$0xff]  ;;  %vm1076_vm2 = vcmask 130048   ;;  %vm1454_vm3 = vcmask 523264  }
  0xc2   : > { %s8315_s21 = smov (!%p407_p8, %s4914_s21), 63  ;;  %4917 = vmatpush1.msk.msra.mxu0 %vm550_vm0, %v450_v2  ;;  %6139 = vmatpush1.msk.msra.mxu1 %vm550_vm0, %v450_v2  ;;  %v1075_v37 = vld [vmem:[%s8152_s3 + $0x30] sm:$0xff]  ;;  %v1430_v41 = vld [vmem:[%s8152_s3 + $0x108] sm:$0xff]  ;;  %v1432_v44 = vld [vmem:[%s8152_s3 + $0x118] sm:$0xff]  ;;  %s5190_s4 = sshll.u32 %s6752_s8, 9 }
  0xc3   : > { %s4915_s16 = sshll.u32 %s8315_s21, 3  ;;  %5610 = vmatprep.subr.msk.mxu1 %vm550_vm0, %v452_v8  ;;  %v5862_v38 = vpack.c.bf16 %v1075_v37, %v1074_v36  ;;  %v1431_v39 = vld [vmem:[%s8152_s3 + $0x110] sm:$0xff]  ;;  %v5868_v46 = vpack.c.bf16 %v1433_v43, %v1430_v41  ;;  %v1437_v48 = vld [vmem:[%s8152_s3 + $0x140] sm:$0xff]  ;;  %v1440_v49 = vld [vmem:[%s8152_s3 + $0x158] sm:$0xff]  ;;  %s8297_s21 = sld [smem:[#allocation22_spill]] }
  0xc4   : > { %s6997_s22 = scalar_lea.vmem %s8149_s0, %s4915_s16  ;;  %v5866_v42 = vpack.c.bf16 %v1434_v40, %v1431_v39  ;;  %v1435_v45 = vld [vmem:[%s8152_s3 + $0x130] sm:$0xff]  ;;  %v1436_v50 = vld [vmem:[%s8152_s3 + $0x138] sm:$0xff]  ;;  %v5870_v52 = vpack.c.bf16 %v1440_v49, %v1437_v48  ;;  %v1446_v57 = vld [vmem:[%s8152_s3 + $0x188] sm:$0xff]  ;;  %s8298_s27 = sld [smem:[#allocation73_spill]] }
  0xc5   : > { %v418_v3 = vld [vmem:[%s6997_s22] sm:$0xff]  ;;  %v419_v4 = vld [vmem:[%s6997_s22 + $0x8] sm:$0xff]  ;;  %v420_v5 = vld [vmem:[%s6997_s22 + $0x10] sm:$0xff]  ;;  %v5882_v47 = vpack.c.bf16 %v1435_v45, %v1432_v44  ;;  %s6675_s8 = smov [#allocation11]  }
  0xc6   : > { %4918 = vmatmul.mubr.msk.f32.vlgmr.msra.gmra.mrb[0].mxu0 %vm453_vm1, %v418_v3  ;;  %v421_v6 = vld [vmem:[%s6997_s22 + $0x18] sm:$0xff]  ;;  %v422_v9 = vld [vmem:[%s6997_s22 + $0x20] sm:$0xff]  ;;  %v423_v10 = vld [vmem:[%s6997_s22 + $0x28] sm:$0xff]  ;;  %5867 = vmatprep.subr.bf16.mxu0 %v5866_v42  ;;  %s6559_s19 = sshll.u32 %s6675_s8, 4  ;;  %s6560_s19 = int_to_ptr.vmem [resolvable:$false] %s6559_s19 }
  0xc7   : > { %630 = vmatprep.mubr.f32.mxu0 %v8172_v0  ;;  %v7019_v7 = vld [vmem:[%s6997_s22 + $0xf8] sm:$0xff]  ;;  %v424_v11 = vld [vmem:[%s6997_s22 + $0x30] sm:$0xff]  ;;  %v426_v13 = vld [vmem:[%s6997_s22 + $0x40] sm:$0xff]  ;;  %5869 = vmatpush1.bf16.msra.mxu0 %v5868_v46  ;;  %s6561_s17 = scalar_lea.vmem %s6560_s19, 1024 }
  0xc8   : > { %4949 = vmatmul.mubr.msk.f32.vlgmr.msra.gmra.mrb[0].mxu1 %vm453_vm1, %v7019_v7  ;;  %v425_v12 = vld [vmem:[%s6997_s22 + $0x38] sm:$0xff]  ;;  %v427_v14 = vld [vmem:[%s6997_s22 + $0x48] sm:$0xff]  ;;  %v428_v15 = vld [vmem:[%s6997_s22 + $0x50] sm:$0xff]  ;;  %5871 = vmatprep.subr.bf16.mxu0 %v5870_v52 }
  0xc9   : > { %5612 = vmatprep.mubr.msk.f32.mxu1 %vm453_vm1, %v418_v3  ;;  %5611 = vmatpush3.msk.msra.mxu1 %vm550_vm0, %v452_v8  ;;  %v429_v16 = vld [vmem:[%s6997_s22 + $0x58] sm:$0xff]  ;;  %v430_v17 = vld [vmem:[%s6997_s22 + $0x60] sm:$0xff]  ;;  %v431_v18 = vld [vmem:[%s6997_s22 + $0x68] sm:$0xff]  ;;  %p8300_p1 = scmp.ne.s32.totalorder %s8297_s21, 0 }
  0xca   : > { %4919 = vmatmul.mubr.msk.f32.gmra.mrb[2].mxu0 %vm453_vm1, %v419_v4  ;;  %v432_v19 = vld [vmem:[%s6997_s22 + $0x70] sm:$0xff]  ;;  %v433_v20 = vld [vmem:[%s6997_s22 + $0x78] sm:$0xff]  ;;  %v434_v21 = vld [vmem:[%s6997_s22 + $0x80] sm:$0xff]  ;;  %5863 = vmatprep.subr.bf16.mxu1 %v5862_v38  ;;  %s8299_s20 = smov %s8298_s27  ;;  %s8096_s26 = scalar_lea.hbm %s8298_s27, %s5190_s4 }
  0xcb   : > { %636 = vmatprep.mubr.f32.mxu0 %v8172_v0  ;;  %v435_v22 = vld [vmem:[%s6997_s22 + $0x88] sm:$0xff]  ;;  %v436_v23 = vld [vmem:[%s6997_s22 + $0x90] sm:$0xff]  ;;  %v437_v24 = vld [vmem:[%s6997_s22 + $0x98] sm:$0xff] }
  0xcc   : > { %5613 = vmatmul.mubr.msk.f32.vlgmr.msra.gmra.mrb[2].mxu1 %vm453_vm1, %v419_v4  ;;  %v438_v25 = vld [vmem:[%s6997_s22 + $0xa0] sm:$0xff]  ;;  %v439_v26 = vld [vmem:[%s6997_s22 + $0xa8] sm:$0xff]  ;;  %v440_v27 = vld [vmem:[%s6997_s22 + $0xb0] sm:$0xff] }
  0xcd   : > { %5615 = vmatprep.mubr.msk.f32.mxu1 %vm453_vm1, %v420_v5  ;;  %v441_v28 = vld [vmem:[%s6997_s22 + $0xb8] sm:$0xff]  ;;  %v442_v29 = vld [vmem:[%s6997_s22 + $0xc0] sm:$0xff]  ;;  %v443_v30 = vld [vmem:[%s6997_s22 + $0xc8] sm:$0xff]  ;;  %5865 = vmatpush3.bf16.msra.mxu1 %v5862_v38 }
  0xce   : > { %4920 = vmatmul.mubr.msk.f32.gmra.mrb[4].mxu0 %vm453_vm1, %v420_v5  ;;  %v444_v31 = vld [vmem:[%s6997_s22 + $0xd0] sm:$0xff]  ;;  %v445_v32 = vld [vmem:[%s6997_s22 + $0xd8] sm:$0xff]  ;;  %v446_v33 = vld [vmem:[%s6997_s22 + $0xe0] sm:$0xff]  ;;  %5883 = vmatprep.subr.bf16.mxu1 %v5882_v47 }
  0xcf   : > { %642 = vmatprep.mubr.f32.mxu0 %v8172_v0  ;;  %v447_v34 = vld [vmem:[%s6997_s22 + $0xe8] sm:$0xff]  ;;  %v448_v35 = vld [vmem:[%s6997_s22 + $0xf0] sm:$0xff]  ;;  %v1445_v61 = vld [vmem:[%s8152_s3 + $0x180] sm:$0xff] }
  0xd0   : > { %5616 = vmatmul.mubr.msk.f32.gmra.mrb[4].mxu1 %vm453_vm1, %v421_v6  ;;  %v1439_v53 = vld [vmem:[%s8152_s3 + $0x150] sm:$0xff]  ;;  %v1442_v60 = vld [vmem:[%s8152_s3 + $0x168] sm:$0xff]  ;;  %v1441_v63 = vld [vmem:[%s8152_s3 + $0x160] sm:$0xff] }
  0xd1   : > { %5618 = vmatprep.mubr.msk.f32.mxu1 %vm453_vm1, %v422_v9  ;;  %v5872_v55 = vpack.c.bf16 %v1439_v53, %v1436_v50  ;;  %v1443_v56 = vld [vmem:[%s8152_s3 + $0x170] sm:$0xff]  ;;  %v1438_v62 = vld [vmem:[%s8152_s3 + $0x148] sm:$0xff]  ;;  %v5876_v3 = vpack.c.bf16 %v1445_v61, %v1442_v60 }
  0xd2   : > { %4921 = vmatmul.mubr.msk.f32.gmra.mrb[6].mxu0 %vm453_vm1, %v421_v6  ;;  %v5874_v59 = vpack.c.bf16 %v1446_v57, %v1443_v56  ;;  %v5886_v5 = vpack.c.bf16 %v1441_v63, %v1438_v62  ;;  %v1444_v6 = vld [vmem:[%s8152_s3 + $0x178] sm:$0xff] }
  0xd3   : > { %648 = vmatprep.mubr.f32.mxu0 %v8172_v0  ;;  %5873 = vmatpush1.bf16.msra.mxu0 %v5872_v55 }
  0xd4   : > { %5619 = vmatmul.mubr.msk.f32.gmra.mrb[6].mxu1 %vm453_vm1, %v423_v10  ;;  %5875 = vmatprep.subr.bf16.mxu0 %v5874_v59 }
  0xd5   : > { %5621 = vmatprep.mubr.msk.f32.mxu1 %vm453_vm1, %v424_v11 }
  0xd6   : > { %4922 = vmatmul.mubr.msk.f32.gmra.mrb[8].mxu0 %vm453_vm1, %v422_v9 }
  0xd7   : > { %654 = vmatprep.mubr.f32.mxu0 %v8172_v0  ;;  %5877 = vmatpush1.bf16.msra.mxu0 %v5876_v3 }
  0xd8   : > { %5622 = vmatmul.mubr.msk.f32.gmra.mrb[8].mxu1 %vm453_vm1, %v425_v12 }
  0xd9   : > { %5624 = vmatprep.mubr.msk.f32.mxu1 %vm453_vm1, %v426_v13 }
  0xda   : > { %4923 = vmatmul.mubr.msk.f32.gmra.mrb[10].mxu0 %vm453_vm1, %v423_v10 }
  0xdb   : > { %660 = vmatprep.mubr.f32.mxu0 %v8172_v0 }
  0xdc   : > { %5625 = vmatmul.mubr.msk.f32.gmra.mrb[10].mxu1 %vm453_vm1, %v427_v14 }
  0xdd   : > { %5627 = vmatprep.mubr.msk.f32.mxu1 %vm453_vm1, %v428_v15 }
  0xde   : > { %4924 = vmatmul.mubr.msk.f32.gmra.mrb[12].mxu0 %vm453_vm1, %v424_v11 }
  0xdf   : > { %666 = vmatprep.mubr.f32.mxu0 %v8172_v0 }
  0xe0   : > { %5628 = vmatmul.mubr.msk.f32.gmra.mrb[12].mxu1 %vm453_vm1, %v429_v16 }
  0xe1   : > { %5630 = vmatprep.mubr.msk.f32.mxu1 %vm453_vm1, %v430_v17 }
  0xe2   : > { %4925 = vmatmul.mubr.msk.f32.gmra.mrb[14].mxu0 %vm453_vm1, %v425_v12 }
  0xe3   : > { %672 = vmatprep.mubr.f32.mxu0 %v8172_v0 }
  0xe4   : > { %5631 = vmatmul.mubr.msk.f32.gmra.mrb[14].mxu1 %vm453_vm1, %v431_v18 }
  0xe5   : > { %5633 = vmatprep.mubr.msk.f32.mxu1 %vm453_vm1, %v432_v19 }
  0xe6   : > { %4926 = vmatmul.mubr.msk.f32.gmra.mrb[16].mxu0 %vm453_vm1, %v426_v13 }
  0xe7   : > { %678 = vmatprep.mubr.f32.mxu0 %v8172_v0 }
  0xe8   : > { %5634 = vmatmul.mubr.msk.f32.gmra.mrb[16].mxu1 %vm453_vm1, %v433_v20 }
  0xe9   : > { %5636 = vmatprep.mubr.msk.f32.mxu1 %vm453_vm1, %v434_v21 }
  0xea   : > { %4927 = vmatmul.mubr.msk.f32.gmra.mrb[18].mxu0 %vm453_vm1, %v427_v14 }
  0xeb   : > { %684 = vmatprep.mubr.f32.mxu0 %v8172_v0 }
  0xec   : > { %5637 = vmatmul.mubr.msk.f32.gmra.mrb[18].mxu1 %vm453_vm1, %v435_v22 }
  0xed   : > { %5639 = vmatprep.mubr.msk.f32.mxu1 %vm453_vm1, %v436_v23 }
  0xee   : > { %4928 = vmatmul.mubr.msk.f32.gmra.mrb[20].mxu0 %vm453_vm1, %v428_v15 }
  0xef   : > { %690 = vmatprep.mubr.f32.mxu0 %v8172_v0 }
  0xf0   : > { %5640 = vmatmul.mubr.msk.f32.gmra.mrb[20].mxu1 %vm453_vm1, %v437_v24 }
  0xf1   : > { %5642 = vmatprep.mubr.msk.f32.mxu1 %vm453_vm1, %v438_v25 }
  0xf2   : > { %4929 = vmatmul.mubr.msk.f32.gmra.mrb[22].mxu0 %vm453_vm1, %v429_v16 }
  0xf3   : > { %696 = vmatprep.mubr.f32.mxu0 %v8172_v0 }
  0xf4   : > { %5643 = vmatmul.mubr.msk.f32.gmra.mrb[22].mxu1 %vm453_vm1, %v439_v26 }
  0xf5   : > { %5645 = vmatprep.mubr.msk.f32.mxu1 %vm453_vm1, %v440_v27 }
  0xf6   : > { %4930 = vmatmul.mubr.msk.f32.gmra.mrb[24].mxu0 %vm453_vm1, %v430_v17 }
  0xf7   : > { %702 = vmatprep.mubr.f32.mxu0 %v8172_v0 }
  0xf8   : > { %5646 = vmatmul.mubr.msk.f32.gmra.mrb[24].mxu1 %vm453_vm1, %v441_v28 }
  0xf9   : > { %5648 = vmatprep.mubr.msk.f32.mxu1 %vm453_vm1, %v442_v29 }
  0xfa   : > { %4931 = vmatmul.mubr.msk.f32.gmra.mrb[26].mxu0 %vm453_vm1, %v431_v18 }
  0xfb   : > { %708 = vmatprep.mubr.f32.mxu0 %v8172_v0 }
  0xfc   : > { %5649 = vmatmul.mubr.msk.f32.gmra.mrb[26].mxu1 %vm453_vm1, %v443_v30 }
  0xfd   : > { %5651 = vmatprep.mubr.msk.f32.mxu1 %vm453_vm1, %v444_v31 }
  0xfe   : > { %4932 = vmatmul.mubr.msk.f32.gmra.mrb[28].mxu0 %vm453_vm1, %v432_v19 }
  0xff   : > { %714 = vmatprep.mubr.f32.mxu0 %v8172_v0 }
 0x100   : > { %5652 = vmatmul.mubr.msk.f32.gmra.mrb[28].mxu1 %vm453_vm1, %v445_v32 }
 0x101   : > { %5654 = vmatprep.mubr.msk.f32.mxu1 %vm453_vm1, %v446_v33 }
 0x102   : > { %4933 = vmatmul.mubr.msk.f32.gmra.mrb[30].mxu0 %vm453_vm1, %v433_v20 }
 0x103   : > { %720 = vmatprep.mubr.f32.mxu0 %v8172_v0 }
 0x104   : > { %5655 = vmatmul.mubr.msk.f32.gmra.mrb[30].mxu1 %vm453_vm1, %v447_v34 }
 0x105   : > { %5657 = vmatprep.mubr.msk.f32.mxu1 %vm453_vm1, %v448_v35 }
 0x106   : > { %4934 = vmatmul.mubr.msk.f32.gmra.mrb[32].mxu0 %vm453_vm1, %v434_v21 }
 0x107   : > { %726 = vmatprep.mubr.f32.mxu0 %v8172_v0 }
 0x108   : > { %5658 = vmatmul.mubr.msk.f32.gmra.mrb[32].mxu1 %vm453_vm1, %v7019_v7  ;;  %v1447_v7 = vld [vmem:[%s8152_s3 + $0x190] sm:$0xff] }
 0x109   : > { %v5890_v13 = vpack.c.bf16 %v1447_v7, %v1444_v6 }
 0x10a   : > { %4935 = vmatmul.mubr.msk.f32.gmra.mrb[34].mxu0 %vm453_vm1, %v435_v22 }
 0x10b   : > { %732 = vmatprep.mubr.f32.mxu0 %v8172_v0 }
 0x10e   : > { %4936 = vmatmul.mubr.msk.f32.gmra.mrb[36].mxu0 %vm453_vm1, %v436_v23 }
 0x10f   : > { %738 = vmatprep.mubr.f32.mxu0 %v8172_v0 }
 0x112   : > { %4937 = vmatmul.mubr.msk.f32.gmra.mrb[38].mxu0 %vm453_vm1, %v437_v24 }
 0x113   : > { %744 = vmatprep.mubr.f32.mxu0 %v8172_v0 }
 0x116   : > { %4938 = vmatmul.mubr.msk.f32.gmra.mrb[40].mxu0 %vm453_vm1, %v438_v25 }
 0x117   : > { %750 = vmatprep.mubr.f32.mxu0 %v8172_v0 }
 0x11a   : > { %4939 = vmatmul.mubr.msk.f32.gmra.mrb[42].mxu0 %vm453_vm1, %v439_v26 }
 0x11b   : > { %756 = vmatprep.mubr.f32.mxu0 %v8172_v0 }
 0x11e   : > { %4940 = vmatmul.mubr.msk.f32.gmra.mrb[44].mxu0 %vm453_vm1, %v440_v27 }
 0x11f   : > { %762 = vmatprep.mubr.f32.mxu0 %v8172_v0 }
 0x122   : > { %4941 = vmatmul.mubr.msk.f32.gmra.mrb[46].mxu0 %vm453_vm1, %v441_v28 }
 0x123   : > { %768 = vmatprep.mubr.f32.mxu0 %v8172_v0 }
 0x126   : > { %4942 = vmatmul.mubr.msk.f32.gmra.mrb[48].mxu0 %vm453_vm1, %v442_v29 }
 0x127   : > { %774 = vmatprep.mubr.f32.mxu0 %v8172_v0 }
 0x12a   : > { %4943 = vmatmul.mubr.msk.f32.gmra.mrb[50].mxu0 %vm453_vm1, %v443_v30 }
 0x12b   : > { %780 = vmatprep.mubr.f32.mxu0 %v8172_v0 }
 0x12e   : > { %4944 = vmatmul.mubr.msk.f32.gmra.mrb[52].mxu0 %vm453_vm1, %v444_v31 }
 0x12f   : > { %786 = vmatprep.mubr.f32.mxu0 %v8172_v0 }
 0x132   : > { %4945 = vmatmul.mubr.msk.f32.gmra.mrb[54].mxu0 %vm453_vm1, %v445_v32 }
 0x133   : > { %792 = vmatprep.mubr.f32.mxu0 %v8172_v0 }
 0x136   : > { %4946 = vmatmul.mubr.msk.f32.gmra.mrb[56].mxu0 %vm453_vm1, %v446_v33 }
 0x137   : > { %798 = vmatprep.mubr.f32.mxu0 %v8172_v0 }
 0x13a   : > { %4947 = vmatmul.mubr.msk.f32.gmra.mrb[58].mxu0 %vm453_vm1, %v447_v34 }
 0x13b   : > { %804 = vmatprep.mubr.f32.mxu0 %v8172_v0 }
 0x13e   : > { %4948 = vmatmul.mubr.msk.f32.gmra.mrb[60].mxu0 %vm453_vm1, %v448_v35 }
 0x13f   : > { %1615 = vmatprep.mubr.f32.mxu0 %v8172_v0 }
 0x199   : > { %v626_v51 = vpop.f32.mrb[0].mxu0 }
 0x19a   : > { %v628_v54 = vpop.f32.mrb[1].mxu0 }
 0x19b   : > { %v1042_v58 = vmul.f32 %v628_v54, %v626_v51  ;;  %v812_v10 = vpop.f32.mrb[0].mxu1 }
 0x19c   : > { %v814_v12 = vpop.f32.mrb[1].mxu1 }
 0x19d   : > { %v632_v1 = vpop.f32.mrb[2].mxu0  ;;  %5664 = vmatprep.mubr.msk.f32.mxu1 %vm1076_vm2, %v1042_v58  ;;  %v7207_v14 = vmul.f32 %v814_v12, %v812_v10 }
 0x19e   : > { %v634_v2 = vpop.f32.mrb[3].mxu0 }
 0x19f   : > { %v1043_v4 = vmul.f32 %v634_v2, %v632_v1  ;;  %v7210_v17 = vpop.f32.mrb[2].mxu1 }
 0x1a0   : > { %v7212_v19 = vpop.f32.mrb[3].mxu1 }
 0x1a1   : > { %v638_v8 = vpop.f32.mrb[4].mxu0  ;;  %5665 = vmatmul.mubr.msk.f32.vlgmr.msra.gmra.mrb[34].mxu1 %vm1076_vm2, %v1043_v4 }
 0x1a2   : > { %v640_v9 = vpop.f32.mrb[5].mxu0  ;;  %5885 = vmatpush3.bf16.msra.mxu1 %v5882_v47 }
 0x1a3   : > { %v1044_v11 = vmul.f32 %v640_v9, %v638_v8  ;;  %5887 = vmatprep.subr.bf16.mxu1 %v5886_v5  ;;  %v7215_v22 = vpop.f32.mrb[4].mxu1 }
 0x1a4   : > { %v7217_v24 = vpop.f32.mrb[5].mxu1 }
 0x1a5   : > { %v644_v15 = vpop.f32.mrb[6].mxu0  ;;  %5667 = vmatprep.mubr.msk.f32.mxu1 %vm1076_vm2, %v1044_v11 }
 0x1a6   : > { %v646_v16 = vpop.f32.mrb[7].mxu0  ;;  %5889 = vmatpush3.bf16.msra.mxu1 %v5886_v5 }
 0x1a7   : > { %v1045_v18 = vmul.f32 %v646_v16, %v644_v15  ;;  %5891 = vmatprep.subr.bf16.mxu1 %v5890_v13  ;;  %v7220_v27 = vpop.f32.mrb[6].mxu1 }
 0x1a8   : > { %v7222_v29 = vpop.f32.mrb[7].mxu1 }
 0x1a9   : > { %v650_v20 = vpop.f32.mrb[8].mxu0  ;;  %5668 = vmatmul.mubr.msk.f32.gmra.mrb[36].mxu1 %vm1076_vm2, %v1045_v18 }
 0x1aa   : > { %v652_v21 = vpop.f32.mrb[9].mxu0  ;;  %5893 = vmatpush3.bf16.msra.mxu1 %v5890_v13 }
 0x1ab   : > { %v1046_v23 = vmul.f32 %v652_v21, %v650_v20  ;;  %v7225_v32 = vpop.f32.mrb[8].mxu1 }
 0x1ac   : > { %v7227_v34 = vpop.f32.mrb[9].mxu1 }
 0x1ad   : > { %v656_v25 = vpop.f32.mrb[10].mxu0  ;;  %5670 = vmatprep.mubr.msk.f32.mxu1 %vm1076_vm2, %v1046_v23 }
 0x1ae   : > { %v658_v26 = vpop.f32.mrb[11].mxu0 }
 0x1af   : > { %v1047_v28 = vmul.f32 %v658_v26, %v656_v25  ;;  %v7230_v37 = vpop.f32.mrb[10].mxu1 }
 0x1b0   : > { %v7232_v39 = vpop.f32.mrb[11].mxu1 }
 0x1b1   : > { %v662_v30 = vpop.f32.mrb[12].mxu0  ;;  %5671 = vmatmul.mubr.msk.f32.gmra.mrb[38].mxu1 %vm1076_vm2, %v1047_v28 }
 0x1b2   : > { %v664_v31 = vpop.f32.mrb[13].mxu0 }
 0x1b3   : > { %v1048_v33 = vmul.f32 %v664_v31, %v662_v30  ;;  %v7235_v42 = vpop.f32.mrb[12].mxu1 }
 0x1b4   : > { %v7237_v44 = vpop.f32.mrb[13].mxu1 }
 0x1b5   : > { %v668_v35 = vpop.f32.mrb[14].mxu0  ;;  %5673 = vmatprep.mubr.msk.f32.mxu1 %vm1076_vm2, %v1048_v33 }
 0x1b6   : > { %v670_v36 = vpop.f32.mrb[15].mxu0 }
 0x1b7   : > { %v1049_v38 = vmul.f32 %v670_v36, %v668_v35  ;;  %v7240_v47 = vpop.f32.mrb[14].mxu1 }
 0x1b8   : > { %v7242_v49 = vpop.f32.mrb[15].mxu1 }
 0x1b9   : > { %v674_v40 = vpop.f32.mrb[16].mxu0  ;;  %5674 = vmatmul.mubr.msk.f32.gmra.mrb[40].mxu1 %vm1076_vm2, %v1049_v38 }
 0x1ba   : > { %v676_v41 = vpop.f32.mrb[17].mxu0 }
 0x1bb   : > { %v1050_v43 = vmul.f32 %v676_v41, %v674_v40  ;;  %v7245_v52 = vpop.f32.mrb[16].mxu1 }
 0x1bc   : > { %v7247_v54 = vpop.f32.mrb[17].mxu1 }
 0x1bd   : > { %v680_v45 = vpop.f32.mrb[18].mxu0  ;;  %5676 = vmatprep.mubr.msk.f32.mxu1 %vm1076_vm2, %v1050_v43 }
 0x1be   : > { %v682_v46 = vpop.f32.mrb[19].mxu0 }
 0x1bf   : > { %v1051_v48 = vmul.f32 %v682_v46, %v680_v45  ;;  %v7250_v57 = vpop.f32.mrb[18].mxu1 }
 0x1c0   : > { %v7252_v59 = vpop.f32.mrb[19].mxu1 }
 0x1c1   : > { %v686_v50 = vpop.f32.mrb[20].mxu0  ;;  %5677 = vmatmul.mubr.msk.f32.gmra.mrb[42].mxu1 %vm1076_vm2, %v1051_v48 }
 0x1c2   : > { %v688_v51 = vpop.f32.mrb[21].mxu0 }
 0x1c3   : > { %v1052_v53 = vmul.f32 %v688_v51, %v686_v50  ;;  %v7255_v62 = vpop.f32.mrb[20].mxu1 }
 0x1c4   : > { %v7257_v1 = vpop.f32.mrb[21].mxu1 }
 0x1c5   : > { %v692_v55 = vpop.f32.mrb[22].mxu0  ;;  %5679 = vmatprep.mubr.msk.f32.mxu1 %vm1076_vm2, %v1052_v53 }
 0x1c6   : > { %v694_v56 = vpop.f32.mrb[23].mxu0 }
 0x1c7   : > { %v1053_v58 = vmul.f32 %v694_v56, %v692_v55  ;;  %v7260_v4 = vpop.f32.mrb[22].mxu1 }
 0x1c8   : > { %v7262_v6 = vpop.f32.mrb[23].mxu1 }
 0x1c9   : > { %v698_v60 = vpop.f32.mrb[24].mxu0  ;;  %5680 = vmatmul.mubr.msk.f32.gmra.mrb[44].mxu1 %vm1076_vm2, %v1053_v58 }
 0x1ca   : > { %v700_v61 = vpop.f32.mrb[25].mxu0 }
 0x1cb   : > { %v1054_v63 = vmul.f32 %v700_v61, %v698_v60  ;;  %v7265_v9 = vpop.f32.mrb[24].mxu1  ;;  %v1449_v61 = vld [vmem:[%s8152_s3 + $0x1a0] sm:$0xff] }
 0x1cc   : > { %v7267_v11 = vpop.f32.mrb[25].mxu1 }
 0x1cd   : > { %v704_v2 = vpop.f32.mrb[26].mxu0  ;;  %5682 = vmatprep.mubr.msk.f32.mxu1 %vm1076_vm2, %v1054_v63  ;;  %v1452_v63 = vld [vmem:[%s8152_s3 + $0x1b8] sm:$0xff] }
 0x1ce   : > { %v706_v3 = vpop.f32.mrb[27].mxu0 }
 0x1cf   : > { %v1055_v5 = vmul.f32 %v706_v3, %v704_v2  ;;  %v7270_v15 = vpop.f32.mrb[26].mxu1  ;;  %v5878_v3 = vpack.c.bf16 %v1452_v63, %v1449_v61 }
 0x1d0   : > { %v7272_v18 = vpop.f32.mrb[27].mxu1 }
 0x1d1   : > { %v710_v7 = vpop.f32.mrb[28].mxu0  ;;  %5683 = vmatmul.mubr.msk.f32.gmra.mrb[46].mxu1 %vm1076_vm2, %v1055_v5  ;;  %v1448_v5 = vld [vmem:[%s8152_s3 + $0x198] sm:$0xff]  ;;  %5879 = vmatprep.subr.bf16.mxu0 %v5878_v3 }
 0x1d2   : > { %v712_v8 = vpop.f32.mrb[29].mxu0 }
 0x1d3   : > { %v1056_v10 = vmul.f32 %v712_v8, %v710_v7  ;;  %v7275_v23 = vpop.f32.mrb[28].mxu1  ;;  %v1451_v7 = vld [vmem:[%s8152_s3 + $0x1b0] sm:$0xff]  ;;  %v1450_v8 = vld [vmem:[%s8152_s3 + $0x1a8] sm:$0xff] }
 0x1d4   : > { %v7277_v26 = vpop.f32.mrb[29].mxu1 }
 0x1d5   : > { %v716_v12 = vpop.f32.mrb[30].mxu0  ;;  %5685 = vmatprep.mubr.msk.f32.mxu1 %vm1076_vm2, %v1056_v10 }
 0x1d6   : > { %v718_v13 = vpop.f32.mrb[31].mxu0 }
 0x1d7   : > { %v1057_v16 = vmul.f32 %v718_v13, %v716_v12  ;;  %v7280_v31 = vpop.f32.mrb[30].mxu1  ;;  %v5880_v12 = vpack.c.bf16 %v1451_v7, %v1448_v5  ;;  %v1453_v13 = vld [vmem:[%s8152_s3 + $0x1c0] sm:$0xff] }
 0x1d8   : > { %v7282_v35 = vpop.f32.mrb[31].mxu1 }
 0x1d9   : > { %v722_v20 = vpop.f32.mrb[32].mxu0  ;;  %5686 = vmatmul.mubr.msk.f32.gmra.mrb[48].mxu1 %vm1076_vm2, %v1057_v16  ;;  %v5894_v16 = vpack.c.bf16 %v1453_v13, %v1450_v8  ;;  %5881 = vmatpush1.bf16.msra.mxu0 %v5880_v12 }
 0x1da   : > { %v724_v21 = vpop.f32.mrb[33].mxu0 }
 0x1db   : > { %v1058_v25 = vmul.f32 %v724_v21, %v722_v20  ;;  %v7285_v40 = vpop.f32.mrb[32].mxu1  ;;  %5895 = vmatprep.subr.bf16.mxu1 %v5894_v16 }
 0x1dc   : > { %v7287_v43 = vpop.f32.mrb[33].mxu1  ;;  %5897 = vmatpush3.bf16.msra.mxu1 %v5894_v16 }
 0x1dd   : > { %v728_v28 = vpop.f32.mrb[34].mxu0  ;;  %5688 = vmatprep.mubr.msk.f32.mxu1 %vm1076_vm2, %v1058_v25 }
 0x1de   : > { %v730_v30 = vpop.f32.mrb[35].mxu0 }
 0x1df   : > { %v1059_v33 = vmul.f32 %v730_v30, %v728_v28  ;;  %v8170_v30 = vmov 0.0|0.0  }
 0x1e0   : > { %5898 = vmatprep.subr.bf16.mxu1 %v8170_v30 }
 0x1e1   : > { %v734_v36 = vpop.f32.mrb[36].mxu0  ;;  %5689 = vmatmul.mubr.msk.f32.gmra.mrb[50].mxu1 %vm1076_vm2, %v1059_v33 }
 0x1e2   : > { %v736_v38 = vpop.f32.mrb[37].mxu0 }
 0x1e3   : > { %v1060_v41 = vmul.f32 %v736_v38, %v734_v36 }
 0x1e5   : > { %v740_v45 = vpop.f32.mrb[38].mxu0  ;;  %5691 = vmatprep.mubr.msk.f32.mxu1 %vm1076_vm2, %v1060_v41 }
 0x1e6   : > { %v742_v46 = vpop.f32.mrb[39].mxu0 }
 0x1e7   : > { %v1061_v48 = vmul.f32 %v742_v46, %v740_v45 }
 0x1e9   : > { %v746_v50 = vpop.f32.mrb[40].mxu0  ;;  %5692 = vmatmul.mubr.msk.f32.gmra.mrb[52].mxu1 %vm1076_vm2, %v1061_v48 }
 0x1ea   : > { %v748_v51 = vpop.f32.mrb[41].mxu0 }
 0x1eb   : > { %v1062_v53 = vmul.f32 %v748_v51, %v746_v50 }
 0x1ed   : > { %v752_v55 = vpop.f32.mrb[42].mxu0  ;;  %5694 = vmatprep.mubr.msk.f32.mxu1 %vm1076_vm2, %v1062_v53 }
 0x1ee   : > { %v754_v56 = vpop.f32.mrb[43].mxu0 }
 0x1ef   : > { %v1063_v58 = vmul.f32 %v754_v56, %v752_v55 }
 0x1f1   : > { %v758_v60 = vpop.f32.mrb[44].mxu0  ;;  %5695 = vmatmul.mubr.msk.f32.gmra.mrb[54].mxu1 %vm1076_vm2, %v1063_v58 }
 0x1f2   : > { %v760_v2 = vpop.f32.mrb[45].mxu0 }
 0x1f3   : > { %v1064_v10 = vmul.f32 %v760_v2, %v758_v60 }
 0x1f5   : > { %v764_v20 = vpop.f32.mrb[46].mxu0  ;;  %5697 = vmatprep.mubr.msk.f32.mxu1 %vm1076_vm2, %v1064_v10 }
 0x1f6   : > { %v766_v21 = vpop.f32.mrb[47].mxu0 }
 0x1f7   : > { %v1065_v25 = vmul.f32 %v766_v21, %v764_v20 }
 0x1f9   : > { %v770_v28 = vpop.f32.mrb[48].mxu0  ;;  %5698 = vmatmul.mubr.msk.f32.gmra.mrb[56].mxu1 %vm1076_vm2, %v1065_v25 }
 0x1fa   : > { %v772_v33 = vpop.f32.mrb[49].mxu0 }
 0x1fb   : > { %v1066_v36 = vmul.f32 %v772_v33, %v770_v28 }
 0x1fd   : > { %v776_v38 = vpop.f32.mrb[50].mxu0  ;;  %5700 = vmatprep.mubr.msk.f32.mxu1 %vm1076_vm2, %v1066_v36 }
 0x1fe   : > { %v778_v41 = vpop.f32.mrb[51].mxu0 }
 0x1ff   : > { %v1067_v45 = vmul.f32 %v778_v41, %v776_v38 }
 0x201   : > { %v782_v46 = vpop.f32.mrb[52].mxu0  ;;  %5701 = vmatmul.mubr.msk.f32.gmra.mrb[58].mxu1 %vm1076_vm2, %v1067_v45 }
 0x202   : > { %v784_v48 = vpop.f32.mrb[53].mxu0 }
 0x203   : > { %v1068_v50 = vmul.f32 %v784_v48, %v782_v46 }
 0x205   : > { %v788_v51 = vpop.f32.mrb[54].mxu0  ;;  %5703 = vmatprep.mubr.msk.f32.mxu1 %vm1076_vm2, %v1068_v50 }
 0x206   : > { %v790_v53 = vpop.f32.mrb[55].mxu0 }
 0x207   : > { %v1069_v55 = vmul.f32 %v790_v53, %v788_v51 }
 0x209   : > { %v794_v56 = vpop.f32.mrb[56].mxu0  ;;  %5704 = vmatmul.mubr.msk.f32.gmra.mrb[60].mxu1 %vm1076_vm2, %v1069_v55 }
 0x20a   : > { %v796_v58 = vpop.f32.mrb[57].mxu0 }
 0x20b   : > { %v1070_v60 = vmul.f32 %v796_v58, %v794_v56 }
 0x20d   : > { %v800_v61 = vpop.f32.mrb[58].mxu0  ;;  %5706 = vmatprep.mubr.msk.f32.mxu1 %vm1076_vm2, %v1070_v60 }
 0x20e   : > { %v802_v63 = vpop.f32.mrb[59].mxu0 }
 0x20f   : > { %v1071_v2 = vmul.f32 %v802_v63, %v800_v61 }
 0x211   : > { %v806_v3 = vpop.f32.mrb[60].mxu0  ;;  %5707 = vmatmul.mubr.msk.f32.gmra.mrb[62].mxu1 %vm1076_vm2, %v1071_v2 }
 0x212   : > { %v808_v5 = vpop.f32.mrb[61].mxu0 }
 0x213   : > { %v1072_v7 = vmul.f32 %v808_v5, %v806_v3 }
 0x215   : > { %5709 = vmatprep.mubr.msk.f32.mxu1 %vm1076_vm2, %v1072_v7 }
 0x216   : > { %5710 = vmatmul.mubr.msk.f32.gmra.mrb[64].mxu1 %vm1076_vm2, %v7207_v14 }
 0x274   : > { %v5666_v8 = vpop.f32.mrb[34].mxu1 }
 0x275   : > { %v1399_v10 = vmul.f32 %v5666_v8, %v7210_v17  ;;  %v1239_v12 = vpop.f32.mrb[35].mxu1 }
 0x276   : > { %v1398_v13 = vmul.f32 %v1239_v12, %v7212_v19 }
 0x278   : > { %5015 = vmatmul.mubr.msk.f32.vlgmr.msra.gmra.mrb[62].mxu0 %vm1454_vm3, %v1398_v13  ;;  %5728 = vmatprep.mubr.msk.f32.mxu1 %vm1454_vm3, %v1398_v13  ;;  %v5899_v16 = vpack.c.bf16 %v1399_v10, %v1398_v13 }
 0x279   : > { %5729 = vmatmul.mubr.msk.f32.vlgmr.msra.gmra.mrb[66].mxu1 %vm1454_vm3, %v1399_v10  ;;  %1621 = vmatprep.mubr.f32.mxu0 %v8172_v0 }
 0x27a   : > { %5900 = vmatpush1.bf16.msra.mxu1 %v5899_v16 }
 0x27b   : > { %5901 = vmatprep.subr.bf16.mxu1 %v8170_v30 }
 0x27c   : > { %v5669_v14 = vpop.f32.mrb[36].mxu1  ;;  %5016 = vmatmul.mubr.msk.f32.gmra.mrb[64].mxu0 %vm1454_vm3, %v1399_v10 }
 0x27d   : > { %v1401_v17 = vmul.f32 %v5669_v14, %v7215_v22  ;;  %v1249_v20 = vpop.f32.mrb[37].mxu1  ;;  %1627 = vmatprep.mubr.f32.mxu0 %v8172_v0 }
 0x27e   : > { %v1400_v19 = vmul.f32 %v1249_v20, %v7217_v24  ;;  %v2323_v20 = vld [vmem:[%s8152_s3 + $0x50] sm:$0xff] }
 0x280   : > { %5017 = vmatmul.mubr.msk.f32.gmra.mrb[66].mxu0 %vm1454_vm3, %v1400_v19  ;;  %5731 = vmatprep.mubr.msk.f32.mxu1 %vm1454_vm3, %v1400_v19  ;;  %v5902_v21 = vpack.c.bf16 %v1401_v17, %v1400_v19  ;;  %v2325_v19 = vld [vmem:[%s8152_s3 + $0x68] sm:$0xff] }
 0x281   : > { %5732 = vmatmul.mubr.msk.f32.gmra.mrb[68].mxu1 %vm1454_vm3, %v1401_v17  ;;  %1633 = vmatprep.mubr.f32.mxu0 %v8172_v0 }
 0x282   : > { %5903 = vmatpush1.bf16.msra.mxu1 %v5902_v21  ;;  %v5946_v21 = vpack.c.bf16 %v2325_v19, %v2323_v20  ;;  %v2055_v20 = vld [vmem:[%s6970_s12 + $0xb0] sm:$0xff]  ;;  %v2058_v19 = vld [vmem:[%s6970_s12 + $0xc8] sm:$0xff] }
 0x283   : > { %5904 = vmatprep.subr.bf16.mxu1 %v8170_v30 }
 0x284   : > { %v5672_v25 = vpop.f32.mrb[38].mxu1  ;;  %5018 = vmatmul.mubr.msk.f32.gmra.mrb[68].mxu0 %vm1454_vm3, %v1401_v17  ;;  %5947 = vmatprep.subr.bf16.mxu0 %v5946_v21  ;;  %v2057_v21 = vld [vmem:[%s6970_s12 + $0xc0] sm:$0xff] }
 0x285   : > { %v1403_v22 = vmul.f32 %v5672_v25, %v7220_v27  ;;  %v1259_v28 = vpop.f32.mrb[39].mxu1  ;;  %1639 = vmatprep.mubr.f32.mxu0 %v8172_v0  ;;  %v2322_v25 = vld [vmem:[%s8152_s3 + $0x48] sm:$0xff] }
 0x286   : > { %v1402_v24 = vmul.f32 %v1259_v28, %v7222_v29 }
 0x288   : > { %5019 = vmatmul.mubr.msk.f32.gmra.mrb[70].mxu0 %vm1454_vm3, %v1402_v24  ;;  %5734 = vmatprep.mubr.msk.f32.mxu1 %vm1454_vm3, %v1402_v24  ;;  %v5905_v33 = vpack.c.bf16 %v1403_v22, %v1402_v24 }
 0x289   : > { %5735 = vmatmul.mubr.msk.f32.gmra.mrb[70].mxu1 %vm1454_vm3, %v1403_v22  ;;  %1645 = vmatprep.mubr.f32.mxu0 %v8172_v0 }
 0x28a   : > { %5906 = vmatpush1.bf16.msra.mxu1 %v5905_v33 }
 0x28b   : > { %5907 = vmatprep.subr.bf16.mxu1 %v8170_v30 }
 0x28c   : > { %v5675_v36 = vpop.f32.mrb[40].mxu1  ;;  %5020 = vmatmul.mubr.msk.f32.gmra.mrb[72].mxu0 %vm1454_vm3, %v1403_v22 }
 0x28d   : > { %v1405_v27 = vmul.f32 %v5675_v36, %v7225_v32  ;;  %v1269_v38 = vpop.f32.mrb[41].mxu1  ;;  %1651 = vmatprep.mubr.f32.mxu0 %v8172_v0 }
 0x28e   : > { %v1404_v29 = vmul.f32 %v1269_v38, %v7227_v34 }
 0x290   : > { %5021 = vmatmul.mubr.msk.f32.gmra.mrb[74].mxu0 %vm1454_vm3, %v1404_v29  ;;  %5737 = vmatprep.mubr.msk.f32.mxu1 %vm1454_vm3, %v1404_v29  ;;  %v5908_v41 = vpack.c.bf16 %v1405_v27, %v1404_v29 }
 0x291   : > { %5738 = vmatmul.mubr.msk.f32.gmra.mrb[72].mxu1 %vm1454_vm3, %v1405_v27  ;;  %1657 = vmatprep.mubr.f32.mxu0 %v8172_v0 }
 0x292   : > { %5909 = vmatpush1.bf16.msra.mxu1 %v5908_v41 }
 0x293   : > { %5910 = vmatprep.subr.bf16.mxu1 %v8170_v30 }
 0x294   : > { %v5678_v45 = vpop.f32.mrb[42].mxu1  ;;  %5022 = vmatmul.mubr.msk.f32.gmra.mrb[76].mxu0 %vm1454_vm3, %v1405_v27 }
 0x295   : > { %v1407_v32 = vmul.f32 %v5678_v45, %v7230_v37  ;;  %v1279_v46 = vpop.f32.mrb[43].mxu1  ;;  %1663 = vmatprep.mubr.f32.mxu0 %v8172_v0 }
 0x296   : > { %v1406_v34 = vmul.f32 %v1279_v46, %v7232_v39 }
 0x298   : > { %5023 = vmatmul.mubr.msk.f32.gmra.mrb[78].mxu0 %vm1454_vm3, %v1406_v34  ;;  %5740 = vmatprep.mubr.msk.f32.mxu1 %vm1454_vm3, %v1406_v34  ;;  %v5911_v48 = vpack.c.bf16 %v1407_v32, %v1406_v34 }
 0x299   : > { %5741 = vmatmul.mubr.msk.f32.gmra.mrb[74].mxu1 %vm1454_vm3, %v1407_v32  ;;  %1669 = vmatprep.mubr.f32.mxu0 %v8172_v0 }
 0x29a   : > { %5912 = vmatpush1.bf16.msra.mxu1 %v5911_v48 }
 0x29b   : > { %5913 = vmatprep.subr.bf16.mxu1 %v8170_v30 }
 0x29c   : > { %v5681_v50 = vpop.f32.mrb[44].mxu1  ;;  %5024 = vmatmul.mubr.msk.f32.gmra.mrb[80].mxu0 %vm1454_vm3, %v1407_v32 }
 0x29d   : > { %v1409_v37 = vmul.f32 %v5681_v50, %v7235_v42  ;;  %v1289_v51 = vpop.f32.mrb[45].mxu1  ;;  %1675 = vmatprep.mubr.f32.mxu0 %v8172_v0 }
 0x29e   : > { %v1408_v39 = vmul.f32 %v1289_v51, %v7237_v44  ;;  %v2033_v51 = vld [vmem:[%s6970_s12] sm:$0xff] }
 0x2a0   : > { %5025 = vmatmul.mubr.msk.f32.gmra.mrb[82].mxu0 %vm1454_vm3, %v1408_v39  ;;  %5743 = vmatprep.mubr.msk.f32.mxu1 %vm1454_vm3, %v1408_v39  ;;  %v5914_v53 = vpack.c.bf16 %v1409_v37, %v1408_v39 }
 0x2a1   : > { %5744 = vmatmul.mubr.msk.f32.gmra.mrb[76].mxu1 %vm1454_vm3, %v1409_v37  ;;  %1681 = vmatprep.mubr.f32.mxu0 %v8172_v0 }
 0x2a2   : > { %5915 = vmatpush1.bf16.msra.mxu1 %v5914_v53  ;;  %v2326_v53 = vld [vmem:[%s8152_s3 + $0x78] sm:$0xff] }
 0x2a3   : > { %5916 = vmatprep.subr.bf16.mxu1 %v8170_v30 }
 0x2a4   : > { %v5684_v55 = vpop.f32.mrb[46].mxu1  ;;  %5026 = vmatmul.mubr.msk.f32.gmra.mrb[84].mxu0 %vm1454_vm3, %v1409_v37 }
 0x2a5   : > { %v1411_v42 = vmul.f32 %v5684_v55, %v7240_v47  ;;  %v1299_v56 = vpop.f32.mrb[47].mxu1  ;;  %1687 = vmatprep.mubr.f32.mxu0 %v8172_v0  ;;  %v2328_v55 = vld [vmem:[%s8152_s3 + $0x90] sm:$0xff] }
 0x2a6   : > { %v1410_v44 = vmul.f32 %v1299_v56, %v7242_v49  ;;  %v5952_v56 = vpack.c.bf16 %v2328_v55, %v2326_v53 }
 0x2a8   : > { %5027 = vmatmul.mubr.msk.f32.gmra.mrb[86].mxu0 %vm1454_vm3, %v1410_v44  ;;  %5746 = vmatprep.mubr.msk.f32.mxu1 %vm1454_vm3, %v1410_v44  ;;  %v5917_v58 = vpack.c.bf16 %v1411_v42, %v1410_v44  ;;  %v2035_v44 = vld [vmem:[%s6970_s12 + $0x10] sm:$0xff] }
 0x2a9   : > { %5747 = vmatmul.mubr.msk.f32.gmra.mrb[78].mxu1 %vm1454_vm3, %v1411_v42  ;;  %1693 = vmatprep.mubr.f32.mxu0 %v8172_v0 }
 0x2aa   : > { %5918 = vmatpush1.bf16.msra.mxu1 %v5917_v58  ;;  %v2038_v58 = vld [vmem:[%s6970_s12 + $0x28] sm:$0xff] }
 0x2ab   : > { %5919 = vmatprep.subr.bf16.mxu1 %v8170_v30 }
 0x2ac   : > { %v5687_v60 = vpop.f32.mrb[48].mxu1  ;;  %5028 = vmatmul.mubr.msk.f32.gmra.mrb[88].mxu0 %vm1454_vm3, %v1411_v42  ;;  %v2036_v42 = vld [vmem:[%s6970_s12 + $0x18] sm:$0xff] }
 0x2ad   : > { %v1413_v47 = vmul.f32 %v5687_v60, %v7245_v52  ;;  %v1309_v61 = vpop.f32.mrb[49].mxu1  ;;  %1699 = vmatprep.mubr.f32.mxu0 %v8172_v0  ;;  %v2037_v60 = vld [vmem:[%s6970_s12 + $0x20] sm:$0xff] }
 0x2ae   : > { %v1412_v49 = vmul.f32 %v1309_v61, %v7247_v54  ;;  %v2039_v61 = vld [vmem:[%s6970_s12 + $0x30] sm:$0xff] }
 0x2b0   : > { %5029 = vmatmul.mubr.msk.f32.gmra.mrb[90].mxu0 %vm1454_vm3, %v1412_v49  ;;  %5749 = vmatprep.mubr.msk.f32.mxu1 %vm1454_vm3, %v1412_v49  ;;  %v5920_v63 = vpack.c.bf16 %v1413_v47, %v1412_v49  ;;  %v2042_v49 = vld [vmem:[%s6970_s12 + $0x48] sm:$0xff] }
 0x2b1   : > { %5750 = vmatmul.mubr.msk.f32.gmra.mrb[80].mxu1 %vm1454_vm3, %v1413_v47  ;;  %1705 = vmatprep.mubr.f32.mxu0 %v8172_v0 }
 0x2b2   : > { %5921 = vmatpush1.bf16.msra.mxu1 %v5920_v63  ;;  %v2041_v63 = vld [vmem:[%s6970_s12 + $0x40] sm:$0xff] }
 0x2b3   : > { %5922 = vmatprep.subr.bf16.mxu1 %v8170_v30 }
 0x2b4   : > { %v5690_v2 = vpop.f32.mrb[50].mxu1  ;;  %5030 = vmatmul.mubr.msk.f32.gmra.mrb[92].mxu0 %vm1454_vm3, %v1413_v47  ;;  %v2040_v47 = vld [vmem:[%s6970_s12 + $0x38] sm:$0xff] }
 0x2b5   : > { %v1415_v52 = vmul.f32 %v5690_v2, %v7250_v57  ;;  %v1319_v3 = vpop.f32.mrb[51].mxu1  ;;  %1711 = vmatprep.mubr.f32.mxu0 %v8172_v0  ;;  %v2044_v2 = vld [vmem:[%s6970_s12 + $0x58] sm:$0xff] }
 0x2b6   : > { %v1414_v54 = vmul.f32 %v1319_v3, %v7252_v59  ;;  %v2046_v3 = vld [vmem:[%s6970_s12 + $0x68] sm:$0xff] }
 0x2b8   : > { %5031 = vmatmul.mubr.msk.f32.gmra.mrb[94].mxu0 %vm1454_vm3, %v1414_v54  ;;  %5752 = vmatprep.mubr.msk.f32.mxu1 %vm1454_vm3, %v1414_v54  ;;  %v5923_v5 = vpack.c.bf16 %v1415_v52, %v1414_v54  ;;  %v2045_v54 = vld [vmem:[%s6970_s12 + $0x60] sm:$0xff] }
 0x2b9   : > { %5753 = vmatmul.mubr.msk.f32.gmra.mrb[82].mxu1 %vm1454_vm3, %v1415_v52  ;;  %1717 = vmatprep.mubr.f32.mxu0 %v8172_v0 }
 0x2ba   : > { %5924 = vmatpush1.bf16.msra.mxu1 %v5923_v5  ;;  %v2048_v5 = vld [vmem:[%s6970_s12 + $0x78] sm:$0xff] }
 0x2bb   : > { %5925 = vmatprep.subr.bf16.mxu1 %v8170_v30 }
 0x2bc   : > { %v5693_v7 = vpop.f32.mrb[52].mxu1  ;;  %5032 = vmatmul.mubr.msk.f32.gmra.mrb[96].mxu0 %vm1454_vm3, %v1415_v52  ;;  %v2043_v52 = vld [vmem:[%s6970_s12 + $0x50] sm:$0xff] }
 0x2bd   : > { %v1417_v57 = vmul.f32 %v5693_v7, %v7255_v62  ;;  %v1329_v8 = vpop.f32.mrb[53].mxu1  ;;  %1723 = vmatprep.mubr.f32.mxu0 %v8172_v0  ;;  %v2047_v7 = vld [vmem:[%s6970_s12 + $0x70] sm:$0xff] }
 0x2be   : > { %v1416_v59 = vmul.f32 %v1329_v8, %v7257_v1  ;;  %v2331_v8 = vld [vmem:[%s8152_s3 + $0xb0] sm:$0xff] }
 0x2c0   : > { %5033 = vmatmul.mubr.msk.f32.gmra.mrb[98].mxu0 %vm1454_vm3, %v1416_v59  ;;  %5755 = vmatprep.mubr.msk.f32.mxu1 %vm1454_vm3, %v1416_v59  ;;  %v5926_v10 = vpack.c.bf16 %v1417_v57, %v1416_v59  ;;  %v2333_v59 = vld [vmem:[%s8152_s3 + $0xc8] sm:$0xff] }
 0x2c1   : > { %5756 = vmatmul.mubr.msk.f32.gmra.mrb[84].mxu1 %vm1454_vm3, %v1417_v57  ;;  %1729 = vmatprep.mubr.f32.mxu0 %v8172_v0 }
 0x2c2   : > { %5927 = vmatpush1.bf16.msra.mxu1 %v5926_v10  ;;  %v5954_v10 = vpack.c.bf16 %v2333_v59, %v2331_v8  ;;  %v2087_v59 = vld [vmem:[%s6970_s12 + $0x1b0] sm:$0xff] }
 0x2c3   : > { %5928 = vmatprep.subr.bf16.mxu1 %v8170_v30 }
 0x2c4   : > { %v5696_v12 = vpop.f32.mrb[54].mxu1  ;;  %5034 = vmatmul.mubr.msk.f32.gmra.mrb[100].mxu0 %vm1454_vm3, %v1417_v57  ;;  %v2050_v57 = vld [vmem:[%s6970_s12 + $0x88] sm:$0xff] }
 0x2c5   : > { %v1419_v62 = vmul.f32 %v5696_v12, %v7260_v4  ;;  %v1339_v13 = vpop.f32.mrb[55].mxu1  ;;  %1735 = vmatprep.mubr.f32.mxu0 %v8172_v0  ;;  %v2049_v12 = vld [vmem:[%s6970_s12 + $0x80] sm:$0xff] }
 0x2c6   : > { %v1418_v1 = vmul.f32 %v1339_v13, %v7262_v6  ;;  %v2332_v13 = vld [vmem:[%s8152_s3 + $0xc0] sm:$0xff] }
 0x2c8   : > { %5035 = vmatmul.mubr.msk.f32.gmra.mrb[102].mxu0 %vm1454_vm3, %v1418_v1  ;;  %5758 = vmatprep.mubr.msk.f32.mxu1 %vm1454_vm3, %v1418_v1  ;;  %v5929_v16 = vpack.c.bf16 %v1419_v62, %v1418_v1  ;;  %v2052_v1 = vld [vmem:[%s6970_s12 + $0x98] sm:$0xff] }
 0x2c9   : > { %5759 = vmatmul.mubr.msk.f32.gmra.mrb[86].mxu1 %vm1454_vm3, %v1419_v62  ;;  %1741 = vmatprep.mubr.f32.mxu0 %v8172_v0 }
 0x2ca   : > { %5930 = vmatpush1.bf16.msra.mxu1 %v5929_v16 }
 0x2cb   : > { %5931 = vmatprep.subr.bf16.mxu1 %v8170_v30 }
 0x2cc   : > { %v5699_v14 = vpop.f32.mrb[56].mxu1  ;;  %5036 = vmatmul.mubr.msk.f32.gmra.mrb[104].mxu0 %vm1454_vm3, %v1419_v62  ;;  %v2330_v62 = vld [vmem:[%s8152_s3 + $0xa8] sm:$0xff] }
 0x2cd   : > { %v1421_v4 = vmul.f32 %v5699_v14, %v7265_v9  ;;  %v1349_v17 = vpop.f32.mrb[57].mxu1  ;;  %1747 = vmatprep.mubr.f32.mxu0 %v8172_v0  ;;  %v2324_v9 = vld [vmem:[%s8152_s3 + $0x60] sm:$0xff]  ;;  %v5956_v16 = vpack.c.bf16 %v2332_v13, %v2330_v62  ;;  %v2051_v14 = vld [vmem:[%s6970_s12 + $0x90] sm:$0xff]  ;;  %v2090_v62 = vld [vmem:[%s6970_s12 + $0x1c8] sm:$0xff] }
 0x2ce   : > { %v1420_v6 = vmul.f32 %v1349_v17, %v7267_v11  ;;  %v5948_v22 = vpack.c.bf16 %v2324_v9, %v2322_v25  ;;  %v2053_v17 = vld [vmem:[%s6970_s12 + $0xa0] sm:$0xff]  ;;  %v2060_v25 = vld [vmem:[%s6970_s12 + $0xd8] sm:$0xff]  ;;  %v2059_v9 = vld [vmem:[%s6970_s12 + $0xd0] sm:$0xff] }
 0x2d0   : > { %5037 = vmatmul.mubr.msk.f32.gmra.mrb[106].mxu0 %vm1454_vm3, %v1420_v6  ;;  %5761 = vmatprep.mubr.msk.f32.mxu1 %vm1454_vm3, %v1420_v6  ;;  %v5932_v11 = vpack.c.bf16 %v1421_v4, %v1420_v6  ;;  %v2056_v6 = vld [vmem:[%s6970_s12 + $0xb8] sm:$0xff] }
 0x2d1   : > { %5762 = vmatmul.mubr.msk.f32.gmra.mrb[88].mxu1 %vm1454_vm3, %v1421_v4  ;;  %1753 = vmatprep.mubr.f32.mxu0 %v8172_v0 }
 0x2d2   : > { %5933 = vmatpush1.bf16.msra.mxu1 %v5932_v11  ;;  %5949 = vmatpush1.bf16.msra.mxu0 %v5948_v22  ;;  %v2062_v11 = vld [vmem:[%s6970_s12 + $0xe8] sm:$0xff]  ;;  %v2061_v22 = vld [vmem:[%s6970_s12 + $0xe0] sm:$0xff] }
 0x2d3   : > { %5934 = vmatprep.subr.bf16.mxu1 %v8170_v30 }
 0x2d4   : > { %v5702_v28 = vpop.f32.mrb[58].mxu1  ;;  %5038 = vmatmul.mubr.msk.f32.gmra.mrb[108].mxu0 %vm1454_vm3, %v1421_v4  ;;  %v2054_v4 = vld [vmem:[%s6970_s12 + $0xa8] sm:$0xff] }
 0x2d5   : > { %v1423_v24 = vmul.f32 %v5702_v28, %v7270_v15  ;;  %v1359_v33 = vpop.f32.mrb[59].mxu1  ;;  %1759 = vmatprep.mubr.f32.mxu0 %v8172_v0  ;;  %v2064_v28 = vld [vmem:[%s6970_s12 + $0xf8] sm:$0xff] }
 0x2d6   : > { %v1422_v36 = vmul.f32 %v1359_v33, %v7272_v18  ;;  %v2066_v33 = vld [vmem:[%s6970_s12 + $0x108] sm:$0xff] }
 0x2d8   : > { %5039 = vmatmul.mubr.msk.f32.gmra.mrb[110].mxu0 %vm1454_vm3, %v1422_v36  ;;  %5764 = vmatprep.mubr.msk.f32.mxu1 %vm1454_vm3, %v1422_v36  ;;  %v5935_v27 = vpack.c.bf16 %v1423_v24, %v1422_v36  ;;  %v2335_v36 = vld [vmem:[%s8152_s3 + $0xe0] sm:$0xff] }
 0x2d9   : > { %5765 = vmatmul.mubr.msk.f32.gmra.mrb[90].mxu1 %vm1454_vm3, %v1423_v24  ;;  %1765 = vmatprep.mubr.f32.mxu0 %v8172_v0 }
 0x2da   : > { %5936 = vmatpush1.bf16.msra.mxu1 %v5935_v27  ;;  %v2337_v27 = vld [vmem:[%s8152_s3 + $0xf8] sm:$0xff] }
 0x2db   : > { %5937 = vmatprep.subr.bf16.mxu1 %v8170_v30 }
 0x2dc   : > { %v5705_v38 = vpop.f32.mrb[60].mxu1  ;;  %5040 = vmatmul.mubr.msk.f32.gmra.mrb[112].mxu0 %vm1454_vm3, %v1423_v24  ;;  %v2063_v24 = vld [vmem:[%s6970_s12 + $0xf0] sm:$0xff] }
 0x2dd   : > { %v1425_v15 = vmul.f32 %v5705_v38, %v7275_v23  ;;  %v1369_v29 = vpop.f32.mrb[61].mxu1  ;;  %1771 = vmatprep.mubr.f32.mxu0 %v8172_v0  ;;  %v5958_v38 = vpack.c.bf16 %v2337_v27, %v2335_v36 }
 0x2de   : > { %v1424_v18 = vmul.f32 %v1369_v29, %v7277_v26  ;;  %v2334_v29 = vld [vmem:[%s8152_s3 + $0xd8] sm:$0xff] }
 0x2e0   : > { %5041 = vmatmul.mubr.msk.f32.gmra.mrb[114].mxu0 %vm1454_vm3, %v1424_v18  ;;  %5767 = vmatprep.mubr.msk.f32.mxu1 %vm1454_vm3, %v1424_v18  ;;  %v5938_v41 = vpack.c.bf16 %v1425_v15, %v1424_v18  ;;  %v2336_v18 = vld [vmem:[%s8152_s3 + $0xf0] sm:$0xff] }
 0x2e1   : > { %5768 = vmatmul.mubr.msk.f32.gmra.mrb[92].mxu1 %vm1454_vm3, %v1425_v15  ;;  %1777 = vmatprep.mubr.f32.mxu0 %v8172_v0 }
 0x2e2   : > { %5939 = vmatpush1.bf16.msra.mxu1 %v5938_v41  ;;  %v2068_v41 = vld [vmem:[%s6970_s12 + $0x118] sm:$0xff] }
 0x2e3   : > { %5940 = vmatprep.subr.bf16.mxu1 %v8170_v30 }
 0x2e4   : > { %v5708_v45 = vpop.f32.mrb[62].mxu1  ;;  %5042 = vmatmul.mubr.msk.f32.gmra.mrb[116].mxu0 %vm1454_vm3, %v1425_v15  ;;  %v2065_v15 = vld [vmem:[%s6970_s12 + $0x100] sm:$0xff] }
 0x2e5   : > { %v1427_v23 = vmul.f32 %v5708_v45, %v7280_v31  ;;  %v1379_v32 = vpop.f32.mrb[63].mxu1  ;;  %1783 = vmatprep.mubr.f32.mxu0 %v8172_v0  ;;  %v5960_v45 = vpack.c.bf16 %v2336_v18, %v2334_v29 }
 0x2e6   : > { %v1426_v26 = vmul.f32 %v1379_v32, %v7282_v35  ;;  %v2034_v35 = vld [vmem:[%s6970_s12 + $0x8] sm:$0xff] }
 0x2e7   : > { %v2070_v32 = vld [vmem:[%s6970_s12 + $0x128] sm:$0xff] }
 0x2e8   : > { %5043 = vmatmul.mubr.msk.f32.gmra.mrb[118].mxu0 %vm1454_vm3, %v1426_v26  ;;  %5770 = vmatprep.mubr.msk.f32.mxu1 %vm1454_vm3, %v1426_v26  ;;  %v5941_v46 = vpack.c.bf16 %v1427_v23, %v1426_v26  ;;  %v2069_v26 = vld [vmem:[%s6970_s12 + $0x120] sm:$0xff] }
 0x2e9   : > { %v5711_v34 = vpop.f32.mrb[64].mxu1  ;;  %5771 = vmatmul.mubr.msk.f32.gmra.mrb[94].mxu1 %vm1454_vm3, %v1427_v23  ;;  %1789 = vmatprep.mubr.f32.mxu0 %v8172_v0 }
 0x2ea   : > { %v1429_v48 = vmul.f32 %v5711_v34, %v7285_v40  ;;  %v1389_v31 = vpop.f32.mrb[65].mxu1  ;;  %5942 = vmatpush1.bf16.msra.mxu1 %v5941_v46  ;;  %v2327_v40 = vld [vmem:[%s8152_s3 + $0x80] sm:$0xff]  ;;  %v2071_v34 = vld [vmem:[%s6970_s12 + $0x130] sm:$0xff] }
 0x2eb   : > { %v1428_v50 = vmul.f32 %v1389_v31, %v7287_v43  ;;  %5943 = vmatprep.subr.bf16.mxu1 %v8170_v30  ;;  %v2329_v43 = vld [vmem:[%s8152_s3 + $0x98] sm:$0xff]  ;;  %v2072_v46 = vld [vmem:[%s6970_s12 + $0x138] sm:$0xff]  ;;  %v2073_v31 = vld [vmem:[%s6970_s12 + $0x140] sm:$0xff] }
 0x2ec   : > { %5044 = vmatmul.mubr.msk.f32.gmra.mrb[120].mxu0 %vm1454_vm3, %v1427_v23  ;;  %v5950_v39 = vpack.c.bf16 %v2329_v43, %v2327_v40  ;;  %v2067_v23 = vld [vmem:[%s6970_s12 + $0x110] sm:$0xff]  ;;  %v2077_v40 = vld [vmem:[%s6970_s12 + $0x160] sm:$0xff]  ;;  %v2080_v43 = vld [vmem:[%s6970_s12 + $0x178] sm:$0xff] }
 0x2ed   : > { %5773 = vmatprep.mubr.msk.f32.mxu1 %vm1454_vm3, %v1428_v50  ;;  %1795 = vmatprep.mubr.f32.mxu0 %v8172_v0  ;;  %v5944_v37 = vpack.c.bf16 %v1429_v48, %v1428_v50 }
 0x2ee   : > { %5774 = vmatmul.mubr.msk.f32.gmra.mrb[96].mxu1 %vm1454_vm3, %v1429_v48  ;;  %5951 = vmatprep.subr.bf16.mxu0 %v5950_v39  ;;  %v2079_v39 = vld [vmem:[%s6970_s12 + $0x170] sm:$0xff] }
 0x2ef   : > { %5945 = vmatpush1.bf16.msra.mxu1 %v5944_v37  ;;  %2161 = vmatprep.mubr.f32.mxu1 %v2034_v35  ;;  %v2075_v35 = vld [vmem:[%s6970_s12 + $0x150] sm:$0xff]  ;;  %v2078_v37 = vld [vmem:[%s6970_s12 + $0x168] sm:$0xff] }
 0x2f0   : > { %5045 = vmatmul.mubr.msk.f32.gmra.mrb[122].mxu0 %vm1454_vm3, %v1428_v50  ;;  %v2076_v50 = vld [vmem:[%s6970_s12 + $0x158] sm:$0xff] }
 0x2f1   : > { %1801 = vmatprep.mubr.f32.mxu0 %v8172_v0  ;;  %5953 = vmatpush1.bf16.msra.mxu0 %v5952_v56 }
 0x2f2   : > { %2162 = vmatmul.mubr.f32.vlgmr.msra.gmra.mrb[98].mxu1 %v2033_v51  ;;  %5955 = vmatprep.subr.bf16.mxu0 %v5954_v10 }
 0x2f3   : > { %2166 = vmatprep.mubr.f32.mxu1 %v2036_v42  ;;  %v2082_v42 = vld [vmem:[%s6970_s12 + $0x188] sm:$0xff] }
 0x2f4   : > { %5046 = vmatmul.mubr.msk.f32.gmra.mrb[124].mxu0 %vm1454_vm3, %v1429_v48  ;;  %v2074_v48 = vld [vmem:[%s6970_s12 + $0x148] sm:$0xff] }
 0x2f5   : > { %2498 = vmatprep.mubr.f32.mxu0 %v8172_v0  ;;  %5957 = vmatpush1.bf16.msra.mxu0 %v5956_v16  ;;  %v2089_v16 = vld [vmem:[%s6970_s12 + $0x1c0] sm:$0xff] }
 0x2f6   : > { %2167 = vmatmul.mubr.f32.gmra.mrb[100].mxu1 %v2035_v44  ;;  %5959 = vmatprep.subr.bf16.mxu0 %v5958_v38 }
 0x2f7   : > { %2171 = vmatprep.mubr.f32.mxu1 %v2038_v58  ;;  %v2081_v58 = vld [vmem:[%s6970_s12 + $0x180] sm:$0xff] }
 0x2f9   : > { %5961 = vmatpush1.bf16.msra.mxu0 %v5960_v45 }
 0x2fa   : > { %2172 = vmatmul.mubr.f32.gmra.mrb[102].mxu1 %v2037_v60 }
 0x2fb   : > { %2176 = vmatprep.mubr.f32.mxu1 %v2040_v47  ;;  %v2084_v47 = vld [vmem:[%s6970_s12 + $0x198] sm:$0xff] }
 0x2fe   : > { %2177 = vmatmul.mubr.f32.gmra.mrb[104].mxu1 %v2039_v61 }
 0x2ff   : > { %2181 = vmatprep.mubr.f32.mxu1 %v2042_v49  ;;  %v2083_v49 = vld [vmem:[%s6970_s12 + $0x190] sm:$0xff] }
 0x302   : > { %2182 = vmatmul.mubr.f32.gmra.mrb[106].mxu1 %v2041_v63 }
 0x303   : > { %2186 = vmatprep.mubr.f32.mxu1 %v2044_v2 }
 0x306   : > { %2187 = vmatmul.mubr.f32.gmra.mrb[108].mxu1 %v2043_v52  ;;  %v2086_v52 = vld [vmem:[%s6970_s12 + $0x1a8] sm:$0xff] }
 0x307   : > { %2191 = vmatprep.mubr.f32.mxu1 %v2046_v3 }
 0x30a   : > { %2192 = vmatmul.mubr.f32.gmra.mrb[110].mxu1 %v2045_v54 }
 0x30b   : > { %2196 = vmatprep.mubr.f32.mxu1 %v2048_v5  ;;  %v2085_v5 = vld [vmem:[%s6970_s12 + $0x1a0] sm:$0xff] }
 0x30e   : > { %2197 = vmatmul.mubr.f32.gmra.mrb[112].mxu1 %v2047_v7 }
 0x30f   : > { %2201 = vmatprep.mubr.f32.mxu1 %v2050_v57  ;;  %v2088_v57 = vld [vmem:[%s6970_s12 + $0x1b8] sm:$0xff] }
 0x312   : > { %2202 = vmatmul.mubr.f32.gmra.mrb[114].mxu1 %v2049_v12 }
 0x313   : > { %2206 = vmatprep.mubr.f32.mxu1 %v2052_v1 }
 0x316   : > { %2207 = vmatmul.mubr.f32.gmra.mrb[116].mxu1 %v2051_v14 }
 0x317   : > { %2211 = vmatprep.mubr.f32.mxu1 %v2054_v4  ;;  %v2092_v4 = vld [vmem:[%s6970_s12 + $0x1d8] sm:$0xff] }
 0x31a   : > { %2212 = vmatmul.mubr.f32.gmra.mrb[118].mxu1 %v2053_v17 }
 0x31b   : > { %2216 = vmatprep.mubr.f32.mxu1 %v2056_v6  ;;  %v2091_v6 = vld [vmem:[%s6970_s12 + $0x1d0] sm:$0xff] }
 0x31e   : > { %2217 = vmatmul.mubr.f32.gmra.mrb[120].mxu1 %v2055_v20 }
 0x31f   : > { %2221 = vmatprep.mubr.f32.mxu1 %v2058_v19 }
 0x322   : > { %2222 = vmatmul.mubr.f32.gmra.mrb[122].mxu1 %v2057_v21  ;;  %v2094_v21 = vld [vmem:[%s6970_s12 + $0x1e8] sm:$0xff] }
 0x323   : > { %2226 = vmatprep.mubr.f32.mxu1 %v2060_v25 }
 0x326   : > { %2227 = vmatmul.mubr.f32.gmra.mrb[124].mxu1 %v2059_v9 }
 0x327   : > { %2231 = vmatprep.mubr.f32.mxu1 %v2062_v11  ;;  %v2093_v11 = vld [vmem:[%s6970_s12 + $0x1e0] sm:$0xff] }
 0x32a   : > { %2232 = vmatmul.mubr.f32.gmra.mrb[126].mxu1 %v2061_v22 }
 0x32b   : > { %2236 = vmatprep.mubr.f32.mxu1 %v2064_v28  ;;  %v2096_v28 = vld [vmem:[%s6970_s12 + $0x1f8] sm:$0xff] }
 0x32e   : > { %2237 = vmatmul.mubr.f32.gmra.mrb[128].mxu1 %v2063_v24 }
 0x32f   : > { %2241 = vmatprep.mubr.f32.mxu1 %v2066_v33  ;;  %v2095_v33 = vld [vmem:[%s6970_s12 + $0x1f0] sm:$0xff] }
 0x332   : > { %2242 = vmatmul.mubr.f32.gmra.mrb[130].mxu1 %v2065_v15 }
 0x333   : > { %2246 = vmatprep.mubr.f32.mxu1 %v2068_v41 }
 0x336   : > { %2247 = vmatmul.mubr.f32.gmra.mrb[132].mxu1 %v2067_v23 }
 0x337   : > { %2251 = vmatprep.mubr.f32.mxu1 %v2070_v32 }
 0x33a   : > { %2252 = vmatmul.mubr.f32.gmra.mrb[134].mxu1 %v2069_v26 }
 0x33b   : > { %2256 = vmatprep.mubr.f32.mxu1 %v2072_v46 }
 0x33e   : > { %2257 = vmatmul.mubr.f32.gmra.mrb[136].mxu1 %v2071_v34 }
 0x33f   : > { %2261 = vmatprep.mubr.f32.mxu1 %v2074_v48 }
 0x342   : > { %2262 = vmatmul.mubr.f32.gmra.mrb[138].mxu1 %v2073_v31 }
 0x343   : > { %2266 = vmatprep.mubr.f32.mxu1 %v2076_v50 }
 0x346   : > { %2267 = vmatmul.mubr.f32.gmra.mrb[140].mxu1 %v2075_v35 }
 0x347   : > { %2271 = vmatprep.mubr.f32.mxu1 %v2078_v37 }
 0x34a   : > { %2272 = vmatmul.mubr.f32.gmra.mrb[142].mxu1 %v2077_v40 }
 0x34b   : > { %v7561_v51 = vpop.f32.mrb[62].mxu0  ;;  %2276 = vmatprep.mubr.f32.mxu1 %v2080_v43 }
 0x34c   : > { %v7564_v53 = vpop.f32.mrb[63].mxu0  ;;  %v7566_v55 = vpop.f32.mrb[66].mxu1 }
 0x34d   : > { %8201 = vst [vmem:[#allocation24_spill] sm:$0xff] %v7566_v55  ;;  %v7569_v56 = vpop.f32.mrb[67].mxu1 }
 0x34e   : > { %8202 = vst [vmem:[#allocation25_spill] sm:$0xff] %v7569_v56  ;;  %2277 = vmatmul.mubr.f32.gmra.mrb[144].mxu1 %v2079_v39 }
 0x34f   : > { %v7571_v44 = vpop.f32.mrb[64].mxu0  ;;  %2281 = vmatprep.mubr.f32.mxu1 %v2082_v42 }
 0x350   : > { %v7574_v60 = vpop.f32.mrb[65].mxu0 }
 0x352   : > { %2282 = vmatmul.mubr.f32.gmra.mrb[146].mxu1 %v2081_v58 }
 0x353   : > { %v7577_v61 = vpop.f32.mrb[66].mxu0  ;;  %2286 = vmatprep.mubr.f32.mxu1 %v2084_v47 }
 0x354   : > { %v7580_v63 = vpop.f32.mrb[67].mxu0  ;;  %v7582_v2 = vpop.f32.mrb[68].mxu1 }
 0x355   : > { %8203 = vst [vmem:[#allocation26_spill] sm:$0xff] %v7582_v2  ;;  %v7585_v3 = vpop.f32.mrb[69].mxu1 }
 0x356   : > { %8204 = vst [vmem:[#allocation27_spill] sm:$0xff] %v7585_v3  ;;  %2287 = vmatmul.mubr.f32.gmra.mrb[148].mxu1 %v2083_v49 }
 0x357   : > { %v7587_v54 = vpop.f32.mrb[68].mxu0  ;;  %2291 = vmatprep.mubr.f32.mxu1 %v2086_v52 }
 0x358   : > { %v7590_v7 = vpop.f32.mrb[69].mxu0 }
 0x35a   : > { %2292 = vmatmul.mubr.f32.gmra.mrb[150].mxu1 %v2085_v5 }
 0x35b   : > { %v7593_v8 = vpop.f32.mrb[70].mxu0  ;;  %2296 = vmatprep.mubr.f32.mxu1 %v2088_v57 }
 0x35c   : > { %v7596_v10 = vpop.f32.mrb[71].mxu0  ;;  %v7598_v12 = vpop.f32.mrb[70].mxu1 }
 0x35d   : > { %8205 = vst [vmem:[#allocation28_spill] sm:$0xff] %v7598_v12  ;;  %v7601_v13 = vpop.f32.mrb[71].mxu1 }
 0x35e   : > { %8206 = vst [vmem:[#allocation29_spill] sm:$0xff] %v7601_v13  ;;  %2297 = vmatmul.mubr.f32.gmra.mrb[152].mxu1 %v2087_v59 }
 0x35f   : > { %v7603_v1 = vpop.f32.mrb[72].mxu0  ;;  %2301 = vmatprep.mubr.f32.mxu1 %v2090_v62 }
 0x360   : > { %v7606_v14 = vpop.f32.mrb[73].mxu0 }
 0x362   : > { %2302 = vmatmul.mubr.f32.gmra.mrb[154].mxu1 %v2089_v16 }
 0x363   : > { %v7609_v17 = vpop.f32.mrb[74].mxu0  ;;  %2306 = vmatprep.mubr.f32.mxu1 %v2092_v4 }
 0x364   : > { %v7612_v20 = vpop.f32.mrb[75].mxu0  ;;  %v7614_v19 = vpop.f32.mrb[72].mxu1 }
 0x365   : > { %8207 = vst [vmem:[#allocation30_spill] sm:$0xff] %v7614_v19  ;;  %v7617_v25 = vpop.f32.mrb[73].mxu1  ;;  %v6262_v19 = vld [vmem:[#allocation8 + $0x4] ss:$12 sps:$4 sm:$0xff]  }
 0x366   : > { %8208 = vst [vmem:[#allocation31_spill] sm:$0xff] %v7617_v25  ;;  %2307 = vmatmul.mubr.f32.gmra.mrb[156].mxu1 %v2091_v6  ;;  %3107 = vmatprep.subr.bf16.mxu1 %v6262_v19 }
 0x367   : > { %v7619_v9 = vpop.f32.mrb[76].mxu0  ;;  %2311 = vmatprep.mubr.f32.mxu1 %v2094_v21 }
 0x368   : > { %v7622_v22 = vpop.f32.mrb[77].mxu0 }
 0x36a   : > { %2312 = vmatmul.mubr.f32.gmra.mrb[158].mxu1 %v2093_v11 }
 0x36b   : > { %v7625_v24 = vpop.f32.mrb[78].mxu0  ;;  %2316 = vmatprep.mubr.f32.mxu1 %v2096_v28 }
 0x36c   : > { %v7628_v36 = vpop.f32.mrb[79].mxu0  ;;  %v7630_v27 = vpop.f32.mrb[74].mxu1 }
 0x36d   : > { %8209 = vst [vmem:[#allocation32_spill] sm:$0xff] %v7630_v27  ;;  %v7632_v38 = vpop.f32.mrb[75].mxu1 }
 0x36e   : > { %8210 = vst [vmem:[#allocation33_spill] sm:$0xff] %v7632_v38  ;;  %2317 = vmatmul.mubr.f32.gmra.mrb[160].mxu1 %v2095_v33  ;;  %v6260_v38 = vld [vmem:[#allocation8] ss:$12 sps:$4 sm:$0xff]  }
 0x36f   : > { %v7634_v15 = vpop.f32.mrb[80].mxu0  ;;  %3108 = vmatpush1.bf16.msra.mxu1 %v6260_v38 }
 0x370   : > { %v7636_v29 = vpop.f32.mrb[81].mxu0 }
 0x373   : > { %v7638_v18 = vpop.f32.mrb[82].mxu0 }
 0x374   : > { %v7640_v41 = vpop.f32.mrb[83].mxu0  ;;  %v7642_v45 = vpop.f32.mrb[76].mxu1 }
 0x375   : > { %8211 = vst [vmem:[#allocation34_spill] sm:$0xff] %v7642_v45  ;;  %v7644_v23 = vpop.f32.mrb[77].mxu1  ;;  %v6259_v45 = vld [vmem:[#allocation8 + $0xc8] ss:$12 sps:$4 sm:$0xff]  }
 0x376   : > { %8212 = vst [vmem:[#allocation35_spill] sm:$0xff] %v7644_v23  ;;  %5298 = vmatprep.subr.bf16.mxu0 %v6259_v45  ;;  %v6266_v45 = vld [vmem:[#allocation8 + $0x1c] ss:$12 sps:$4 sm:$0xff]  }
 0x377   : > { %v7646_v32 = vpop.f32.mrb[84].mxu0  ;;  %3109 = vmatprep.subr.bf16.mxu1 %v6266_v45 }
 0x378   : > { %v7648_v26 = vpop.f32.mrb[85].mxu0 }
 0x37b   : > { %v7650_v46 = vpop.f32.mrb[86].mxu0 }
 0x37c   : > { %v7652_v34 = vpop.f32.mrb[87].mxu0  ;;  %v7654_v48 = vpop.f32.mrb[78].mxu1 }
 0x37d   : > { %8213 = vst [vmem:[#allocation36_spill] sm:$0xff] %v7654_v48  ;;  %v7656_v31 = vpop.f32.mrb[79].mxu1 }
 0x37e   : > { %8214 = vst [vmem:[#allocation37_spill] sm:$0xff] %v7656_v31 }
 0x37f   : > { %v7658_v50 = vpop.f32.mrb[88].mxu0 }
 0x380   : > { %v7660_v35 = vpop.f32.mrb[89].mxu0 }
 0x383   : > { %v7662_v37 = vpop.f32.mrb[90].mxu0 }
 0x384   : > { %v7664_v40 = vpop.f32.mrb[91].mxu0  ;;  %v7666_v43 = vpop.f32.mrb[80].mxu1 }
 0x385   : > { %8215 = vst [vmem:[#allocation38_spill] sm:$0xff] %v7666_v43  ;;  %v7668_v39 = vpop.f32.mrb[81].mxu1 }
 0x386   : > { %8216 = vst [vmem:[#allocation39_spill] sm:$0xff] %v7668_v39 }
 0x387   : > { %v7670_v42 = vpop.f32.mrb[92].mxu0 }
 0x388   : > { %v7672_v58 = vpop.f32.mrb[93].mxu0 }
 0x38b   : > { %v7674_v47 = vpop.f32.mrb[94].mxu0 }
 0x38c   : > { %v7676_v49 = vpop.f32.mrb[95].mxu0  ;;  %v7678_v52 = vpop.f32.mrb[82].mxu1 }
 0x38d   : > { %8217 = vst [vmem:[#allocation40_spill] sm:$0xff] %v7678_v52  ;;  %v7680_v5 = vpop.f32.mrb[83].mxu1 }
 0x38e   : > { %8218 = vst [vmem:[#allocation41_spill] sm:$0xff] %v7680_v5 }
 0x38f   : > { %v7682_v57 = vpop.f32.mrb[96].mxu0 }
 0x390   : > { %v7684_v59 = vpop.f32.mrb[97].mxu0 }
 0x393   : > { %v7686_v62 = vpop.f32.mrb[98].mxu0 }
 0x394   : > { %v7688_v16 = vpop.f32.mrb[99].mxu0  ;;  %v7690_v4 = vpop.f32.mrb[84].mxu1 }
 0x395   : > { %8219 = vst [vmem:[#allocation42_spill] sm:$0xff] %v7690_v4  ;;  %v7692_v6 = vpop.f32.mrb[85].mxu1 }
 0x396   : > { %8220 = vst [vmem:[#allocation43_spill] sm:$0xff] %v7692_v6 }
 0x397   : > { %v7694_v21 = vpop.f32.mrb[100].mxu0 }
 0x398   : > { %v7696_v11 = vpop.f32.mrb[101].mxu0 }
 0x39b   : > { %v7698_v28 = vpop.f32.mrb[102].mxu0 }
 0x39c   : > { %v7700_v33 = vpop.f32.mrb[103].mxu0  ;;  %v7702_v30 = vpop.f32.mrb[86].mxu1 }
 0x39d   : > { %8221 = vst [vmem:[#allocation44_spill] sm:$0xff] %v7702_v30  ;;  %v7704_v0 = vpop.f32.mrb[87].mxu1 }
 0x39e   : > { %8222 = vst [vmem:[#allocation45_spill] sm:$0xff] %v7704_v0 }
 0x39f   : > { %v7706_v52 = vpop.f32.mrb[104].mxu0 }
 0x3a0   : > { %v7708_v5 = vpop.f32.mrb[105].mxu0 }
 0x3a3   : > { %v7710_v43 = vpop.f32.mrb[106].mxu0 }
 0x3a4   : > { %v7712_v4 = vpop.f32.mrb[107].mxu0  ;;  %v7714_v6 = vpop.f32.mrb[88].mxu1 }
 0x3a5   : > { %8223 = vst [vmem:[#allocation46_spill] sm:$0xff] %v7714_v6  ;;  %v7716_v39 = vpop.f32.mrb[89].mxu1 }
 0x3a6   : > { %8224 = vst [vmem:[#allocation47_spill] sm:$0xff] %v7716_v39 }
 0x3a7   : > { %v7718_v48 = vpop.f32.mrb[108].mxu0 }
 0x3a8   : > { %v7720_v31 = vpop.f32.mrb[109].mxu0 }
 0x3ab   : > { %v7722_v30 = vpop.f32.mrb[110].mxu0 }
 0x3ac   : > { %v7724_v0 = vpop.f32.mrb[111].mxu0  ;;  %v7726_v23 = vpop.f32.mrb[90].mxu1 }
 0x3ad   : > { %8225 = vst [vmem:[#allocation48_spill] sm:$0xff] %v7724_v0  ;;  %8226 = vst [vmem:[#allocation49_spill] sm:$0xff] %v7726_v23  ;;  %v7728_v27 = vpop.f32.mrb[91].mxu1  ;;  %v6264_v23 = vld [vmem:[#allocation8 + $0x18] ss:$12 sps:$4 sm:$0xff]  }
 0x3ae   : > { %8227 = vst [vmem:[#allocation50_spill] sm:$0xff] %v7728_v27  ;;  %3110 = vmatpush1.bf16.msra.mxu1 %v6264_v23  ;;  %v6272_v23 = vld [vmem:[#allocation8 + $0x48] ss:$12 sps:$4 sm:$0xff]   ;;  %v6280_v0 = vld [vmem:[#allocation8 + $0x78] ss:$12 sps:$4 sm:$0xff]  }
 0x3af   : > { %v7730_v25 = vpop.f32.mrb[112].mxu0 }
 0x3b0   : > { %8228 = vst [vmem:[#allocation51_spill] sm:$0xff] %v7730_v25  ;;  %v7732_v6 = vpop.f32.mrb[113].mxu0 }
 0x3b1   : > { %8229 = vst [vmem:[#allocation52_spill] sm:$0xff] %v7732_v6  ;;  %v6278_v6 = vld [vmem:[#allocation8 + $0x64] ss:$12 sps:$4 sm:$0xff]  }
 0x3b3   : > { %v7734_v39 = vpop.f32.mrb[114].mxu0 }
 0x3b4   : > { %8230 = vst [vmem:[#allocation53_spill] sm:$0xff] %v7734_v39  ;;  %v7736_v12 = vpop.f32.mrb[115].mxu0  ;;  %v7738_v13 = vpop.f32.mrb[92].mxu1 }
 0x3b5   : > { %8231 = vst [vmem:[#allocation54_spill] sm:$0xff] %v7736_v12  ;;  %8232 = vst [vmem:[#allocation55_spill] sm:$0xff] %v7738_v13  ;;  %v7740_v2 = vpop.f32.mrb[93].mxu1  ;;  %v6268_v12 = vld [vmem:[#allocation8 + $0x30] ss:$12 sps:$4 sm:$0xff]  }
 0x3b6   : > { %8233 = vst [vmem:[#allocation56_spill] sm:$0xff] %v7740_v2  ;;  %v6270_v13 = vld [vmem:[#allocation8 + $0x34] ss:$12 sps:$4 sm:$0xff]  }
 0x3b7   : > { %v7742_v3 = vpop.f32.mrb[116].mxu0  ;;  %3111 = vmatprep.subr.bf16.mxu1 %v6270_v13  ;;  %v6276_v13 = vld [vmem:[#allocation8 + $0x60] ss:$12 sps:$4 sm:$0xff]  }
 0x3b8   : > { %8234 = vst [vmem:[#allocation57_spill] sm:$0xff] %v7742_v3  ;;  %v7744_v27 = vpop.f32.mrb[117].mxu0  ;;  %3112 = vmatpush1.bf16.msra.mxu1 %v6268_v12  ;;  %v6282_v12 = vld [vmem:[#allocation8 + $0x7c] ss:$12 sps:$4 sm:$0xff]  }
 0x3b9   : > { %8235 = vst [vmem:[#allocation58_spill] sm:$0xff] %v7744_v27 }
 0x3bb   : > { %v7746_v19 = vpop.f32.mrb[118].mxu0 }
 0x3bc   : > { %8236 = vst [vmem:[#allocation59_spill] sm:$0xff] %v7746_v19  ;;  %v7748_v55 = vpop.f32.mrb[119].mxu0  ;;  %v7750_v38 = vpop.f32.mrb[94].mxu1  ;;  %v6274_v19 = vld [vmem:[#allocation8 + $0x4c] ss:$12 sps:$4 sm:$0xff]  }
 0x3bd   : > { %8237 = vst [vmem:[#allocation60_spill] sm:$0xff] %v7748_v55  ;;  %8238 = vst [vmem:[#allocation61_spill] sm:$0xff] %v7750_v38  ;;  %v7752_v56 = vpop.f32.mrb[95].mxu1  ;;  %v6263_v55 = vld [vmem:[#allocation8 + $0x8] ss:$12 sps:$4 sm:$0xff]   ;;  %3113 = vmatprep.subr.bf16.mxu1 %v6274_v19 }
 0x3be   : > { %8239 = vst [vmem:[#allocation62_spill] sm:$0xff] %v7752_v56  ;;  %v6267_v56 = vld [vmem:[#allocation8 + $0xe0] ss:$12 sps:$4 sm:$0xff]   ;;  %3114 = vmatpush1.bf16.msra.mxu1 %v6272_v23 }
 0x3bf   : > { %v7754_v39 = vpop.f32.mrb[120].mxu0  ;;  %3115 = vmatprep.subr.bf16.mxu1 %v6278_v6  ;;  %v6283_v6 = vld [vmem:[#allocation8 + $0x110] ss:$12 sps:$4 sm:$0xff]  }
 0x3c0   : > { %8240 = vst [vmem:[#allocation63_spill] sm:$0xff] %v7754_v39  ;;  %v7756_v2 = vpop.f32.mrb[121].mxu0 }
 0x3c1   : > { %8241 = vst [vmem:[#allocation64_spill] sm:$0xff] %v7756_v2  ;;  %v7758_v45 = vpop.f32.mrb[96].mxu1 }
 0x3c2   : > { %8242 = vst [vmem:[#allocation65_spill] sm:$0xff] %v7758_v45  ;;  %v7760_v27 = vpop.f32.mrb[97].mxu1  ;;  %3116 = vmatpush1.bf16.msra.mxu1 %v6276_v13  ;;  %v6287_v13 = vld [vmem:[#allocation8 + $0x50] ss:$12 sps:$4 sm:$0xff]  }
 0x3c3   : > { %8243 = vst [vmem:[#allocation66_spill] sm:$0xff] %v7760_v27  ;;  %v7762_v3 = vpop.f32.mrb[122].mxu0  ;;  %v8247_v27 = vmov 0.0   ;;  %3117 = vmatprep.subr.bf16.mxu1 %v6282_v12  ;;  %v6291_v12 = vld [vmem:[#allocation8 + $0x128] ss:$12 sps:$4 sm:$0xff]  }
 0x3c4   : > { %8244 = vst [vmem:[#allocation67_spill] sm:$0xff] %v7762_v3  ;;  %v7764_v38 = vpop.f32.mrb[123].mxu0  ;;  %v6271_v3 = vld [vmem:[#allocation8 + $0x20] ss:$12 sps:$4 sm:$0xff]  }
 0x3c5   : > { %8245 = vst [vmem:[#allocation68_spill] sm:$0xff] %v7764_v38  ;;  %v2163_v25 = vpop.f32.mrb[98].mxu1  ;;  %v6275_v38 = vld [vmem:[#allocation8 + $0xf8] ss:$12 sps:$4 sm:$0xff]  }
 0x3c6   : > { %v2165_v39 = vpop.f32.mrb[99].mxu1  ;;  %5079 = vmatmul.mubr.msk.f32.vlgmr.msra.gmra.mrb[126].mxu0 %vm1454_vm3, %v2163_v25  ;;  %v6286_v25 = vld [vmem:[#allocation8 + $0x94] ss:$12 sps:$4 sm:$0xff]   ;;  %3118 = vmatpush1.bf16.msra.mxu1 %v6280_v0  ;;  %v6294_v0 = vld [vmem:[#allocation8 + $0xc4] ss:$12 sps:$4 sm:$0xff]  }
 0x3c7   : > { %v7767_v45 = vpop.f32.mrb[124].mxu0  ;;  %2504 = vmatprep.mubr.f32.mxu0 %v8247_v27  ;;  %5299 = vmatpush3.bf16.msra.mxu0 %v6263_v55  ;;  %v6279_v39 = vld [vmem:[#allocation8 + $0x38] ss:$12 sps:$4 sm:$0xff]  }
 0x3c8   : > { %8246 = vst [vmem:[#allocation69_spill] sm:$0xff] %v7767_v45  ;;  %v7770_v2 = vpop.f32.mrb[125].mxu0  ;;  %5300 = vmatprep.subr.bf16.mxu0 %v6267_v56  ;;  %v6284_v45 = vld [vmem:[#allocation8 + $0x90] ss:$12 sps:$4 sm:$0xff]   ;;  %3119 = vmatprep.subr.bf16.mxu1 %v6286_v25  ;;  %v6290_v56 = vld [vmem:[#allocation8 + $0xac] ss:$12 sps:$4 sm:$0xff]  }
 0x3c9   : > { %8248 = vst [vmem:[#allocation70_spill] sm:$0xff] %v7770_v2  ;;  %v2168_v19 = vpop.f32.mrb[100].mxu1 }
 0x3ca   : > { %v2170_v23 = vpop.f32.mrb[101].mxu1  ;;  %5080 = vmatmul.mubr.msk.f32.gmra.mrb[128].mxu0 %vm1454_vm3, %v2168_v19  ;;  %3120 = vmatpush1.bf16.msra.mxu1 %v6284_v45  ;;  %v6298_v45 = vld [vmem:[#allocation8 + $0xdc] ss:$12 sps:$4 sm:$0xff]  }
 0x3cb   : > { %2510 = vmatprep.mubr.f32.mxu0 %v8247_v27  ;;  %5301 = vmatpush3.bf16.msra.mxu0 %v6271_v3  ;;  %v6288_v3 = vld [vmem:[#allocation8 + $0xa8] ss:$12 sps:$4 sm:$0xff]  }
 0x3cc   : > { %5302 = vmatprep.subr.bf16.mxu0 %v6275_v38  ;;  %3121 = vmatprep.subr.bf16.mxu1 %v6290_v56  ;;  %v6299_v38 = vld [vmem:[#allocation8 + $0x140] ss:$12 sps:$4 sm:$0xff]   ;;  %v6307_v56 = vld [vmem:[#allocation8 + $0x158] ss:$12 sps:$4 sm:$0xff]  }
 0x3cd   : > { %v2173_v55 = vpop.f32.mrb[102].mxu1 }
 0x3ce   : > { %v2175_v2 = vpop.f32.mrb[103].mxu1  ;;  %5081 = vmatmul.mubr.msk.f32.gmra.mrb[130].mxu0 %vm1454_vm3, %v2173_v55  ;;  %3122 = vmatpush1.bf16.msra.mxu1 %v6288_v3  ;;  %v6311_v3 = vld [vmem:[#allocation8 + $0x98] ss:$12 sps:$4 sm:$0xff]  }
 0x3cf   : > { %2516 = vmatprep.mubr.f32.mxu0 %v8247_v27  ;;  %5303 = vmatpush3.bf16.msra.mxu0 %v6279_v39  ;;  %v6295_v2 = vld [vmem:[#allocation8 + $0x68] ss:$12 sps:$4 sm:$0xff]   ;;  %v6292_v39 = vld [vmem:[#allocation8 + $0xc0] ss:$12 sps:$4 sm:$0xff]  }
 0x3d0   : > { %5304 = vmatprep.subr.bf16.mxu0 %v6283_v6  ;;  %3123 = vmatprep.subr.bf16.mxu1 %v6294_v0  ;;  %v6303_v6 = vld [vmem:[#allocation8 + $0x80] ss:$12 sps:$4 sm:$0xff]  }
 0x3d1   : > { %v2178_v19 = vpop.f32.mrb[104].mxu1 }
 0x3d2   : > { %v2180_v23 = vpop.f32.mrb[105].mxu1  ;;  %5082 = vmatmul.mubr.msk.f32.gmra.mrb[132].mxu0 %vm1454_vm3, %v2178_v19  ;;  %3124 = vmatpush1.bf16.msra.mxu1 %v6292_v39 }
 0x3d3   : > { %2522 = vmatprep.mubr.f32.mxu0 %v8247_v27  ;;  %5305 = vmatpush3.bf16.msra.mxu0 %v6287_v13  ;;  %v6296_v13 = vld [vmem:[#allocation8 + $0xd8] ss:$12 sps:$4 sm:$0xff]  }
 0x3d4   : > { %5306 = vmatprep.subr.bf16.mxu0 %v6291_v12  ;;  %3125 = vmatprep.subr.bf16.mxu1 %v6298_v45  ;;  %v6302_v12 = vld [vmem:[#allocation8 + $0xf4] ss:$12 sps:$4 sm:$0xff]  }
 0x3d5   : > { %v2183_v25 = vpop.f32.mrb[106].mxu1 }
 0x3d6   : > { %v2185_v55 = vpop.f32.mrb[107].mxu1  ;;  %5083 = vmatmul.mubr.msk.f32.gmra.mrb[134].mxu0 %vm1454_vm3, %v2183_v25  ;;  %3126 = vmatpush1.bf16.msra.mxu1 %v6296_v13  ;;  %v6300_v25 = vld [vmem:[#allocation8 + $0xf0] ss:$12 sps:$4 sm:$0xff]  }
 0x3d7   : > { %2528 = vmatprep.mubr.f32.mxu0 %v8247_v27  ;;  %5307 = vmatpush3.bf16.msra.mxu0 %v6295_v2  ;;  %v6304_v55 = vld [vmem:[#allocation8 + $0x108] ss:$12 sps:$4 sm:$0xff]  }
 0x3d8   : > { %5308 = vmatprep.subr.bf16.mxu0 %v6299_v38  ;;  %3127 = vmatprep.subr.bf16.mxu1 %v6302_v12  ;;  %v6306_v38 = vld [vmem:[#allocation8 + $0x10c] ss:$12 sps:$4 sm:$0xff]  }
 0x3d9   : > { %v2188_v19 = vpop.f32.mrb[108].mxu1 }
 0x3da   : > { %v2190_v23 = vpop.f32.mrb[109].mxu1  ;;  %5084 = vmatmul.mubr.msk.f32.gmra.mrb[136].mxu0 %vm1454_vm3, %v2188_v19  ;;  %3128 = vmatpush1.bf16.msra.mxu1 %v6300_v25  ;;  %v6308_v19 = vld [vmem:[#allocation8 + $0x120] ss:$12 sps:$4 sm:$0xff]  }
 0x3db   : > { %2534 = vmatprep.mubr.f32.mxu0 %v8247_v27  ;;  %5309 = vmatpush3.bf16.msra.mxu0 %v6303_v6  ;;  %v6310_v6 = vld [vmem:[#allocation8 + $0x124] ss:$12 sps:$4 sm:$0xff]   ;;  %v6314_v23 = vld [vmem:[#allocation8 + $0x13c] ss:$12 sps:$4 sm:$0xff]  }
 0x3dc   : > { %5310 = vmatprep.subr.bf16.mxu0 %v6307_v56  ;;  %3129 = vmatprep.subr.bf16.mxu1 %v6306_v38 }
 0x3dd   : > { %v2193_v0 = vpop.f32.mrb[110].mxu1 }
 0x3de   : > { %v2195_v2 = vpop.f32.mrb[111].mxu1  ;;  %5085 = vmatmul.mubr.msk.f32.gmra.mrb[138].mxu0 %vm1454_vm3, %v2193_v0  ;;  %3130 = vmatpush1.bf16.msra.mxu1 %v6304_v55 }
 0x3df   : > { %2540 = vmatprep.mubr.f32.mxu0 %v8247_v27  ;;  %5311 = vmatpush3.bf16.msra.mxu0 %v6311_v3  ;;  %v6312_v3 = vld [vmem:[#allocation8 + $0x138] ss:$12 sps:$4 sm:$0xff]  }
 0x3e0   : > { %3131 = vmatprep.subr.bf16.mxu1 %v6310_v6 }
 0x3e1   : > { %v2198_v39 = vpop.f32.mrb[112].mxu1 }
 0x3e2   : > { %v2200_v45 = vpop.f32.mrb[113].mxu1  ;;  %5086 = vmatmul.mubr.msk.f32.gmra.mrb[140].mxu0 %vm1454_vm3, %v2198_v39  ;;  %3132 = vmatpush1.bf16.msra.mxu1 %v6308_v19 }
 0x3e3   : > { %2546 = vmatprep.mubr.f32.mxu0 %v8247_v27  ;;  %3133 = vmatprep.subr.bf16.mxu1 %v6314_v23 }
 0x3e5   : > { %v2203_v56 = vpop.f32.mrb[114].mxu1 }
 0x3e6   : > { %v2205_v13 = vpop.f32.mrb[115].mxu1  ;;  %5087 = vmatmul.mubr.msk.f32.gmra.mrb[142].mxu0 %vm1454_vm3, %v2203_v56  ;;  %3134 = vmatpush1.bf16.msra.mxu1 %v6312_v3 }
 0x3e7   : > { %2552 = vmatprep.mubr.f32.mxu0 %v8247_v27 }
 0x3e9   : > { %v2208_v12 = vpop.f32.mrb[116].mxu1 }
 0x3ea   : > { %v2210_v0 = vpop.f32.mrb[117].mxu1  ;;  %5088 = vmatmul.mubr.msk.f32.gmra.mrb[144].mxu0 %vm1454_vm3, %v2208_v12 }
 0x3eb   : > { %2558 = vmatprep.mubr.f32.mxu0 %v8247_v27 }
 0x3ed   : > { %v2213_v25 = vpop.f32.mrb[118].mxu1 }
 0x3ee   : > { %v2215_v2 = vpop.f32.mrb[119].mxu1  ;;  %5089 = vmatmul.mubr.msk.f32.gmra.mrb[146].mxu0 %vm1454_vm3, %v2213_v25 }
 0x3ef   : > { %2564 = vmatprep.mubr.f32.mxu0 %v8247_v27 }
 0x3f1   : > { %v2218_v38 = vpop.f32.mrb[120].mxu1 }
 0x3f2   : > { %v2220_v39 = vpop.f32.mrb[121].mxu1  ;;  %5090 = vmatmul.mubr.msk.f32.gmra.mrb[148].mxu0 %vm1454_vm3, %v2218_v38 }
 0x3f3   : > { %2570 = vmatprep.mubr.f32.mxu0 %v8247_v27 }
 0x3f5   : > { %v2223_v55 = vpop.f32.mrb[122].mxu1 }
 0x3f6   : > { %v2225_v45 = vpop.f32.mrb[123].mxu1  ;;  %5091 = vmatmul.mubr.msk.f32.gmra.mrb[150].mxu0 %vm1454_vm3, %v2223_v55 }
 0x3f7   : > { %2576 = vmatprep.mubr.f32.mxu0 %v8247_v27 }
 0x3f9   : > { %v2228_v6 = vpop.f32.mrb[124].mxu1 }
 0x3fa   : > { %v2230_v56 = vpop.f32.mrb[125].mxu1  ;;  %5092 = vmatmul.mubr.msk.f32.gmra.mrb[152].mxu0 %vm1454_vm3, %v2228_v6 }
 0x3fb   : > { %2582 = vmatprep.mubr.f32.mxu0 %v8247_v27 }
 0x3fd   : > { %v2233_v19 = vpop.f32.mrb[126].mxu1 }
 0x3fe   : > { %v2235_v13 = vpop.f32.mrb[127].mxu1  ;;  %5093 = vmatmul.mubr.msk.f32.gmra.mrb[154].mxu0 %vm1454_vm3, %v2233_v19 }
 0x3ff   : > { %2588 = vmatprep.mubr.f32.mxu0 %v8247_v27 }
 0x401   : > { %v2238_v23 = vpop.f32.mrb[128].mxu1 }
 0x402   : > { %v2240_v12 = vpop.f32.mrb[129].mxu1  ;;  %5094 = vmatmul.mubr.msk.f32.gmra.mrb[156].mxu0 %vm1454_vm3, %v2238_v23  ;;  %v6317_v23 = vld [vmem:[#allocation8 + $0x154] ss:$12 sps:$4 sm:$0xff]  }
 0x403   : > { %2594 = vmatprep.mubr.f32.mxu0 %v8247_v27  ;;  %v6315_v12 = vld [vmem:[#allocation8 + $0x150] ss:$12 sps:$4 sm:$0xff]   ;;  %3135 = vmatprep.subr.bf16.mxu1 %v6317_v23 }
 0x404   : > { %3136 = vmatpush1.bf16.msra.mxu1 %v6315_v12 }
 0x405   : > { %v2243_v3 = vpop.f32.mrb[130].mxu1 }
 0x406   : > { %v2245_v0 = vpop.f32.mrb[131].mxu1  ;;  %5095 = vmatmul.mubr.msk.f32.gmra.mrb[158].mxu0 %vm1454_vm3, %v2243_v3  ;;  %v6318_v3 = vld [vmem:[#allocation8 + $0x170] ss:$12 sps:$4 sm:$0xff]  }
 0x407   : > { %2600 = vmatprep.mubr.f32.mxu0 %v8247_v27  ;;  %5312 = vmatprep.subr.bf16.mxu0 %v6318_v3 }
 0x409   : > { %v2248_v25 = vpop.f32.mrb[132].mxu1 }
 0x40a   : > { %v2250_v2 = vpop.f32.mrb[133].mxu1  ;;  %5096 = vmatmul.mubr.msk.f32.gmra.mrb[160].mxu0 %vm1454_vm3, %v2248_v25 }
 0x40b   : > { %2606 = vmatprep.mubr.f32.mxu0 %v8247_v27  ;;  %v6322_v2 = vld [vmem:[#allocation8 + $0x16c] ss:$12 sps:$4 sm:$0xff]  }
 0x40c   : > { %3137 = vmatprep.subr.bf16.mxu1 %v6322_v2 }
 0x40d   : > { %v2253_v38 = vpop.f32.mrb[134].mxu1 }
 0x40e   : > { %v2255_v39 = vpop.f32.mrb[135].mxu1  ;;  %5097 = vmatmul.mubr.msk.f32.gmra.mrb[162].mxu0 %vm1454_vm3, %v2253_v38  ;;  %v6319_v38 = vld [vmem:[#allocation8 + $0xb0] ss:$12 sps:$4 sm:$0xff]  }
 0x40f   : > { %2612 = vmatprep.mubr.f32.mxu0 %v8247_v27  ;;  %v6320_v39 = vld [vmem:[#allocation8 + $0x168] ss:$12 sps:$4 sm:$0xff]   ;;  %5313 = vmatpush3.bf16.msra.mxu0 %v6319_v38 }
 0x410   : > { %3138 = vmatpush1.bf16.msra.mxu1 %v6320_v39 }
 0x411   : > { %v2258_v55 = vpop.f32.mrb[136].mxu1 }
 0x412   : > { %v2260_v45 = vpop.f32.mrb[137].mxu1  ;;  %5098 = vmatmul.mubr.msk.f32.gmra.mrb[164].mxu0 %vm1454_vm3, %v2258_v55 }
 0x413   : > { %2618 = vmatprep.mubr.f32.mxu0 %v8247_v27 }
 0x415   : > { %v2263_v6 = vpop.f32.mrb[138].mxu1 }
 0x416   : > { %v2265_v56 = vpop.f32.mrb[139].mxu1  ;;  %5099 = vmatmul.mubr.msk.f32.gmra.mrb[166].mxu0 %vm1454_vm3, %v2263_v6  ;;  %v8249_v6 = vmov 0.0|0.0  }
 0x417   : > { %2624 = vmatprep.mubr.f32.mxu0 %v8247_v27  ;;  %6026 = vmatprep.subr.bf16.mxu0 %v8249_v6 }
 0x419   : > { %v2268_v19 = vpop.f32.mrb[140].mxu1 }
 0x41a   : > { %v2270_v13 = vpop.f32.mrb[141].mxu1  ;;  %5100 = vmatmul.mubr.msk.f32.gmra.mrb[168].mxu0 %vm1454_vm3, %v2268_v19 }
 0x41b   : > { %2630 = vmatprep.mubr.f32.mxu0 %v8247_v27 }
 0x41d   : > { %v2273_v0 = vpop.f32.mrb[142].mxu1 }
 0x41e   : > { %v2275_v25 = vpop.f32.mrb[143].mxu1  ;;  %5101 = vmatmul.mubr.msk.f32.gmra.mrb[170].mxu0 %vm1454_vm3, %v2273_v0 }
 0x41f   : > { %2636 = vmatprep.mubr.f32.mxu0 %v8247_v27 }
 0x421   : > { %v2278_v55 = vpop.f32.mrb[144].mxu1 }
 0x422   : > { %v2280_v45 = vpop.f32.mrb[145].mxu1  ;;  %5102 = vmatmul.mubr.msk.f32.gmra.mrb[172].mxu0 %vm1454_vm3, %v2278_v55 }
 0x423   : > { %2642 = vmatprep.mubr.f32.mxu0 %v8247_v27 }
 0x425   : > { %v2283_v56 = vpop.f32.mrb[146].mxu1 }
 0x426   : > { %v2285_v19 = vpop.f32.mrb[147].mxu1  ;;  %5103 = vmatmul.mubr.msk.f32.gmra.mrb[174].mxu0 %vm1454_vm3, %v2283_v56 }
 0x427   : > { %2648 = vmatprep.mubr.f32.mxu0 %v8247_v27 }
 0x429   : > { %v2288_v13 = vpop.f32.mrb[148].mxu1 }
 0x42a   : > { %v2290_v23 = vpop.f32.mrb[149].mxu1  ;;  %5104 = vmatmul.mubr.msk.f32.gmra.mrb[176].mxu0 %vm1454_vm3, %v2288_v13 }
 0x42b   : > { %2654 = vmatprep.mubr.f32.mxu0 %v8247_v27 }
 0x42d   : > { %v2293_v12 = vpop.f32.mrb[150].mxu1 }
 0x42e   : > { %v2295_v3 = vpop.f32.mrb[151].mxu1  ;;  %5105 = vmatmul.mubr.msk.f32.gmra.mrb[178].mxu0 %vm1454_vm3, %v2293_v12 }
 0x42f   : > { %2660 = vmatprep.mubr.f32.mxu0 %v8247_v27 }
 0x431   : > { %v2298_v0 = vpop.f32.mrb[152].mxu1 }
 0x432   : > { %v2300_v25 = vpop.f32.mrb[153].mxu1  ;;  %5106 = vmatmul.mubr.msk.f32.gmra.mrb[180].mxu0 %vm1454_vm3, %v2298_v0 }
 0x433   : > { %2666 = vmatprep.mubr.f32.mxu0 %v8247_v27 }
 0x435   : > { %v2303_v2 = vpop.f32.mrb[154].mxu1 }
 0x436   : > { %v2305_v38 = vpop.f32.mrb[155].mxu1  ;;  %5107 = vmatmul.mubr.msk.f32.gmra.mrb[182].mxu0 %vm1454_vm3, %v2303_v2 }
 0x437   : > { %2672 = vmatprep.mubr.f32.mxu0 %v8247_v27 }
 0x439   : > { %v2308_v39 = vpop.f32.mrb[156].mxu1 }
 0x43a   : > { %v2310_v55 = vpop.f32.mrb[157].mxu1  ;;  %5108 = vmatmul.mubr.msk.f32.gmra.mrb[184].mxu0 %vm1454_vm3, %v2308_v39 }
 0x43b   : > { %2678 = vmatprep.mubr.f32.mxu0 %v8247_v27 }
 0x43d   : > { %v2313_v45 = vpop.f32.mrb[158].mxu1 }
 0x43e   : > { %v2315_v56 = vpop.f32.mrb[159].mxu1  ;;  %5109 = vmatmul.mubr.msk.f32.gmra.mrb[186].mxu0 %vm1454_vm3, %v2313_v45 }
 0x43f   : > { %2684 = vmatprep.mubr.f32.mxu0 %v8247_v27 }
 0x441   : > { %v2318_v19 = vpop.f32.mrb[160].mxu1 }
 0x442   : > { %v2320_v13 = vpop.f32.mrb[161].mxu1  ;;  %5110 = vmatmul.mubr.msk.f32.gmra.mrb[188].mxu0 %vm1454_vm3, %v2318_v19 }
 0x499   : > { %v2500_v23 = vpop.f32.mrb[126].mxu0 }
 0x49a   : > { %v2691_v12 = vmul.f32 %v2500_v23, %v7561_v51  ;;  %v2502_v3 = vpop.f32.mrb[127].mxu0 }
 0x49b   : > { %v2692_v0 = vmul.f32 %v2502_v3, %v7564_v53 }
 0x49d   : > { %v2506_v25 = vpop.f32.mrb[128].mxu0 }
 0x49e   : > { %v2693_v2 = vmul.f32 %v2506_v25, %v7571_v44  ;;  %v2508_v38 = vpop.f32.mrb[129].mxu0 }
 0x49f   : > { %v2694_v39 = vmul.f32 %v2508_v38, %v7574_v60 }
 0x4a0   : > { %v2755_v55 = vpack.c.bf16 %v2693_v2, %v2691_v12 }
 0x4a1   : > { %v2756_v45 = vpack.c.bf16 %v2694_v39, %v2692_v0  ;;  %v2512_v56 = vpop.f32.mrb[130].mxu0 }
 0x4a2   : > { %v2695_v27 = vmul.f32 %v2512_v56, %v7577_v61  ;;  %v2514_v13 = vpop.f32.mrb[131].mxu0 }
 0x4a3   : > { %v2696_v19 = vmul.f32 %v2514_v13, %v7580_v63  ;;  %3139 = vmatprep.mubr.bf16.mxu1 %v2756_v45  ;;  %3332 = vmatprep.mubr.bf16.mxu0 %v2756_v45 }
 0x4a4   : > { %3140 = vmatmul.mubr.bf16.vlgmr.msra.gmra.mrb[164].mxu1 %v2755_v55  ;;  %3333 = vmatmul.mubr.bf16.vlgmr.msra.gmra.mrb[192].mxu0 %v2755_v55 }
 0x4a5   : > { %v2518_v51 = vpop.f32.mrb[132].mxu0 }
 0x4a6   : > { %v2697_v53 = vmul.f32 %v2518_v51, %v7587_v54  ;;  %v2520_v23 = vpop.f32.mrb[133].mxu0 }
 0x4a7   : > { %v2698_v44 = vmul.f32 %v2520_v23, %v7590_v7 }
 0x4a8   : > { %v2757_v3 = vpack.c.bf16 %v2697_v53, %v2695_v27 }
 0x4a9   : > { %v2758_v60 = vpack.c.bf16 %v2698_v44, %v2696_v19  ;;  %v2524_v12 = vpop.f32.mrb[134].mxu0 }
 0x4aa   : > { %v2699_v0 = vmul.f32 %v2524_v12, %v7593_v8  ;;  %v2526_v25 = vpop.f32.mrb[135].mxu0 }
 0x4ab   : > { %v2700_v61 = vmul.f32 %v2526_v25, %v7596_v10  ;;  %3149 = vmatprep.mubr.bf16.mxu1 %v2758_v60  ;;  %3340 = vmatprep.mubr.bf16.mxu0 %v2758_v60 }
 0x4ac   : > { %3150 = vmatmul.mubr.bf16.gmra.mrb[168].mxu1 %v2757_v3  ;;  %3341 = vmatmul.mubr.bf16.gmra.mrb[196].mxu0 %v2757_v3 }
 0x4ad   : > { %v2530_v63 = vpop.f32.mrb[136].mxu0 }
 0x4ae   : > { %v2701_v2 = vmul.f32 %v2530_v63, %v7603_v1  ;;  %v2532_v38 = vpop.f32.mrb[137].mxu0 }
 0x4af   : > { %v2702_v54 = vmul.f32 %v2532_v38, %v7606_v14 }
 0x4b0   : > { %v2759_v39 = vpack.c.bf16 %v2701_v2, %v2699_v0 }
 0x4b1   : > { %v2760_v7 = vpack.c.bf16 %v2702_v54, %v2700_v61  ;;  %v2536_v55 = vpop.f32.mrb[138].mxu0 }
 0x4b2   : > { %v2703_v45 = vmul.f32 %v2536_v55, %v7609_v17  ;;  %v2538_v56 = vpop.f32.mrb[139].mxu0 }
 0x4b3   : > { %v2704_v8 = vmul.f32 %v2538_v56, %v7612_v20  ;;  %3159 = vmatprep.mubr.bf16.mxu1 %v2760_v7  ;;  %3348 = vmatprep.mubr.bf16.mxu0 %v2760_v7 }
 0x4b4   : > { %3160 = vmatmul.mubr.bf16.gmra.mrb[172].mxu1 %v2759_v39  ;;  %3349 = vmatmul.mubr.bf16.gmra.mrb[200].mxu0 %v2759_v39 }
 0x4b5   : > { %v2542_v10 = vpop.f32.mrb[140].mxu0 }
 0x4b6   : > { %v2705_v27 = vmul.f32 %v2542_v10, %v7619_v9  ;;  %v2544_v13 = vpop.f32.mrb[141].mxu0 }
 0x4b7   : > { %v2706_v1 = vmul.f32 %v2544_v13, %v7622_v22 }
 0x4b8   : > { %v2761_v19 = vpack.c.bf16 %v2705_v27, %v2703_v45 }
 0x4b9   : > { %v2762_v14 = vpack.c.bf16 %v2706_v1, %v2704_v8  ;;  %v2548_v51 = vpop.f32.mrb[142].mxu0 }
 0x4ba   : > { %v2707_v53 = vmul.f32 %v2548_v51, %v7625_v24  ;;  %v2550_v23 = vpop.f32.mrb[143].mxu0 }
 0x4bb   : > { %v2708_v17 = vmul.f32 %v2550_v23, %v7628_v36  ;;  %3169 = vmatprep.mubr.bf16.mxu1 %v2762_v14  ;;  %3356 = vmatprep.mubr.bf16.mxu0 %v2762_v14 }
 0x4bc   : > { %3170 = vmatmul.mubr.bf16.gmra.mrb[176].mxu1 %v2761_v19  ;;  %3357 = vmatmul.mubr.bf16.gmra.mrb[204].mxu0 %v2761_v19 }
 0x4bd   : > { %v2554_v20 = vpop.f32.mrb[144].mxu0 }
 0x4be   : > { %v2709_v44 = vmul.f32 %v2554_v20, %v7634_v15  ;;  %v2556_v3 = vpop.f32.mrb[145].mxu0 }
 0x4bf   : > { %v2710_v9 = vmul.f32 %v2556_v3, %v7636_v29 }
 0x4c0   : > { %v2763_v60 = vpack.c.bf16 %v2709_v44, %v2707_v53 }
 0x4c1   : > { %v2764_v22 = vpack.c.bf16 %v2710_v9, %v2708_v17  ;;  %v2560_v12 = vpop.f32.mrb[146].mxu0 }
 0x4c2   : > { %v2711_v0 = vmul.f32 %v2560_v12, %v7638_v18  ;;  %v2562_v25 = vpop.f32.mrb[147].mxu0 }
 0x4c3   : > { %v2712_v24 = vmul.f32 %v2562_v25, %v7640_v41  ;;  %3179 = vmatprep.mubr.bf16.mxu1 %v2764_v22  ;;  %3364 = vmatprep.mubr.bf16.mxu0 %v2764_v22 }
 0x4c4   : > { %3180 = vmatmul.mubr.bf16.gmra.mrb[180].mxu1 %v2763_v60  ;;  %3365 = vmatmul.mubr.bf16.gmra.mrb[208].mxu0 %v2763_v60 }
 0x4c5   : > { %v2566_v36 = vpop.f32.mrb[148].mxu0 }
 0x4c6   : > { %v2713_v61 = vmul.f32 %v2566_v36, %v7646_v32  ;;  %v2568_v63 = vpop.f32.mrb[149].mxu0 }
 0x4c7   : > { %v2714_v15 = vmul.f32 %v2568_v63, %v7648_v26 }
 0x4c8   : > { %v2765_v2 = vpack.c.bf16 %v2713_v61, %v2711_v0 }
 0x4c9   : > { %v2766_v29 = vpack.c.bf16 %v2714_v15, %v2712_v24  ;;  %v2572_v38 = vpop.f32.mrb[150].mxu0 }
 0x4ca   : > { %v2715_v54 = vmul.f32 %v2572_v38, %v7650_v46  ;;  %v2574_v39 = vpop.f32.mrb[151].mxu0 }
 0x4cb   : > { %v2716_v18 = vmul.f32 %v2574_v39, %v7652_v34  ;;  %3189 = vmatprep.mubr.bf16.mxu1 %v2766_v29  ;;  %3372 = vmatprep.mubr.bf16.mxu0 %v2766_v29 }
 0x4cc   : > { %3190 = vmatmul.mubr.bf16.gmra.mrb[184].mxu1 %v2765_v2  ;;  %3373 = vmatmul.mubr.bf16.gmra.mrb[212].mxu0 %v2765_v2 }
 0x4cd   : > { %v2578_v41 = vpop.f32.mrb[152].mxu0 }
 0x4ce   : > { %v2717_v7 = vmul.f32 %v2578_v41, %v7658_v50  ;;  %v2580_v55 = vpop.f32.mrb[153].mxu0 }
 0x4cf   : > { %v2718_v32 = vmul.f32 %v2580_v55, %v7660_v35  ;;  %v8251_v55 = vld [vmem:[#allocation51_spill] sm:$0xff] }
 0x4d0   : > { %v2767_v45 = vpack.c.bf16 %v2717_v7, %v2715_v54 }
 0x4d1   : > { %v2768_v26 = vpack.c.bf16 %v2718_v32, %v2716_v18  ;;  %v2584_v56 = vpop.f32.mrb[154].mxu0 }
 0x4d2   : > { %v2719_v8 = vmul.f32 %v2584_v56, %v7662_v37  ;;  %v2586_v10 = vpop.f32.mrb[155].mxu0 }
 0x4d3   : > { %v2720_v46 = vmul.f32 %v2586_v10, %v7664_v40  ;;  %3199 = vmatprep.mubr.bf16.mxu1 %v2768_v26  ;;  %3380 = vmatprep.mubr.bf16.mxu0 %v2768_v26  ;;  %v8253_v10 = vld [vmem:[#allocation53_spill] sm:$0xff] }
 0x4d4   : > { %3200 = vmatmul.mubr.bf16.gmra.mrb[188].mxu1 %v2767_v45  ;;  %3381 = vmatmul.mubr.bf16.gmra.mrb[216].mxu0 %v2767_v45 }
 0x4d5   : > { %v2590_v34 = vpop.f32.mrb[156].mxu0 }
 0x4d6   : > { %v2721_v27 = vmul.f32 %v2590_v34, %v7670_v42  ;;  %v2592_v13 = vpop.f32.mrb[157].mxu0 }
 0x4d7   : > { %v2722_v50 = vmul.f32 %v2592_v13, %v7672_v58 }
 0x4d8   : > { %v2769_v1 = vpack.c.bf16 %v2721_v27, %v2719_v8 }
 0x4d9   : > { %v2770_v35 = vpack.c.bf16 %v2722_v50, %v2720_v46  ;;  %v2596_v19 = vpop.f32.mrb[158].mxu0  ;;  %v8255_v50 = vld [vmem:[#allocation57_spill] sm:$0xff] }
 0x4da   : > { %v2723_v14 = vmul.f32 %v2596_v19, %v7674_v47  ;;  %v2598_v51 = vpop.f32.mrb[159].mxu0  ;;  %v8256_v19 = vld [vmem:[#allocation58_spill] sm:$0xff] }
 0x4db   : > { %v2724_v37 = vmul.f32 %v2598_v51, %v7676_v49  ;;  %3209 = vmatprep.mubr.bf16.mxu1 %v2770_v35  ;;  %3388 = vmatprep.mubr.bf16.mxu0 %v2770_v35 }
 0x4dc   : > { %3210 = vmatmul.mubr.bf16.gmra.mrb[192].mxu1 %v2769_v1  ;;  %3389 = vmatmul.mubr.bf16.gmra.mrb[220].mxu0 %v2769_v1 }
 0x4dd   : > { %v2602_v40 = vpop.f32.mrb[160].mxu0 }
 0x4de   : > { %v2725_v53 = vmul.f32 %v2602_v40, %v7682_v57  ;;  %v2604_v23 = vpop.f32.mrb[161].mxu0 }
 0x4df   : > { %v2726_v42 = vmul.f32 %v2604_v23, %v7684_v59 }
 0x4e0   : > { %v2771_v17 = vpack.c.bf16 %v2725_v53, %v2723_v14  ;;  %v8257_v53 = vld [vmem:[#allocation59_spill] sm:$0xff] }
 0x4e1   : > { %v2772_v58 = vpack.c.bf16 %v2726_v42, %v2724_v37  ;;  %v2608_v20 = vpop.f32.mrb[162].mxu0 }
 0x4e2   : > { %v2727_v44 = vmul.f32 %v2608_v20, %v7686_v62  ;;  %v2610_v3 = vpop.f32.mrb[163].mxu0 }
 0x4e3   : > { %v2728_v47 = vmul.f32 %v2610_v3, %v7688_v16  ;;  %3219 = vmatprep.mubr.bf16.mxu1 %v2772_v58  ;;  %3396 = vmatprep.mubr.bf16.mxu0 %v2772_v58 }
 0x4e4   : > { %3220 = vmatmul.mubr.bf16.gmra.mrb[196].mxu1 %v2771_v17  ;;  %3397 = vmatmul.mubr.bf16.gmra.mrb[224].mxu0 %v2771_v17  ;;  %v8258_v17 = vld [vmem:[#allocation60_spill] sm:$0xff] }
 0x4e5   : > { %v2614_v49 = vpop.f32.mrb[164].mxu0 }
 0x4e6   : > { %v2729_v9 = vmul.f32 %v2614_v49, %v7694_v21  ;;  %v2616_v60 = vpop.f32.mrb[165].mxu0  ;;  %v8260_v49 = vld [vmem:[#allocation64_spill] sm:$0xff] }
 0x4e7   : > { %v2730_v57 = vmul.f32 %v2616_v60, %v7696_v11 }
 0x4e8   : > { %v2773_v22 = vpack.c.bf16 %v2729_v9, %v2727_v44  ;;  %v8259_v44 = vld [vmem:[#allocation63_spill] sm:$0xff] }
 0x4e9   : > { %v2774_v59 = vpack.c.bf16 %v2730_v57, %v2728_v47  ;;  %v2620_v12 = vpop.f32.mrb[166].mxu0 }
 0x4ea   : > { %v2731_v0 = vmul.f32 %v2620_v12, %v7698_v28  ;;  %v2622_v25 = vpop.f32.mrb[167].mxu0 }
 0x4eb   : > { %v2732_v62 = vmul.f32 %v2622_v25, %v7700_v33  ;;  %3229 = vmatprep.mubr.bf16.mxu1 %v2774_v59  ;;  %3404 = vmatprep.mubr.bf16.mxu0 %v2774_v59  ;;  %v8261_v59 = vld [vmem:[#allocation67_spill] sm:$0xff]  ;;  %v8262_v25 = vld [vmem:[#allocation68_spill] sm:$0xff] }
 0x4ec   : > { %3230 = vmatmul.mubr.bf16.gmra.mrb[200].mxu1 %v2773_v22  ;;  %3405 = vmatmul.mubr.bf16.gmra.mrb[228].mxu0 %v2773_v22 }
 0x4ed   : > { %v2626_v16 = vpop.f32.mrb[168].mxu0 }
 0x4ee   : > { %v2733_v24 = vmul.f32 %v2626_v16, %v7706_v52  ;;  %v2628_v36 = vpop.f32.mrb[169].mxu0 }
 0x4ef   : > { %v2734_v21 = vmul.f32 %v2628_v36, %v7708_v5 }
 0x4f0   : > { %v2775_v61 = vpack.c.bf16 %v2733_v24, %v2731_v0  ;;  %v8263_v24 = vld [vmem:[#allocation69_spill] sm:$0xff] }
 0x4f1   : > { %v2776_v11 = vpack.c.bf16 %v2734_v21, %v2732_v62  ;;  %v2632_v63 = vpop.f32.mrb[170].mxu0 }
 0x4f2   : > { %v2735_v15 = vmul.f32 %v2632_v63, %v7710_v43  ;;  %v2634_v2 = vpop.f32.mrb[171].mxu0  ;;  %v8250_v43 = vld [vmem:[#allocation48_spill] sm:$0xff] }
 0x4f3   : > { %v2736_v28 = vmul.f32 %v2634_v2, %v7712_v4  ;;  %3239 = vmatprep.mubr.bf16.mxu1 %v2776_v11  ;;  %3412 = vmatprep.mubr.bf16.mxu0 %v2776_v11  ;;  %v6347_v2 = vld [vmem:[%s6970_s12 + $0x8] sm:$0xff] }
 0x4f4   : > { %3240 = vmatmul.mubr.bf16.gmra.mrb[204].mxu1 %v2775_v61  ;;  %3413 = vmatmul.mubr.bf16.gmra.mrb[232].mxu0 %v2775_v61  ;;  %v8264_v61 = vld [vmem:[#allocation70_spill] sm:$0xff] }
 0x4f5   : > { %v2638_v33 = vpop.f32.mrb[172].mxu0 }
 0x4f6   : > { %v2737_v29 = vmul.f32 %v2638_v33, %v7718_v48  ;;  %v2640_v38 = vpop.f32.mrb[173].mxu0  ;;  %v8252_v48 = vld [vmem:[#allocation52_spill] sm:$0xff] }
 0x4f7   : > { %v2738_v52 = vmul.f32 %v2640_v38, %v7720_v31 }
 0x4f8   : > { %v2777_v54 = vpack.c.bf16 %v2737_v29, %v2735_v15 }
 0x4f9   : > { %v2778_v5 = vpack.c.bf16 %v2738_v52, %v2736_v28  ;;  %v2644_v39 = vpop.f32.mrb[174].mxu0 }
 0x4fa   : > { %v2739_v18 = vmul.f32 %v2644_v39, %v7722_v30  ;;  %v2646_v41 = vpop.f32.mrb[175].mxu0  ;;  %v8254_v30 = vld [vmem:[#allocation54_spill] sm:$0xff] }
 0x4fb   : > { %v2740_v7 = vmul.f32 %v2646_v41, %v8250_v43  ;;  %3249 = vmatprep.mubr.bf16.mxu1 %v2778_v5  ;;  %3420 = vmatprep.mubr.bf16.mxu0 %v2778_v5 }
 0x4fc   : > { %3250 = vmatmul.mubr.bf16.gmra.mrb[208].mxu1 %v2777_v54  ;;  %3421 = vmatmul.mubr.bf16.gmra.mrb[236].mxu0 %v2777_v54 }
 0x4fd   : > { %v2650_v4 = vpop.f32.mrb[176].mxu0 }
 0x4fe   : > { %v2741_v32 = vmul.f32 %v2650_v4, %v8251_v55  ;;  %v2652_v45 = vpop.f32.mrb[177].mxu0 }
 0x4ff   : > { %v2742_v26 = vmul.f32 %v2652_v45, %v8252_v48 }
 0x500   : > { %v2779_v56 = vpack.c.bf16 %v2741_v32, %v2739_v18 }
 0x501   : > { %v2780_v31 = vpack.c.bf16 %v2742_v26, %v2740_v7  ;;  %v2656_v8 = vpop.f32.mrb[178].mxu0 }
 0x502   : > { %v2743_v46 = vmul.f32 %v2656_v8, %v8253_v10  ;;  %v2658_v34 = vpop.f32.mrb[179].mxu0 }
 0x503   : > { %v2744_v27 = vmul.f32 %v2658_v34, %v8254_v30  ;;  %3259 = vmatprep.mubr.bf16.mxu1 %v2780_v31  ;;  %3428 = vmatprep.mubr.bf16.mxu0 %v2780_v31 }
 0x504   : > { %3260 = vmatmul.mubr.bf16.gmra.mrb[212].mxu1 %v2779_v56  ;;  %3429 = vmatmul.mubr.bf16.gmra.mrb[240].mxu0 %v2779_v56 }
 0x505   : > { %v2662_v13 = vpop.f32.mrb[180].mxu0 }
 0x506   : > { %v2745_v1 = vmul.f32 %v2662_v13, %v8255_v50  ;;  %v2664_v35 = vpop.f32.mrb[181].mxu0 }
 0x507   : > { %v2746_v14 = vmul.f32 %v2664_v35, %v8256_v19 }
 0x508   : > { %v2781_v51 = vpack.c.bf16 %v2745_v1, %v2743_v46 }
 0x509   : > { %v2782_v37 = vpack.c.bf16 %v2746_v14, %v2744_v27  ;;  %v2668_v40 = vpop.f32.mrb[182].mxu0 }
 0x50a   : > { %v2747_v23 = vmul.f32 %v2668_v40, %v8257_v53  ;;  %v2670_v42 = vpop.f32.mrb[183].mxu0 }
 0x50b   : > { %v2748_v58 = vmul.f32 %v2670_v42, %v8258_v17  ;;  %3269 = vmatprep.mubr.bf16.mxu1 %v2782_v37  ;;  %3436 = vmatprep.mubr.bf16.mxu0 %v2782_v37 }
 0x50c   : > { %3270 = vmatmul.mubr.bf16.gmra.mrb[216].mxu1 %v2781_v51  ;;  %3437 = vmatmul.mubr.bf16.gmra.mrb[244].mxu0 %v2781_v51 }
 0x50d   : > { %v2674_v20 = vpop.f32.mrb[184].mxu0 }
 0x50e   : > { %v2749_v3 = vmul.f32 %v2674_v20, %v8259_v44  ;;  %v2676_v47 = vpop.f32.mrb[185].mxu0 }
 0x50f   : > { %v2750_v9 = vmul.f32 %v2676_v47, %v8260_v49 }
 0x510   : > { %v2783_v60 = vpack.c.bf16 %v2749_v3, %v2747_v23 }
 0x511   : > { %v2784_v57 = vpack.c.bf16 %v2750_v9, %v2748_v58  ;;  %v2680_v22 = vpop.f32.mrb[186].mxu0 }
 0x512   : > { %v2751_v12 = vmul.f32 %v2680_v22, %v8261_v59  ;;  %v2682_v0 = vpop.f32.mrb[187].mxu0 }
 0x513   : > { %v2752_v62 = vmul.f32 %v2682_v0, %v8262_v25  ;;  %3279 = vmatprep.mubr.bf16.mxu1 %v2784_v57  ;;  %3444 = vmatprep.mubr.bf16.mxu0 %v2784_v57 }
 0x514   : > { %3280 = vmatmul.mubr.bf16.gmra.mrb[220].mxu1 %v2783_v60  ;;  %3445 = vmatmul.mubr.bf16.gmra.mrb[248].mxu0 %v2783_v60 }
 0x515   : > { %v2686_v16 = vpop.f32.mrb[188].mxu0 }
 0x516   : > { %v2753_v36 = vmul.f32 %v2686_v16, %v8263_v24  ;;  %v2688_v21 = vpop.f32.mrb[189].mxu0 }
 0x517   : > { %v2754_v11 = vmul.f32 %v2688_v21, %v8264_v61 }
 0x518   : > { %v2785_v63 = vpack.c.bf16 %v2753_v36, %v2751_v12 }
 0x519   : > { %v2786_v15 = vpack.c.bf16 %v2754_v11, %v2752_v62 }
 0x51b   : > { %3289 = vmatprep.mubr.bf16.mxu1 %v2786_v15  ;;  %3452 = vmatprep.mubr.bf16.mxu0 %v2786_v15 }
 0x51c   : > { %3290 = vmatmul.mubr.bf16.gmra.mrb[224].mxu1 %v2785_v63  ;;  %3453 = vmatmul.mubr.bf16.gmra.mrb[252].mxu0 %v2785_v63 }
 0x51d   : > { %3525 = vmatprep.mubr.f32.mxu1 %v6347_v2  ;;  %3782 = vmatprep.mubr.f32.mxu0 %v6347_v2 }
 0x577   : > { %v3141_v28 = vpop.f32.mrb[164].mxu1  ;;  %v5314_v33 = vpop.f32.mrb[192].mxu0 }
 0x578   : > { %v3143_v29 = vpop.f32.mrb[165].mxu1  ;;  %v5315_v38 = vpop.f32.mrb[193].mxu0 }
 0x579   : > { %v5316_v52 = vadd.f32 %v5315_v38, %v5314_v33  ;;  %v3145_v54 = vpop.f32.mrb[166].mxu1  ;;  %v5317_v5 = vpop.f32.mrb[194].mxu0 }
 0x57a   : > { %v5964_v39 = vpack.c.bf16 %v3145_v54, %v3141_v28  ;;  %v3147_v18 = vpop.f32.mrb[167].mxu1  ;;  %v5318_v41 = vpop.f32.mrb[195].mxu0 }
 0x57b   : > { %v5962_v43 = vpack.c.bf16 %v3147_v18, %v3143_v29  ;;  %v5319_v7 = vadd.f32 %v5318_v41, %v5317_v5 }
 0x57d   : > { %v6027_v4 = vpack.c.bf16 %v5319_v7, %v5316_v52  ;;  %5963 = vmatprep.subr.bf16.mxu1 %v5962_v43 }
 0x57e   : > { %5965 = vmatpush1.bf16.msra.mxu1 %v5964_v39 }
 0x57f   : > { %v3151_v55 = vpop.f32.mrb[168].mxu1  ;;  %v5320_v32 = vpop.f32.mrb[196].mxu0  ;;  %6028 = vmatpush1.bf16.msra.mxu0 %v6027_v4 }
 0x580   : > { %v3153_v45 = vpop.f32.mrb[169].mxu1  ;;  %v5321_v48 = vpop.f32.mrb[197].mxu0  ;;  %6029 = vmatprep.subr.bf16.mxu0 %v8249_v6 }
 0x581   : > { %v5322_v26 = vadd.f32 %v5321_v48, %v5320_v32  ;;  %v3155_v56 = vpop.f32.mrb[170].mxu1  ;;  %v5323_v31 = vpop.f32.mrb[198].mxu0 }
 0x582   : > { %v5968_v8 = vpack.c.bf16 %v3155_v56, %v3151_v55  ;;  %v3157_v10 = vpop.f32.mrb[171].mxu1  ;;  %v5324_v46 = vpop.f32.mrb[199].mxu0 }
 0x583   : > { %v5966_v34 = vpack.c.bf16 %v3157_v10, %v3153_v45  ;;  %v5325_v30 = vadd.f32 %v5324_v46, %v5323_v31 }
 0x585   : > { %v6030_v27 = vpack.c.bf16 %v5325_v30, %v5322_v26  ;;  %5967 = vmatprep.subr.bf16.mxu1 %v5966_v34 }
 0x586   : > { %5969 = vmatpush1.bf16.msra.mxu1 %v5968_v8 }
 0x587   : > { %v3161_v13 = vpop.f32.mrb[172].mxu1  ;;  %v5326_v50 = vpop.f32.mrb[200].mxu0  ;;  %6031 = vmatpush1.bf16.msra.mxu0 %v6030_v27 }
 0x588   : > { %v3163_v1 = vpop.f32.mrb[173].mxu1  ;;  %v5327_v35 = vpop.f32.mrb[201].mxu0  ;;  %6032 = vmatprep.subr.bf16.mxu0 %v8249_v6 }
 0x589   : > { %v5328_v19 = vadd.f32 %v5327_v35, %v5326_v50  ;;  %v3165_v14 = vpop.f32.mrb[174].mxu1  ;;  %v5329_v51 = vpop.f32.mrb[202].mxu0 }
 0x58a   : > { %v5972_v37 = vpack.c.bf16 %v3165_v14, %v3161_v13  ;;  %v3167_v40 = vpop.f32.mrb[175].mxu1  ;;  %v5330_v53 = vpop.f32.mrb[203].mxu0 }
 0x58b   : > { %v5970_v23 = vpack.c.bf16 %v3167_v40, %v3163_v1  ;;  %v5331_v42 = vadd.f32 %v5330_v53, %v5329_v51 }
 0x58d   : > { %v6033_v17 = vpack.c.bf16 %v5331_v42, %v5328_v19  ;;  %5971 = vmatprep.subr.bf16.mxu1 %v5970_v23 }
 0x58e   : > { %5973 = vmatpush1.bf16.msra.mxu1 %v5972_v37 }
 0x58f   : > { %v3171_v58 = vpop.f32.mrb[176].mxu1  ;;  %v5332_v20 = vpop.f32.mrb[204].mxu0  ;;  %6034 = vmatpush1.bf16.msra.mxu0 %v6033_v17 }
 0x590   : > { %v3173_v44 = vpop.f32.mrb[177].mxu1  ;;  %v5333_v3 = vpop.f32.mrb[205].mxu0  ;;  %6035 = vmatprep.subr.bf16.mxu0 %v8249_v6 }
 0x591   : > { %v5334_v47 = vadd.f32 %v5333_v3, %v5332_v20  ;;  %v3175_v49 = vpop.f32.mrb[178].mxu1  ;;  %v5335_v9 = vpop.f32.mrb[206].mxu0 }
 0x592   : > { %v5976_v60 = vpack.c.bf16 %v3175_v49, %v3171_v58  ;;  %v3177_v57 = vpop.f32.mrb[179].mxu1  ;;  %v5336_v22 = vpop.f32.mrb[207].mxu0 }
 0x593   : > { %v5974_v59 = vpack.c.bf16 %v3177_v57, %v3173_v44  ;;  %v5337_v12 = vadd.f32 %v5336_v22, %v5335_v9 }
 0x595   : > { %v6036_v0 = vpack.c.bf16 %v5337_v12, %v5334_v47  ;;  %5975 = vmatprep.subr.bf16.mxu1 %v5974_v59 }
 0x596   : > { %5977 = vmatpush1.bf16.msra.mxu1 %v5976_v60 }
 0x597   : > { %v3181_v25 = vpop.f32.mrb[180].mxu1  ;;  %v5338_v62 = vpop.f32.mrb[208].mxu0  ;;  %6037 = vmatpush1.bf16.msra.mxu0 %v6036_v0 }
 0x598   : > { %v3183_v16 = vpop.f32.mrb[181].mxu1  ;;  %v5339_v24 = vpop.f32.mrb[209].mxu0  ;;  %6038 = vmatprep.subr.bf16.mxu0 %v8249_v6 }
 0x599   : > { %v5340_v36 = vadd.f32 %v5339_v24, %v5338_v62  ;;  %v3185_v21 = vpop.f32.mrb[182].mxu1  ;;  %v5341_v61 = vpop.f32.mrb[210].mxu0 }
 0x59a   : > { %v5980_v11 = vpack.c.bf16 %v3185_v21, %v3181_v25  ;;  %v3187_v63 = vpop.f32.mrb[183].mxu1  ;;  %v5342_v15 = vpop.f32.mrb[211].mxu0 }
 0x59b   : > { %v5978_v2 = vpack.c.bf16 %v3187_v63, %v3183_v16  ;;  %v5343_v28 = vadd.f32 %v5342_v15, %v5341_v61 }
 0x59d   : > { %v6039_v33 = vpack.c.bf16 %v5343_v28, %v5340_v36  ;;  %5979 = vmatprep.subr.bf16.mxu1 %v5978_v2 }
 0x59e   : > { %5981 = vmatpush1.bf16.msra.mxu1 %v5980_v11 }
 0x59f   : > { %v3191_v29 = vpop.f32.mrb[184].mxu1  ;;  %v5344_v38 = vpop.f32.mrb[212].mxu0  ;;  %6040 = vmatpush1.bf16.msra.mxu0 %v6039_v33 }
 0x5a0   : > { %v3193_v52 = vpop.f32.mrb[185].mxu1  ;;  %v5345_v54 = vpop.f32.mrb[213].mxu0  ;;  %6041 = vmatprep.subr.bf16.mxu0 %v8249_v6 }
 0x5a1   : > { %v5346_v5 = vadd.f32 %v5345_v54, %v5344_v38  ;;  %v3195_v39 = vpop.f32.mrb[186].mxu1  ;;  %v5347_v18 = vpop.f32.mrb[214].mxu0 }
 0x5a2   : > { %v5984_v41 = vpack.c.bf16 %v3195_v39, %v3191_v29  ;;  %v3197_v43 = vpop.f32.mrb[187].mxu1  ;;  %v5348_v7 = vpop.f32.mrb[215].mxu0 }
 0x5a3   : > { %v5982_v4 = vpack.c.bf16 %v3197_v43, %v3193_v52  ;;  %v5349_v55 = vadd.f32 %v5348_v7, %v5347_v18 }
 0x5a5   : > { %v6042_v32 = vpack.c.bf16 %v5349_v55, %v5346_v5  ;;  %5983 = vmatprep.subr.bf16.mxu1 %v5982_v4 }
 0x5a6   : > { %5985 = vmatpush1.bf16.msra.mxu1 %v5984_v41 }
 0x5a7   : > { %v3201_v45 = vpop.f32.mrb[188].mxu1  ;;  %v5350_v48 = vpop.f32.mrb[216].mxu0  ;;  %6043 = vmatpush1.bf16.msra.mxu0 %v6042_v32 }
 0x5a8   : > { %v3203_v26 = vpop.f32.mrb[189].mxu1  ;;  %v5351_v56 = vpop.f32.mrb[217].mxu0  ;;  %6044 = vmatprep.subr.bf16.mxu0 %v8249_v6 }
 0x5a9   : > { %v5352_v31 = vadd.f32 %v5351_v56, %v5350_v48  ;;  %v3205_v8 = vpop.f32.mrb[190].mxu1  ;;  %v5353_v10 = vpop.f32.mrb[218].mxu0 }
 0x5aa   : > { %v5988_v46 = vpack.c.bf16 %v3205_v8, %v3201_v45  ;;  %v3207_v34 = vpop.f32.mrb[191].mxu1  ;;  %v5354_v30 = vpop.f32.mrb[219].mxu0 }
 0x5ab   : > { %v5986_v27 = vpack.c.bf16 %v3207_v34, %v3203_v26  ;;  %v5355_v13 = vadd.f32 %v5354_v30, %v5353_v10 }
 0x5ad   : > { %v6045_v50 = vpack.c.bf16 %v5355_v13, %v5352_v31  ;;  %5987 = vmatprep.subr.bf16.mxu1 %v5986_v27 }
 0x5ae   : > { %5989 = vmatpush1.bf16.msra.mxu1 %v5988_v46 }
 0x5af   : > { %v3211_v1 = vpop.f32.mrb[192].mxu1  ;;  %v5356_v35 = vpop.f32.mrb[220].mxu0  ;;  %6046 = vmatpush1.bf16.msra.mxu0 %v6045_v50 }
 0x5b0   : > { %v3213_v19 = vpop.f32.mrb[193].mxu1  ;;  %v5357_v14 = vpop.f32.mrb[221].mxu0  ;;  %6047 = vmatprep.subr.bf16.mxu0 %v8249_v6 }
 0x5b1   : > { %v5358_v51 = vadd.f32 %v5357_v14, %v5356_v35  ;;  %v3215_v37 = vpop.f32.mrb[194].mxu1  ;;  %v5359_v40 = vpop.f32.mrb[222].mxu0 }
 0x5b2   : > { %v5992_v53 = vpack.c.bf16 %v3215_v37, %v3211_v1  ;;  %v3217_v23 = vpop.f32.mrb[195].mxu1  ;;  %v5360_v42 = vpop.f32.mrb[223].mxu0 }
 0x5b3   : > { %v5990_v17 = vpack.c.bf16 %v3217_v23, %v3213_v19  ;;  %v5361_v58 = vadd.f32 %v5360_v42, %v5359_v40 }
 0x5b5   : > { %v6048_v20 = vpack.c.bf16 %v5361_v58, %v5358_v51  ;;  %5991 = vmatprep.subr.bf16.mxu1 %v5990_v17 }
 0x5b6   : > { %5993 = vmatpush1.bf16.msra.mxu1 %v5992_v53 }
 0x5b7   : > { %v3221_v44 = vpop.f32.mrb[196].mxu1  ;;  %v5362_v3 = vpop.f32.mrb[224].mxu0  ;;  %6049 = vmatpush1.bf16.msra.mxu0 %v6048_v20 }
 0x5b8   : > { %v3223_v47 = vpop.f32.mrb[197].mxu1  ;;  %v5363_v49 = vpop.f32.mrb[225].mxu0  ;;  %6050 = vmatprep.subr.bf16.mxu0 %v8249_v6 }
 0x5b9   : > { %v5364_v9 = vadd.f32 %v5363_v49, %v5362_v3  ;;  %v3225_v60 = vpop.f32.mrb[198].mxu1  ;;  %v5365_v57 = vpop.f32.mrb[226].mxu0 }
 0x5ba   : > { %v5996_v22 = vpack.c.bf16 %v3225_v60, %v3221_v44  ;;  %v3227_v59 = vpop.f32.mrb[199].mxu1  ;;  %v5366_v12 = vpop.f32.mrb[227].mxu0 }
 0x5bb   : > { %v5994_v0 = vpack.c.bf16 %v3227_v59, %v3223_v47  ;;  %v5367_v25 = vadd.f32 %v5366_v12, %v5365_v57 }
 0x5bd   : > { %v6051_v62 = vpack.c.bf16 %v5367_v25, %v5364_v9  ;;  %5995 = vmatprep.subr.bf16.mxu1 %v5994_v0 }
 0x5be   : > { %5997 = vmatpush1.bf16.msra.mxu1 %v5996_v22 }
 0x5bf   : > { %v3231_v16 = vpop.f32.mrb[200].mxu1  ;;  %v5368_v24 = vpop.f32.mrb[228].mxu0  ;;  %6052 = vmatpush1.bf16.msra.mxu0 %v6051_v62 }
 0x5c0   : > { %v3233_v36 = vpop.f32.mrb[201].mxu1  ;;  %v5369_v21 = vpop.f32.mrb[229].mxu0  ;;  %6053 = vmatprep.subr.bf16.mxu0 %v8249_v6 }
 0x5c1   : > { %v5370_v61 = vadd.f32 %v5369_v21, %v5368_v24  ;;  %v3235_v11 = vpop.f32.mrb[202].mxu1  ;;  %v5371_v63 = vpop.f32.mrb[230].mxu0 }
 0x5c2   : > { %v6000_v15 = vpack.c.bf16 %v3235_v11, %v3231_v16  ;;  %v3237_v2 = vpop.f32.mrb[203].mxu1  ;;  %v5372_v28 = vpop.f32.mrb[231].mxu0 }
 0x5c3   : > { %v5998_v33 = vpack.c.bf16 %v3237_v2, %v3233_v36  ;;  %v5373_v29 = vadd.f32 %v5372_v28, %v5371_v63 }
 0x5c5   : > { %v6054_v38 = vpack.c.bf16 %v5373_v29, %v5370_v61  ;;  %5999 = vmatprep.subr.bf16.mxu1 %v5998_v33 }
 0x5c6   : > { %6001 = vmatpush1.bf16.msra.mxu1 %v6000_v15 }
 0x5c7   : > { %v3241_v52 = vpop.f32.mrb[204].mxu1  ;;  %v5374_v54 = vpop.f32.mrb[232].mxu0  ;;  %6055 = vmatpush1.bf16.msra.mxu0 %v6054_v38 }
 0x5c8   : > { %v3243_v5 = vpop.f32.mrb[205].mxu1  ;;  %v5375_v39 = vpop.f32.mrb[233].mxu0  ;;  %6056 = vmatprep.subr.bf16.mxu0 %v8249_v6 }
 0x5c9   : > { %v5376_v18 = vadd.f32 %v5375_v39, %v5374_v54  ;;  %v3245_v41 = vpop.f32.mrb[206].mxu1  ;;  %v5377_v43 = vpop.f32.mrb[234].mxu0 }
 0x5ca   : > { %v6004_v7 = vpack.c.bf16 %v3245_v41, %v3241_v52  ;;  %v3247_v4 = vpop.f32.mrb[207].mxu1  ;;  %v5378_v55 = vpop.f32.mrb[235].mxu0 }
 0x5cb   : > { %v6002_v32 = vpack.c.bf16 %v3247_v4, %v3243_v5  ;;  %v5379_v45 = vadd.f32 %v5378_v55, %v5377_v43 }
 0x5cd   : > { %v6057_v48 = vpack.c.bf16 %v5379_v45, %v5376_v18  ;;  %6003 = vmatprep.subr.bf16.mxu1 %v6002_v32 }
 0x5ce   : > { %6005 = vmatpush1.bf16.msra.mxu1 %v6004_v7 }
 0x5cf   : > { %v3251_v26 = vpop.f32.mrb[208].mxu1  ;;  %v5380_v56 = vpop.f32.mrb[236].mxu0  ;;  %6058 = vmatpush1.bf16.msra.mxu0 %v6057_v48 }
 0x5d0   : > { %v3253_v31 = vpop.f32.mrb[209].mxu1  ;;  %v5381_v8 = vpop.f32.mrb[237].mxu0  ;;  %6059 = vmatprep.subr.bf16.mxu0 %v8249_v6 }
 0x5d1   : > { %v5382_v10 = vadd.f32 %v5381_v8, %v5380_v56  ;;  %v3255_v46 = vpop.f32.mrb[210].mxu1  ;;  %v5383_v34 = vpop.f32.mrb[238].mxu0  ;;  %v6323_v56 = vld [vmem:[#allocation10 + $0x40] sm:$0xff]  }
 0x5d2   : > { %v6008_v30 = vpack.c.bf16 %v3255_v46, %v3251_v26  ;;  %v3257_v27 = vpop.f32.mrb[211].mxu1  ;;  %v5384_v13 = vpop.f32.mrb[239].mxu0  ;;  %v6324_v8 = vld [vmem:[#allocation10] sm:$0xff]  }
 0x5d3   : > { %v6006_v50 = vpack.c.bf16 %v3257_v27, %v3253_v31  ;;  %v5385_v1 = vadd.f32 %v5384_v13, %v5383_v34  ;;  %v6348_v46 = vld [vmem:[%s6970_s12] sm:$0xff]  ;;  %v6334_v34 = vld [vmem:[#allocation10 + $0x88] sm:$0xff]   ;;  %v6327_v13 = vld [vmem:[#allocation10 + $0x50] sm:$0xff]  }
 0x5d4   : > { %v6326_v27 = vld [vmem:[#allocation10 + $0x8] sm:$0xff]  }
 0x5d5   : > { %v6060_v35 = vpack.c.bf16 %v5385_v1, %v5382_v10  ;;  %6007 = vmatprep.subr.bf16.mxu1 %v6006_v50  ;;  %v6331_v10 = vld [vmem:[#allocation10 + $0x80] sm:$0xff]   ;;  %v6350_v50 = vld [vmem:[%s6970_s12 + $0x10] sm:$0xff] }
 0x5d6   : > { %6009 = vmatpush1.bf16.msra.mxu1 %v6008_v30  ;;  %v6349_v30 = vld [vmem:[%s6970_s12 + $0x18] sm:$0xff]  ;;  %v6337_v1 = vld [vmem:[#allocation10 + $0x90] sm:$0xff]  }
 0x5d7   : > { %v3261_v19 = vpop.f32.mrb[212].mxu1  ;;  %v5386_v14 = vpop.f32.mrb[240].mxu0  ;;  %6061 = vmatpush1.bf16.msra.mxu0 %v6060_v35  ;;  %v6351_v35 = vld [vmem:[%s6970_s12 + $0x28] sm:$0xff] }
 0x5d8   : > { %v3263_v51 = vpop.f32.mrb[213].mxu1  ;;  %v5387_v37 = vpop.f32.mrb[241].mxu0  ;;  %6062 = vmatprep.subr.bf16.mxu0 %v8249_v6 }
 0x5d9   : > { %v5388_v40 = vadd.f32 %v5387_v37, %v5386_v14  ;;  %v3265_v53 = vpop.f32.mrb[214].mxu1  ;;  %v5389_v23 = vpop.f32.mrb[242].mxu0  ;;  %v6329_v14 = vld [vmem:[#allocation10 + $0x58] sm:$0xff]  }
 0x5da   : > { %v6012_v42 = vpack.c.bf16 %v3265_v53, %v3261_v19  ;;  %v3267_v17 = vpop.f32.mrb[215].mxu1  ;;  %v5390_v58 = vpop.f32.mrb[243].mxu0  ;;  %v6328_v19 = vld [vmem:[#allocation10 + $0x10] sm:$0xff]   ;;  %v6340_v37 = vld [vmem:[#allocation10 + $0x98] sm:$0xff]  }
 0x5db   : > { %v6010_v20 = vpack.c.bf16 %v3267_v17, %v3263_v51  ;;  %v5391_v44 = vadd.f32 %v5390_v58, %v5389_v23  ;;  %v6352_v51 = vld [vmem:[%s6970_s12 + $0x20] sm:$0xff]  ;;  %v6330_v53 = vld [vmem:[#allocation10 + $0x18] sm:$0xff]   ;;  %v6355_v58 = vld [vmem:[%s6970_s12 + $0x48] sm:$0xff] }
 0x5dc   : > { %v6332_v23 = vld [vmem:[#allocation10 + $0x60] sm:$0xff]  }
 0x5dd   : > { %v6063_v3 = vpack.c.bf16 %v5391_v44, %v5388_v40  ;;  %6011 = vmatprep.subr.bf16.mxu1 %v6010_v20  ;;  %v6353_v40 = vld [vmem:[%s6970_s12 + $0x38] sm:$0xff]  ;;  %v6341_v17 = vld [vmem:[#allocation10 + $0xa0] sm:$0xff]   ;;  %v6335_v44 = vld [vmem:[#allocation10 + $0x68] sm:$0xff]  }
 0x5de   : > { %6013 = vmatpush1.bf16.msra.mxu1 %v6012_v42  ;;  %v6354_v42 = vld [vmem:[%s6970_s12 + $0x30] sm:$0xff]  ;;  %v6333_v20 = vld [vmem:[#allocation10 + $0x20] sm:$0xff]  }
 0x5df   : > { %v3271_v47 = vpop.f32.mrb[216].mxu1  ;;  %v5392_v49 = vpop.f32.mrb[244].mxu0  ;;  %6064 = vmatpush1.bf16.msra.mxu0 %v6063_v3  ;;  %v6356_v3 = vld [vmem:[%s6970_s12 + $0x40] sm:$0xff] }
 0x5e0   : > { %v3273_v9 = vpop.f32.mrb[217].mxu1  ;;  %v5393_v60 = vpop.f32.mrb[245].mxu0  ;;  %6065 = vmatprep.subr.bf16.mxu0 %v8249_v6 }
 0x5e1   : > { %v5394_v57 = vadd.f32 %v5393_v60, %v5392_v49  ;;  %v3275_v22 = vpop.f32.mrb[218].mxu1  ;;  %v5395_v59 = vpop.f32.mrb[246].mxu0  ;;  %v6336_v49 = vld [vmem:[#allocation10 + $0x28] sm:$0xff]   ;;  %v6358_v60 = vld [vmem:[%s6970_s12 + $0x50] sm:$0xff] }
 0x5e2   : > { %v6016_v12 = vpack.c.bf16 %v3275_v22, %v3271_v47  ;;  %v3277_v0 = vpop.f32.mrb[219].mxu1  ;;  %v5396_v25 = vpop.f32.mrb[247].mxu0  ;;  %v6357_v47 = vld [vmem:[%s6970_s12 + $0x58] sm:$0xff]  ;;  %v6339_v22 = vld [vmem:[#allocation10 + $0x30] sm:$0xff]  }
 0x5e3   : > { %v6014_v62 = vpack.c.bf16 %v3277_v0, %v3273_v9  ;;  %v5397_v16 = vadd.f32 %v5396_v25, %v5395_v59  ;;  %v6338_v9 = vld [vmem:[#allocation10 + $0x70] sm:$0xff]   ;;  %v6360_v59 = vld [vmem:[%s6970_s12 + $0x60] sm:$0xff]  ;;  %v6363_v25 = vld [vmem:[%s6970_s12 + $0x88] sm:$0xff] }
 0x5e4   : > { %v6362_v0 = vld [vmem:[%s6970_s12 + $0x70] sm:$0xff] }
 0x5e5   : > { %v6066_v24 = vpack.c.bf16 %v5397_v16, %v5394_v57  ;;  %6015 = vmatprep.subr.bf16.mxu1 %v6014_v62  ;;  %v6359_v57 = vld [vmem:[%s6970_s12 + $0x68] sm:$0xff]  ;;  %v6364_v62 = vld [vmem:[%s6970_s12 + $0x80] sm:$0xff]  ;;  %v6365_v16 = vld [vmem:[%s6970_s12 + $0x98] sm:$0xff] }
 0x5e6   : > { %6017 = vmatpush1.bf16.msra.mxu1 %v6016_v12  ;;  %v6361_v12 = vld [vmem:[%s6970_s12 + $0x78] sm:$0xff] }
 0x5e7   : > { %v3281_v36 = vpop.f32.mrb[220].mxu1  ;;  %v5398_v21 = vpop.f32.mrb[248].mxu0  ;;  %6067 = vmatpush1.bf16.msra.mxu0 %v6066_v24  ;;  %v6366_v24 = vld [vmem:[%s6970_s12 + $0x90] sm:$0xff] }
 0x5e8   : > { %v3283_v61 = vpop.f32.mrb[221].mxu1  ;;  %v5399_v11 = vpop.f32.mrb[249].mxu0  ;;  %6068 = vmatprep.subr.bf16.mxu0 %v8249_v6 }
 0x5e9   : > { %v5400_v63 = vadd.f32 %v5399_v11, %v5398_v21  ;;  %v3285_v15 = vpop.f32.mrb[222].mxu1  ;;  %v5401_v2 = vpop.f32.mrb[250].mxu0  ;;  %v6368_v21 = vld [vmem:[%s6970_s12 + $0xa0] sm:$0xff]  ;;  %v6370_v11 = vld [vmem:[%s6970_s12 + $0xb0] sm:$0xff] }
 0x5ea   : > { %v6020_v28 = vpack.c.bf16 %v3285_v15, %v3281_v36  ;;  %v3287_v33 = vpop.f32.mrb[223].mxu1  ;;  %v5402_v29 = vpop.f32.mrb[251].mxu0  ;;  %v6367_v36 = vld [vmem:[%s6970_s12 + $0xa8] sm:$0xff]  ;;  %v6372_v15 = vld [vmem:[%s6970_s12 + $0xc0] sm:$0xff] }
 0x5eb   : > { %v6018_v38 = vpack.c.bf16 %v3287_v33, %v3283_v61  ;;  %v5403_v52 = vadd.f32 %v5402_v29, %v5401_v2  ;;  %v6369_v61 = vld [vmem:[%s6970_s12 + $0xb8] sm:$0xff]  ;;  %v6375_v33 = vld [vmem:[%s6970_s12 + $0xe8] sm:$0xff]  ;;  %v6376_v29 = vld [vmem:[%s6970_s12 + $0xe0] sm:$0xff] }
 0x5ec   : > { %v6373_v2 = vld [vmem:[%s6970_s12 + $0xd8] sm:$0xff] }
 0x5ed   : > { %v6069_v54 = vpack.c.bf16 %v5403_v52, %v5400_v63  ;;  %6019 = vmatprep.subr.bf16.mxu1 %v6018_v38  ;;  %v6371_v63 = vld [vmem:[%s6970_s12 + $0xc8] sm:$0xff]  ;;  %v6377_v38 = vld [vmem:[%s6970_s12 + $0xf8] sm:$0xff]  ;;  %v6378_v52 = vld [vmem:[%s6970_s12 + $0xf0] sm:$0xff] }
 0x5ee   : > { %6021 = vmatpush1.bf16.msra.mxu1 %v6020_v28  ;;  %v6374_v28 = vld [vmem:[%s6970_s12 + $0xd0] sm:$0xff] }
 0x5ef   : > { %v3291_v5 = vpop.f32.mrb[224].mxu1  ;;  %v5404_v39 = vpop.f32.mrb[252].mxu0  ;;  %6070 = vmatpush1.bf16.msra.mxu0 %v6069_v54  ;;  %v6379_v54 = vld [vmem:[%s6970_s12 + $0x108] sm:$0xff] }
 0x5f0   : > { %v3293_v18 = vpop.f32.mrb[225].mxu1  ;;  %v5405_v41 = vpop.f32.mrb[253].mxu0  ;;  %6071 = vmatprep.subr.bf16.mxu0 %v8249_v6  ;;  %v6325_v6 = vld [vmem:[#allocation10 + $0x48] sm:$0xff]  }
 0x5f1   : > { %v5406_v43 = vadd.f32 %v5405_v41, %v5404_v39  ;;  %v3295_v7 = vpop.f32.mrb[226].mxu1  ;;  %v5407_v4 = vpop.f32.mrb[254].mxu0  ;;  %v6381_v39 = vld [vmem:[%s6970_s12 + $0x118] sm:$0xff]  ;;  %v6383_v41 = vld [vmem:[%s6970_s12 + $0x128] sm:$0xff] }
 0x5f2   : > { %v6024_v55 = vpack.c.bf16 %v3295_v7, %v3291_v5  ;;  %v3297_v32 = vpop.f32.mrb[227].mxu1  ;;  %v5408_v45 = vpop.f32.mrb[255].mxu0  ;;  %v6380_v5 = vld [vmem:[%s6970_s12 + $0x100] sm:$0xff]  ;;  %v6385_v7 = vld [vmem:[%s6970_s12 + $0x138] sm:$0xff] }
 0x5f3   : > { %v6022_v48 = vpack.c.bf16 %v3297_v32, %v3293_v18  ;;  %v5409_v26 = vadd.f32 %v5408_v45, %v5407_v4  ;;  %v6382_v18 = vld [vmem:[%s6970_s12 + $0x110] sm:$0xff]  ;;  %v6388_v32 = vld [vmem:[%s6970_s12 + $0x140] sm:$0xff]  ;;  %v6389_v45 = vld [vmem:[%s6970_s12 + $0x158] sm:$0xff] }
 0x5f4   : > { %v6386_v4 = vld [vmem:[%s6970_s12 + $0x130] sm:$0xff] }
 0x5f5   : > { %v6072_v31 = vpack.c.bf16 %v5409_v26, %v5406_v43  ;;  %6023 = vmatprep.subr.bf16.mxu1 %v6022_v48  ;;  %v6384_v43 = vld [vmem:[%s6970_s12 + $0x120] sm:$0xff]  ;;  %v6390_v48 = vld [vmem:[%s6970_s12 + $0x150] sm:$0xff]  ;;  %v6391_v26 = vld [vmem:[%s6970_s12 + $0x168] sm:$0xff] }
 0x5f6   : > { %6025 = vmatpush1.bf16.msra.mxu1 %v6024_v55  ;;  %v6387_v55 = vld [vmem:[%s6970_s12 + $0x148] sm:$0xff] }
 0x5f7   : > { %6073 = vmatpush1.bf16.msra.mxu0 %v6072_v31  ;;  %5410 = vmatprep.subr.bf16.mxu1 %v6323_v56  ;;  %v6342_v56 = vld [vmem:[#allocation10 + $0x78] sm:$0xff]   ;;  %v6344_v31 = vld [vmem:[#allocation10 + $0xa8] sm:$0xff]  }
 0x5f8   : > { %5776 = vmatprep.subr.bf16.mxu0 %v6331_v10 }
 0x5f9   : > { %3526 = vmatmul.mubr.f32.vlgmr.msra.gmra.mrb[162].mxu1 %v6348_v46 }
 0x5fa   : > { %3783 = vmatmul.mubr.f32.vlgmr.msra.gmra.mrb[190].mxu0 %v6348_v46  ;;  %3531 = vmatprep.mubr.f32.mxu1 %v6349_v30  ;;  %v6345_v46 = vld [vmem:[#allocation10 + $0xb0] sm:$0xff]  }
 0x5fb   : > { %3787 = vmatprep.mubr.f32.mxu0 %v6349_v30  ;;  %5411 = vmatpush3.bf16.msra.mxu1 %v6324_v8  ;;  %v6343_v8 = vld [vmem:[#allocation10 + $0x38] sm:$0xff]   ;;  %v6395_v30 = vld [vmem:[%s6970_s12 + $0x188] sm:$0xff] }
 0x5fc   : > { %5412 = vmatprep.subr.bf16.mxu1 %v6325_v6  ;;  %5777 = vmatpush3.bf16.msra.mxu0 %v6331_v10  ;;  %v6392_v10 = vld [vmem:[%s6970_s12 + $0x160] sm:$0xff]  ;;  %v6393_v6 = vld [vmem:[%s6970_s12 + $0x178] sm:$0xff] }
 0x5fd   : > { %3532 = vmatmul.mubr.f32.gmra.mrb[228].mxu1 %v6350_v50  ;;  %5778 = vmatprep.subr.bf16.mxu0 %v6334_v34 }
 0x5fe   : > { %3788 = vmatmul.mubr.f32.gmra.mrb[0].mxu0 %v6350_v50  ;;  %3537 = vmatprep.mubr.f32.mxu1 %v6351_v35  ;;  %v6397_v50 = vld [vmem:[%s6970_s12 + $0x198] sm:$0xff] }
 0x5ff   : > { %3792 = vmatprep.mubr.f32.mxu0 %v6351_v35  ;;  %5413 = vmatpush3.bf16.msra.mxu1 %v6326_v27  ;;  %v6346_v27 = vld [vmem:[#allocation10 + $0xb8] sm:$0xff]   ;;  %v6399_v35 = vld [vmem:[%s6970_s12 + $0x1a8] sm:$0xff] }
 0x600   : > { %5414 = vmatprep.subr.bf16.mxu1 %v6327_v13  ;;  %5779 = vmatpush3.bf16.msra.mxu0 %v6334_v34  ;;  %v6394_v34 = vld [vmem:[%s6970_s12 + $0x170] sm:$0xff]  ;;  %v6396_v13 = vld [vmem:[%s6970_s12 + $0x180] sm:$0xff] }
 0x601   : > { %3538 = vmatmul.mubr.f32.gmra.mrb[230].mxu1 %v6352_v51  ;;  %5780 = vmatprep.subr.bf16.mxu0 %v6337_v1 }
 0x602   : > { %3793 = vmatmul.mubr.f32.gmra.mrb[2].mxu0 %v6352_v51  ;;  %3543 = vmatprep.mubr.f32.mxu1 %v6353_v40  ;;  %v6402_v51 = vld [vmem:[%s6970_s12 + $0x1b0] sm:$0xff] }
 0x603   : > { %3797 = vmatprep.mubr.f32.mxu0 %v6353_v40  ;;  %5415 = vmatpush3.bf16.msra.mxu1 %v6328_v19  ;;  %v6400_v19 = vld [vmem:[%s6970_s12 + $0x1a0] sm:$0xff] }
 0x604   : > { %5416 = vmatprep.subr.bf16.mxu1 %v6329_v14  ;;  %5781 = vmatpush3.bf16.msra.mxu0 %v6337_v1  ;;  %v6398_v1 = vld [vmem:[%s6970_s12 + $0x190] sm:$0xff]  ;;  %v6401_v14 = vld [vmem:[%s6970_s12 + $0x1b8] sm:$0xff]  ;;  %v6404_v40 = vld [vmem:[%s6970_s12 + $0x1c0] sm:$0xff] }
 0x605   : > { %3544 = vmatmul.mubr.f32.gmra.mrb[232].mxu1 %v6354_v42  ;;  %5782 = vmatprep.subr.bf16.mxu0 %v6340_v37 }
 0x606   : > { %3798 = vmatmul.mubr.f32.gmra.mrb[4].mxu0 %v6354_v42  ;;  %3549 = vmatprep.mubr.f32.mxu1 %v6355_v58  ;;  %v6407_v42 = vld [vmem:[%s6970_s12 + $0x1e8] sm:$0xff] }
 0x607   : > { %3802 = vmatprep.mubr.f32.mxu0 %v6355_v58  ;;  %5417 = vmatpush3.bf16.msra.mxu1 %v6330_v53  ;;  %v6405_v53 = vld [vmem:[%s6970_s12 + $0x1d8] sm:$0xff] }
 0x608   : > { %5418 = vmatprep.subr.bf16.mxu1 %v6332_v23  ;;  %5783 = vmatpush3.bf16.msra.mxu0 %v6340_v37  ;;  %v6403_v37 = vld [vmem:[%s6970_s12 + $0x1c8] sm:$0xff]  ;;  %v6406_v23 = vld [vmem:[%s6970_s12 + $0x1d0] sm:$0xff]  ;;  %v6409_v58 = vld [vmem:[%s6970_s12 + $0x1f8] sm:$0xff] }
 0x609   : > { %3550 = vmatmul.mubr.f32.gmra.mrb[234].mxu1 %v6356_v3  ;;  %5784 = vmatprep.subr.bf16.mxu0 %v6341_v17 }
 0x60a   : > { %3803 = vmatmul.mubr.f32.gmra.mrb[6].mxu0 %v6356_v3  ;;  %3555 = vmatprep.mubr.f32.mxu1 %v6357_v47 }
 0x60b   : > { %3807 = vmatprep.mubr.f32.mxu0 %v6357_v47  ;;  %5419 = vmatpush3.bf16.msra.mxu1 %v6333_v20  ;;  %v6410_v20 = vld [vmem:[%s6970_s12 + $0x1f0] sm:$0xff] }
 0x60c   : > { %5420 = vmatprep.subr.bf16.mxu1 %v6335_v44  ;;  %5785 = vmatpush3.bf16.msra.mxu0 %v6341_v17  ;;  %v6408_v17 = vld [vmem:[%s6970_s12 + $0x1e0] sm:$0xff]  ;;  %s403_s12 = sand.u32 1, %s6637_s25  }
 0x60d   : > { %3556 = vmatmul.mubr.f32.gmra.mrb[236].mxu1 %v6358_v60  ;;  %5786 = vmatprep.subr.bf16.mxu0 %v6344_v31  ;;  %s8098_s15 = scalar_lea.sflag [#allocation4], %s403_s12 }
 0x60e   : > { %3808 = vmatmul.mubr.f32.gmra.mrb[8].mxu0 %v6358_v60  ;;  %3561 = vmatprep.mubr.f32.mxu1 %v6359_v57 }
 0x60f   : > { %3812 = vmatprep.mubr.f32.mxu0 %v6359_v57  ;;  %5421 = vmatpush3.bf16.msra.mxu1 %v6336_v49 }
 0x610   : > { %5422 = vmatprep.subr.bf16.mxu1 %v6338_v9  ;;  %5787 = vmatpush3.bf16.msra.mxu0 %v6344_v31 }
 0x611   : > { %3562 = vmatmul.mubr.f32.gmra.mrb[238].mxu1 %v6360_v59  ;;  %5788 = vmatprep.subr.bf16.mxu0 %v6345_v46 }
 0x612   : > { %3813 = vmatmul.mubr.f32.gmra.mrb[10].mxu0 %v6360_v59  ;;  %3567 = vmatprep.mubr.f32.mxu1 %v6361_v12 }
 0x613   : > { %3817 = vmatprep.mubr.f32.mxu0 %v6361_v12  ;;  %5423 = vmatpush3.bf16.msra.mxu1 %v6339_v22 }
 0x614   : > { %5424 = vmatprep.subr.bf16.mxu1 %v6342_v56  ;;  %5789 = vmatpush3.bf16.msra.mxu0 %v6345_v46 }
 0x615   : > { %3568 = vmatmul.mubr.f32.gmra.mrb[240].mxu1 %v6362_v0  ;;  %5790 = vmatprep.subr.bf16.mxu0 %v6346_v27 }
 0x616   : > { %3818 = vmatmul.mubr.f32.gmra.mrb[12].mxu0 %v6362_v0  ;;  %3573 = vmatprep.mubr.f32.mxu1 %v6363_v25 }
 0x617   : > { %3822 = vmatprep.mubr.f32.mxu0 %v6363_v25  ;;  %5425 = vmatpush3.bf16.msra.mxu1 %v6343_v8 }
 0x618   : > { %5791 = vmatpush3.bf16.msra.mxu0 %v6346_v27 }
 0x619   : > { %3574 = vmatmul.mubr.f32.gmra.mrb[242].mxu1 %v6364_v62 }
 0x61a   : > { %3823 = vmatmul.mubr.f32.gmra.mrb[14].mxu0 %v6364_v62  ;;  %3579 = vmatprep.mubr.f32.mxu1 %v6365_v16 }
 0x61b   : > { %3827 = vmatprep.mubr.f32.mxu0 %v6365_v16 }
 0x61d   : > { %3580 = vmatmul.mubr.f32.gmra.mrb[244].mxu1 %v6366_v24 }
 0x61e   : > { %3828 = vmatmul.mubr.f32.gmra.mrb[16].mxu0 %v6366_v24  ;;  %3585 = vmatprep.mubr.f32.mxu1 %v6367_v36 }
 0x61f   : > { %3832 = vmatprep.mubr.f32.mxu0 %v6367_v36 }
 0x621   : > { %3586 = vmatmul.mubr.f32.gmra.mrb[246].mxu1 %v6368_v21 }
 0x622   : > { %3833 = vmatmul.mubr.f32.gmra.mrb[18].mxu0 %v6368_v21  ;;  %3591 = vmatprep.mubr.f32.mxu1 %v6369_v61 }
 0x623   : > { %3837 = vmatprep.mubr.f32.mxu0 %v6369_v61 }
 0x625   : > { %3592 = vmatmul.mubr.f32.gmra.mrb[248].mxu1 %v6370_v11 }
 0x626   : > { %3838 = vmatmul.mubr.f32.gmra.mrb[20].mxu0 %v6370_v11  ;;  %3597 = vmatprep.mubr.f32.mxu1 %v6371_v63 }
 0x627   : > { %3842 = vmatprep.mubr.f32.mxu0 %v6371_v63 }
 0x629   : > { %3598 = vmatmul.mubr.f32.gmra.mrb[250].mxu1 %v6372_v15 }
 0x62a   : > { %3843 = vmatmul.mubr.f32.gmra.mrb[22].mxu0 %v6372_v15  ;;  %3603 = vmatprep.mubr.f32.mxu1 %v6373_v2 }
 0x62b   : > { %3847 = vmatprep.mubr.f32.mxu0 %v6373_v2 }
 0x62d   : > { %3604 = vmatmul.mubr.f32.gmra.mrb[252].mxu1 %v6374_v28 }
 0x62e   : > { %3848 = vmatmul.mubr.f32.gmra.mrb[24].mxu0 %v6374_v28  ;;  %3609 = vmatprep.mubr.f32.mxu1 %v6375_v33 }
 0x62f   : > { %3852 = vmatprep.mubr.f32.mxu0 %v6375_v33 }
 0x631   : > { %3610 = vmatmul.mubr.f32.gmra.mrb[254].mxu1 %v6376_v29 }
 0x632   : > { %3853 = vmatmul.mubr.f32.gmra.mrb[26].mxu0 %v6376_v29  ;;  %3615 = vmatprep.mubr.f32.mxu1 %v6377_v38 }
 0x633   : > { %3857 = vmatprep.mubr.f32.mxu0 %v6377_v38 }
 0x635   : > { %3616 = vmatmul.mubr.f32.gmra.mrb[0].mxu1 %v6378_v52 }
 0x636   : > { %3858 = vmatmul.mubr.f32.gmra.mrb[28].mxu0 %v6378_v52  ;;  %3621 = vmatprep.mubr.f32.mxu1 %v6379_v54 }
 0x637   : > { %3862 = vmatprep.mubr.f32.mxu0 %v6379_v54 }
 0x639   : > { %3622 = vmatmul.mubr.f32.gmra.mrb[2].mxu1 %v6380_v5 }
 0x63a   : > { %3863 = vmatmul.mubr.f32.gmra.mrb[30].mxu0 %v6380_v5  ;;  %3627 = vmatprep.mubr.f32.mxu1 %v6381_v39 }
 0x63b   : > { %3867 = vmatprep.mubr.f32.mxu0 %v6381_v39 }
 0x63d   : > { %3628 = vmatmul.mubr.f32.gmra.mrb[4].mxu1 %v6382_v18 }
 0x63e   : > { %3868 = vmatmul.mubr.f32.gmra.mrb[32].mxu0 %v6382_v18  ;;  %3633 = vmatprep.mubr.f32.mxu1 %v6383_v41 }
 0x63f   : > { %3872 = vmatprep.mubr.f32.mxu0 %v6383_v41 }
 0x641   : > { %3634 = vmatmul.mubr.f32.gmra.mrb[6].mxu1 %v6384_v43 }
 0x642   : > { %3873 = vmatmul.mubr.f32.gmra.mrb[34].mxu0 %v6384_v43  ;;  %3639 = vmatprep.mubr.f32.mxu1 %v6385_v7 }
 0x643   : > { %3877 = vmatprep.mubr.f32.mxu0 %v6385_v7 }
 0x645   : > { %3640 = vmatmul.mubr.f32.gmra.mrb[8].mxu1 %v6386_v4 }
 0x646   : > { %3878 = vmatmul.mubr.f32.gmra.mrb[36].mxu0 %v6386_v4  ;;  %3645 = vmatprep.mubr.f32.mxu1 %v6387_v55 }
 0x647   : > { %3882 = vmatprep.mubr.f32.mxu0 %v6387_v55 }
 0x649   : > { %3646 = vmatmul.mubr.f32.gmra.mrb[10].mxu1 %v6388_v32 }
 0x64a   : > { %3883 = vmatmul.mubr.f32.gmra.mrb[38].mxu0 %v6388_v32  ;;  %3651 = vmatprep.mubr.f32.mxu1 %v6389_v45 }
 0x64b   : > { %3887 = vmatprep.mubr.f32.mxu0 %v6389_v45 }
 0x64d   : > { %3652 = vmatmul.mubr.f32.gmra.mrb[12].mxu1 %v6390_v48 }
 0x64e   : > { %3888 = vmatmul.mubr.f32.gmra.mrb[40].mxu0 %v6390_v48  ;;  %3657 = vmatprep.mubr.f32.mxu1 %v6391_v26 }
 0x64f   : > { %3892 = vmatprep.mubr.f32.mxu0 %v6391_v26 }
 0x651   : > { %3658 = vmatmul.mubr.f32.gmra.mrb[14].mxu1 %v6392_v10 }
 0x652   : > { %3893 = vmatmul.mubr.f32.gmra.mrb[42].mxu0 %v6392_v10  ;;  %3663 = vmatprep.mubr.f32.mxu1 %v6393_v6 }
 0x653   : > { %3897 = vmatprep.mubr.f32.mxu0 %v6393_v6 }
 0x655   : > { %3664 = vmatmul.mubr.f32.gmra.mrb[16].mxu1 %v6394_v34 }
 0x656   : > { %3898 = vmatmul.mubr.f32.gmra.mrb[44].mxu0 %v6394_v34  ;;  %3669 = vmatprep.mubr.f32.mxu1 %v6395_v30 }
 0x657   : > { %3902 = vmatprep.mubr.f32.mxu0 %v6395_v30 }
 0x659   : > { %3670 = vmatmul.mubr.f32.gmra.mrb[18].mxu1 %v6396_v13 }
 0x65a   : > { %3903 = vmatmul.mubr.f32.gmra.mrb[46].mxu0 %v6396_v13  ;;  %3675 = vmatprep.mubr.f32.mxu1 %v6397_v50 }
 0x65b   : > { %3907 = vmatprep.mubr.f32.mxu0 %v6397_v50 }
 0x65d   : > { %3676 = vmatmul.mubr.f32.gmra.mrb[20].mxu1 %v6398_v1 }
 0x65e   : > { %3908 = vmatmul.mubr.f32.gmra.mrb[48].mxu0 %v6398_v1  ;;  %3681 = vmatprep.mubr.f32.mxu1 %v6399_v35 }
 0x65f   : > { %3912 = vmatprep.mubr.f32.mxu0 %v6399_v35 }
 0x661   : > { %3682 = vmatmul.mubr.f32.gmra.mrb[22].mxu1 %v6400_v19 }
 0x662   : > { %3913 = vmatmul.mubr.f32.gmra.mrb[50].mxu0 %v6400_v19  ;;  %3687 = vmatprep.mubr.f32.mxu1 %v6401_v14 }
 0x663   : > { %3917 = vmatprep.mubr.f32.mxu0 %v6401_v14 }
 0x665   : > { %3688 = vmatmul.mubr.f32.gmra.mrb[24].mxu1 %v6402_v51 }
 0x666   : > { %3918 = vmatmul.mubr.f32.gmra.mrb[52].mxu0 %v6402_v51  ;;  %3693 = vmatprep.mubr.f32.mxu1 %v6403_v37 }
 0x667   : > { %3922 = vmatprep.mubr.f32.mxu0 %v6403_v37 }
 0x669   : > { %3694 = vmatmul.mubr.f32.gmra.mrb[26].mxu1 %v6404_v40 }
 0x66a   : > { %3923 = vmatmul.mubr.f32.gmra.mrb[54].mxu0 %v6404_v40  ;;  %3699 = vmatprep.mubr.f32.mxu1 %v6405_v53 }
 0x66b   : > { %3927 = vmatprep.mubr.f32.mxu0 %v6405_v53 }
 0x66d   : > { %3700 = vmatmul.mubr.f32.gmra.mrb[28].mxu1 %v6406_v23 }
 0x66e   : > { %3928 = vmatmul.mubr.f32.gmra.mrb[56].mxu0 %v6406_v23  ;;  %3705 = vmatprep.mubr.f32.mxu1 %v6407_v42 }
 0x66f   : > { %3932 = vmatprep.mubr.f32.mxu0 %v6407_v42 }
 0x671   : > { %3706 = vmatmul.mubr.f32.gmra.mrb[30].mxu1 %v6408_v17 }
 0x672   : > { %3933 = vmatmul.mubr.f32.gmra.mrb[58].mxu0 %v6408_v17  ;;  %3711 = vmatprep.mubr.f32.mxu1 %v6409_v58 }
 0x673   : > { %3937 = vmatprep.mubr.f32.mxu0 %v6409_v58 }
 0x675   : > { %3712 = vmatmul.mubr.f32.gmra.mrb[32].mxu1 %v6410_v20 }
 0x676   : > { %3938 = vmatmul.mubr.f32.gmra.mrb[60].mxu0 %v6410_v20 }
 0x6cc   : > { %v3527_v44 = vpop.f32.mrb[162].mxu1 }
 0x6cd   : > { %v3784_v3 = vpop.f32.mrb[190].mxu0  ;;  %v3529_v47 = vpop.f32.mrb[163].mxu1 }
 0x6ce   : > { %v3786_v49 = vpop.f32.mrb[191].mxu0 }
 0x6d0   : > { %v3533_v9 = vpop.f32.mrb[228].mxu1 }
 0x6d1   : > { %v3943_v60 = vpack.c.bf16 %v3533_v9, %v3527_v44  ;;  %v3535_v57 = vpop.f32.mrb[229].mxu1  ;;  %v3789_v22 = vpop.f32.mrb[0].mxu0 }
 0x6d2   : > { %v3944_v59 = vpack.c.bf16 %v3535_v57, %v3529_v47  ;;  %v3945_v12 = vpack.c.bf16 %v3789_v22, %v3784_v3  ;;  %v3791_v0 = vpop.f32.mrb[1].mxu0 }
 0x6d4   : > { %4215 = vmatprep.mubr.bf16.mxu1 %v3944_v59  ;;  %5792 = vmatprep.mubr.bf16.mxu0 %v3945_v12  ;;  %v3539_v25 = vpop.f32.mrb[230].mxu1 }
 0x6d5   : > { %v3794_v62 = vpop.f32.mrb[2].mxu0  ;;  %4216 = vmatmul.mubr.bf16.vlgmr.msra.gmra.mrb[36].mxu1 %v3943_v60  ;;  %v3541_v16 = vpop.f32.mrb[231].mxu1 }
 0x6d6   : > { %v3796_v24 = vpop.f32.mrb[3].mxu0 }
 0x6d8   : > { %v3545_v36 = vpop.f32.mrb[232].mxu1 }
 0x6d9   : > { %v3946_v21 = vpack.c.bf16 %v3545_v36, %v3539_v25  ;;  %v3547_v61 = vpop.f32.mrb[233].mxu1  ;;  %v3799_v11 = vpop.f32.mrb[4].mxu0 }
 0x6da   : > { %v3947_v63 = vpack.c.bf16 %v3547_v61, %v3541_v16  ;;  %v3948_v15 = vpack.c.bf16 %v3799_v11, %v3794_v62  ;;  %v3801_v2 = vpop.f32.mrb[5].mxu0 }
 0x6dc   : > { %4223 = vmatprep.mubr.bf16.mxu1 %v3947_v63  ;;  %5793 = vmatmul.mubr.bf16.vlgmr.msra.gmra.mrb[64].mxu0 %v3948_v15  ;;  %v3551_v28 = vpop.f32.mrb[234].mxu1 }
 0x6dd   : > { %v3804_v33 = vpop.f32.mrb[6].mxu0  ;;  %4224 = vmatmul.mubr.bf16.gmra.mrb[40].mxu1 %v3946_v21  ;;  %v3553_v29 = vpop.f32.mrb[235].mxu1 }
 0x6de   : > { %v3806_v38 = vpop.f32.mrb[7].mxu0 }
 0x6e0   : > { %v3557_v52 = vpop.f32.mrb[236].mxu1 }
 0x6e1   : > { %v3949_v54 = vpack.c.bf16 %v3557_v52, %v3551_v28  ;;  %v3559_v5 = vpop.f32.mrb[237].mxu1  ;;  %v3809_v39 = vpop.f32.mrb[8].mxu0 }
 0x6e2   : > { %v3950_v18 = vpack.c.bf16 %v3559_v5, %v3553_v29  ;;  %v3951_v41 = vpack.c.bf16 %v3809_v39, %v3804_v33  ;;  %v3811_v43 = vpop.f32.mrb[9].mxu0 }
 0x6e4   : > { %4231 = vmatprep.mubr.bf16.mxu1 %v3950_v18  ;;  %5796 = vmatprep.mubr.bf16.mxu0 %v3951_v41  ;;  %v3563_v7 = vpop.f32.mrb[238].mxu1 }
 0x6e5   : > { %v3814_v4 = vpop.f32.mrb[10].mxu0  ;;  %4232 = vmatmul.mubr.bf16.gmra.mrb[44].mxu1 %v3949_v54  ;;  %v3565_v55 = vpop.f32.mrb[239].mxu1 }
 0x6e6   : > { %v3816_v32 = vpop.f32.mrb[11].mxu0 }
 0x6e8   : > { %v3569_v45 = vpop.f32.mrb[240].mxu1 }
 0x6e9   : > { %v3952_v48 = vpack.c.bf16 %v3569_v45, %v3563_v7  ;;  %v3571_v26 = vpop.f32.mrb[241].mxu1  ;;  %v3819_v56 = vpop.f32.mrb[12].mxu0 }
 0x6ea   : > { %v3953_v31 = vpack.c.bf16 %v3571_v26, %v3565_v55  ;;  %v3954_v8 = vpack.c.bf16 %v3819_v56, %v3814_v4  ;;  %v3821_v10 = vpop.f32.mrb[13].mxu0 }
 0x6ec   : > { %4239 = vmatprep.mubr.bf16.mxu1 %v3953_v31  ;;  %5797 = vmatmul.mubr.bf16.gmra.mrb[68].mxu0 %v3954_v8  ;;  %v3575_v6 = vpop.f32.mrb[242].mxu1 }
 0x6ed   : > { %v3824_v46 = vpop.f32.mrb[14].mxu0  ;;  %4240 = vmatmul.mubr.bf16.gmra.mrb[48].mxu1 %v3952_v48  ;;  %v3577_v34 = vpop.f32.mrb[243].mxu1 }
 0x6ee   : > { %v3826_v30 = vpop.f32.mrb[15].mxu0 }
 0x6f0   : > { %v3581_v27 = vpop.f32.mrb[244].mxu1 }
 0x6f1   : > { %v3955_v13 = vpack.c.bf16 %v3581_v27, %v3575_v6  ;;  %v3583_v50 = vpop.f32.mrb[245].mxu1  ;;  %v3829_v1 = vpop.f32.mrb[16].mxu0 }
 0x6f2   : > { %v3956_v35 = vpack.c.bf16 %v3583_v50, %v3577_v34  ;;  %v3957_v19 = vpack.c.bf16 %v3829_v1, %v3824_v46  ;;  %v3831_v14 = vpop.f32.mrb[17].mxu0 }
 0x6f4   : > { %4247 = vmatprep.mubr.bf16.mxu1 %v3956_v35  ;;  %5800 = vmatprep.mubr.bf16.mxu0 %v3957_v19  ;;  %v3587_v51 = vpop.f32.mrb[246].mxu1 }
 0x6f5   : > { %v3834_v37 = vpop.f32.mrb[18].mxu0  ;;  %4248 = vmatmul.mubr.bf16.gmra.mrb[52].mxu1 %v3955_v13  ;;  %v3589_v40 = vpop.f32.mrb[247].mxu1 }
 0x6f6   : > { %v3836_v53 = vpop.f32.mrb[19].mxu0 }
 0x6f8   : > { %v3593_v23 = vpop.f32.mrb[248].mxu1 }
 0x6f9   : > { %v3958_v42 = vpack.c.bf16 %v3593_v23, %v3587_v51  ;;  %v3595_v17 = vpop.f32.mrb[249].mxu1  ;;  %v3839_v58 = vpop.f32.mrb[20].mxu0 }
 0x6fa   : > { %v3959_v20 = vpack.c.bf16 %v3595_v17, %v3589_v40  ;;  %v3960_v44 = vpack.c.bf16 %v3839_v58, %v3834_v37  ;;  %v3841_v3 = vpop.f32.mrb[21].mxu0 }
 0x6fc   : > { %4255 = vmatprep.mubr.bf16.mxu1 %v3959_v20  ;;  %5801 = vmatmul.mubr.bf16.gmra.mrb[72].mxu0 %v3960_v44  ;;  %v3599_v47 = vpop.f32.mrb[250].mxu1 }
 0x6fd   : > { %v3844_v49 = vpop.f32.mrb[22].mxu0  ;;  %4256 = vmatmul.mubr.bf16.gmra.mrb[56].mxu1 %v3958_v42  ;;  %v3601_v9 = vpop.f32.mrb[251].mxu1 }
 0x6fe   : > { %v3846_v60 = vpop.f32.mrb[23].mxu0 }
 0x700   : > { %v3605_v57 = vpop.f32.mrb[252].mxu1 }
 0x701   : > { %v3961_v22 = vpack.c.bf16 %v3605_v57, %v3599_v47  ;;  %v3607_v59 = vpop.f32.mrb[253].mxu1  ;;  %v3849_v12 = vpop.f32.mrb[24].mxu0 }
 0x702   : > { %v3962_v0 = vpack.c.bf16 %v3607_v59, %v3601_v9  ;;  %v3963_v25 = vpack.c.bf16 %v3849_v12, %v3844_v49  ;;  %v3851_v62 = vpop.f32.mrb[25].mxu0 }
 0x704   : > { %4263 = vmatprep.mubr.bf16.mxu1 %v3962_v0  ;;  %5804 = vmatprep.mubr.bf16.mxu0 %v3963_v25  ;;  %v3611_v16 = vpop.f32.mrb[254].mxu1 }
 0x705   : > { %v3854_v24 = vpop.f32.mrb[26].mxu0  ;;  %4264 = vmatmul.mubr.bf16.gmra.mrb[60].mxu1 %v3961_v22  ;;  %v3613_v36 = vpop.f32.mrb[255].mxu1 }
 0x706   : > { %v3856_v21 = vpop.f32.mrb[27].mxu0 }
 0x708   : > { %v3617_v61 = vpop.f32.mrb[0].mxu1 }
 0x709   : > { %v3964_v11 = vpack.c.bf16 %v3617_v61, %v3611_v16  ;;  %v3619_v63 = vpop.f32.mrb[1].mxu1  ;;  %v3859_v15 = vpop.f32.mrb[28].mxu0 }
 0x70a   : > { %v3965_v2 = vpack.c.bf16 %v3619_v63, %v3613_v36  ;;  %v3966_v28 = vpack.c.bf16 %v3859_v15, %v3854_v24  ;;  %v3861_v33 = vpop.f32.mrb[29].mxu0 }
 0x70c   : > { %4271 = vmatprep.mubr.bf16.mxu1 %v3965_v2  ;;  %5805 = vmatmul.mubr.bf16.gmra.mrb[76].mxu0 %v3966_v28  ;;  %v3623_v29 = vpop.f32.mrb[2].mxu1 }
 0x70d   : > { %v3864_v38 = vpop.f32.mrb[30].mxu0  ;;  %4272 = vmatmul.mubr.bf16.gmra.mrb[64].mxu1 %v3964_v11  ;;  %v3625_v52 = vpop.f32.mrb[3].mxu1 }
 0x70e   : > { %v3866_v54 = vpop.f32.mrb[31].mxu0 }
 0x710   : > { %v3629_v5 = vpop.f32.mrb[4].mxu1 }
 0x711   : > { %v3967_v39 = vpack.c.bf16 %v3629_v5, %v3623_v29  ;;  %v3631_v18 = vpop.f32.mrb[5].mxu1  ;;  %v3869_v41 = vpop.f32.mrb[32].mxu0 }
 0x712   : > { %v3968_v43 = vpack.c.bf16 %v3631_v18, %v3625_v52  ;;  %v3969_v7 = vpack.c.bf16 %v3869_v41, %v3864_v38  ;;  %v3871_v4 = vpop.f32.mrb[33].mxu0 }
 0x714   : > { %4279 = vmatprep.mubr.bf16.mxu1 %v3968_v43  ;;  %5808 = vmatprep.mubr.bf16.mxu0 %v3969_v7  ;;  %v3635_v55 = vpop.f32.mrb[6].mxu1 }
 0x715   : > { %v3874_v32 = vpop.f32.mrb[34].mxu0  ;;  %4280 = vmatmul.mubr.bf16.gmra.mrb[68].mxu1 %v3967_v39  ;;  %v3637_v45 = vpop.f32.mrb[7].mxu1 }
 0x716   : > { %v3876_v48 = vpop.f32.mrb[35].mxu0 }
 0x718   : > { %v3641_v26 = vpop.f32.mrb[8].mxu1 }
 0x719   : > { %v3970_v56 = vpack.c.bf16 %v3641_v26, %v3635_v55  ;;  %v3643_v31 = vpop.f32.mrb[9].mxu1  ;;  %v3879_v8 = vpop.f32.mrb[36].mxu0 }
 0x71a   : > { %v3971_v10 = vpack.c.bf16 %v3643_v31, %v3637_v45  ;;  %v3972_v6 = vpack.c.bf16 %v3879_v8, %v3874_v32  ;;  %v3881_v46 = vpop.f32.mrb[37].mxu0 }
 0x71c   : > { %4287 = vmatprep.mubr.bf16.mxu1 %v3971_v10  ;;  %5809 = vmatmul.mubr.bf16.gmra.mrb[80].mxu0 %v3972_v6  ;;  %v3647_v34 = vpop.f32.mrb[10].mxu1 }
 0x71d   : > { %v3884_v30 = vpop.f32.mrb[38].mxu0  ;;  %4288 = vmatmul.mubr.bf16.gmra.mrb[72].mxu1 %v3970_v56  ;;  %v3649_v27 = vpop.f32.mrb[11].mxu1 }
 0x71e   : > { %v3886_v13 = vpop.f32.mrb[39].mxu0 }
 0x720   : > { %v3653_v50 = vpop.f32.mrb[12].mxu1 }
 0x721   : > { %v3973_v1 = vpack.c.bf16 %v3653_v50, %v3647_v34  ;;  %v3655_v35 = vpop.f32.mrb[13].mxu1  ;;  %v3889_v19 = vpop.f32.mrb[40].mxu0 }
 0x722   : > { %v3974_v14 = vpack.c.bf16 %v3655_v35, %v3649_v27  ;;  %v3975_v51 = vpack.c.bf16 %v3889_v19, %v3884_v30  ;;  %v3891_v37 = vpop.f32.mrb[41].mxu0 }
 0x724   : > { %4295 = vmatprep.mubr.bf16.mxu1 %v3974_v14  ;;  %5812 = vmatprep.mubr.bf16.mxu0 %v3975_v51  ;;  %v3659_v40 = vpop.f32.mrb[14].mxu1  ;;  %v4538_v14 = vld [vmem:[%s6977_s23 + $0x8] sm:$0xff] }
 0x725   : > { %v3894_v53 = vpop.f32.mrb[42].mxu0  ;;  %4296 = vmatmul.mubr.bf16.gmra.mrb[76].mxu1 %v3973_v1  ;;  %v3661_v23 = vpop.f32.mrb[15].mxu1 }
 0x726   : > { %v3896_v42 = vpop.f32.mrb[43].mxu0 }
 0x728   : > { %v3665_v17 = vpop.f32.mrb[16].mxu1 }
 0x729   : > { %v3976_v58 = vpack.c.bf16 %v3665_v17, %v3659_v40  ;;  %v3667_v20 = vpop.f32.mrb[17].mxu1  ;;  %v3899_v44 = vpop.f32.mrb[44].mxu0 }
 0x72a   : > { %v3977_v3 = vpack.c.bf16 %v3667_v20, %v3661_v23  ;;  %v3978_v47 = vpack.c.bf16 %v3899_v44, %v3894_v53  ;;  %v3901_v49 = vpop.f32.mrb[45].mxu0  ;;  %v8265_v44 = vld [vmem:[#allocation25_spill] sm:$0xff] }
 0x72c   : > { %4303 = vmatprep.mubr.bf16.mxu1 %v3977_v3  ;;  %5813 = vmatmul.mubr.bf16.gmra.mrb[84].mxu0 %v3978_v47  ;;  %v3671_v9 = vpop.f32.mrb[18].mxu1 }
 0x72d   : > { %v3904_v60 = vpop.f32.mrb[46].mxu0  ;;  %4304 = vmatmul.mubr.bf16.gmra.mrb[80].mxu1 %v3976_v58  ;;  %v3673_v57 = vpop.f32.mrb[19].mxu1 }
 0x72e   : > { %v3906_v22 = vpop.f32.mrb[47].mxu0 }
 0x730   : > { %v3677_v59 = vpop.f32.mrb[20].mxu1 }
 0x731   : > { %v3979_v12 = vpack.c.bf16 %v3677_v59, %v3671_v9  ;;  %v3679_v0 = vpop.f32.mrb[21].mxu1  ;;  %v3909_v25 = vpop.f32.mrb[48].mxu0  ;;  %v8267_v59 = vld [vmem:[#allocation27_spill] sm:$0xff] }
 0x732   : > { %v3980_v62 = vpack.c.bf16 %v3679_v0, %v3673_v57  ;;  %v3981_v16 = vpack.c.bf16 %v3909_v25, %v3904_v60  ;;  %v3911_v24 = vpop.f32.mrb[49].mxu0  ;;  %v8266_v57 = vld [vmem:[#allocation24_spill] sm:$0xff] }
 0x734   : > { %4311 = vmatprep.mubr.bf16.mxu1 %v3980_v62  ;;  %5816 = vmatprep.mubr.bf16.mxu0 %v3981_v16  ;;  %v3683_v36 = vpop.f32.mrb[22].mxu1  ;;  %v8268_v62 = vld [vmem:[#allocation26_spill] sm:$0xff] }
 0x735   : > { %v3914_v21 = vpop.f32.mrb[50].mxu0  ;;  %4312 = vmatmul.mubr.bf16.gmra.mrb[84].mxu1 %v3979_v12  ;;  %v3685_v61 = vpop.f32.mrb[23].mxu1 }
 0x736   : > { %v3916_v11 = vpop.f32.mrb[51].mxu0 }
 0x738   : > { %v3689_v63 = vpop.f32.mrb[24].mxu1 }
 0x739   : > { %v3982_v15 = vpack.c.bf16 %v3689_v63, %v3683_v36  ;;  %v3691_v2 = vpop.f32.mrb[25].mxu1  ;;  %v3919_v28 = vpop.f32.mrb[52].mxu0 }
 0x73a   : > { %v3983_v33 = vpack.c.bf16 %v3691_v2, %v3685_v61  ;;  %v3984_v29 = vpack.c.bf16 %v3919_v28, %v3914_v21  ;;  %v3921_v38 = vpop.f32.mrb[53].mxu0  ;;  %v4630_v2 = vld [vmem:[#allocation7] sm:$0xff]  ;;  %v4631_v28 = vld [vmem:[#allocation7 + $0x8] sm:$0xff] }
 0x73b   : > { %v4633_v38 = vld [vmem:[#allocation7 + $0x18] sm:$0xff] }
 0x73c   : > { %4319 = vmatprep.mubr.bf16.mxu1 %v3983_v33  ;;  %5817 = vmatmul.mubr.bf16.gmra.mrb[88].mxu0 %v3984_v29  ;;  %v3695_v52 = vpop.f32.mrb[26].mxu1  ;;  %v4632_v33 = vld [vmem:[#allocation7 + $0x10] sm:$0xff]  ;;  %v6106_v29 = vpack.c.bf16 %v4631_v28, %v4630_v2 }
 0x73d   : > { %v3924_v54 = vpop.f32.mrb[54].mxu0  ;;  %4320 = vmatmul.mubr.bf16.gmra.mrb[88].mxu1 %v3982_v15  ;;  %v3697_v5 = vpop.f32.mrb[27].mxu1 }
 0x73e   : > { %v3926_v39 = vpop.f32.mrb[55].mxu0  ;;  %6107 = vmatprep.subr.bf16.mxu1 %v6106_v29 }
 0x73f   : > { %v4635_v39 = vld [vmem:[#allocation7 + $0x28] sm:$0xff]  ;;  %6109 = vmatpush3.bf16.msra.mxu1 %v6106_v29 }
 0x740   : > { %v3701_v18 = vpop.f32.mrb[28].mxu1 }
 0x741   : > { %v3985_v41 = vpack.c.bf16 %v3701_v18, %v3695_v52  ;;  %v3703_v43 = vpop.f32.mrb[29].mxu1  ;;  %v3929_v7 = vpop.f32.mrb[56].mxu0 }
 0x742   : > { %v3986_v4 = vpack.c.bf16 %v3703_v43, %v3697_v5  ;;  %v3987_v55 = vpack.c.bf16 %v3929_v7, %v3924_v54  ;;  %v3931_v32 = vpop.f32.mrb[57].mxu0  ;;  %v6110_v54 = vpack.c.bf16 %v4633_v38, %v4632_v33  ;;  %v4634_v5 = vld [vmem:[#allocation7 + $0x20] sm:$0xff]  ;;  %v8273_v33 = vld [vmem:[#allocation33_spill] sm:$0xff] }
 0x744   : > { %4327 = vmatprep.mubr.bf16.mxu1 %v3986_v4  ;;  %5820 = vmatprep.mubr.bf16.mxu0 %v3987_v55  ;;  %v3707_v45 = vpop.f32.mrb[30].mxu1 }
 0x745   : > { %v3934_v48 = vpop.f32.mrb[58].mxu0  ;;  %4328 = vmatmul.mubr.bf16.gmra.mrb[92].mxu1 %v3985_v41  ;;  %v3709_v26 = vpop.f32.mrb[31].mxu1  ;;  %6111 = vmatprep.subr.bf16.mxu1 %v6110_v54 }
 0x746   : > { %v3936_v56 = vpop.f32.mrb[59].mxu0  ;;  %6113 = vmatpush3.bf16.msra.mxu1 %v6110_v54  ;;  %v4644_v54 = vld [vmem:[#allocation7 + $0x70] sm:$0xff] }
 0x748   : > { %v3713_v31 = vpop.f32.mrb[32].mxu1 }
 0x749   : > { %v3988_v8 = vpack.c.bf16 %v3713_v31, %v3707_v45  ;;  %v3715_v10 = vpop.f32.mrb[33].mxu1  ;;  %v3939_v6 = vpop.f32.mrb[60].mxu0 }
 0x74a   : > { %v3989_v46 = vpack.c.bf16 %v3715_v10, %v3709_v26  ;;  %v3990_v34 = vpack.c.bf16 %v3939_v6, %v3934_v48  ;;  %v3941_v30 = vpop.f32.mrb[61].mxu0  ;;  %v6114_v48 = vpack.c.bf16 %v4635_v39, %v4634_v5  ;;  %v8269_v26 = vld [vmem:[#allocation29_spill] sm:$0xff]  ;;  %v4636_v10 = vld [vmem:[#allocation7 + $0x30] sm:$0xff]  ;;  %v4637_v6 = vld [vmem:[#allocation7 + $0x38] sm:$0xff] }
 0x74b   : > { %v8270_v30 = vld [vmem:[#allocation28_spill] sm:$0xff]  ;;  %v4645_v5 = vld [vmem:[#allocation7 + $0x78] sm:$0xff] }
 0x74c   : > { %4335 = vmatprep.mubr.bf16.mxu1 %v3989_v46  ;;  %5821 = vmatmul.mubr.bf16.gmra.mrb[92].mxu0 %v3990_v34 }
 0x74d   : > { %4336 = vmatmul.mubr.bf16.gmra.mrb[96].mxu1 %v3988_v8  ;;  %4609 = vmatprep.mubr.f32.mxu0 %v4538_v14  ;;  %v4638_v14 = vld [vmem:[#allocation7 + $0x40] sm:$0xff] }
 0x74e   : > { %6115 = vmatprep.subr.bf16.mxu1 %v6114_v48 }
 0x74f   : > { %6117 = vmatpush3.bf16.msra.mxu1 %v6114_v48  ;;  %v8276_v48 = vld [vmem:[#allocation34_spill] sm:$0xff] }
 0x7a8   : > { %v5426_v27 = vpop.f32.mrb[36].mxu1 }
 0x7a9   : > { %v5427_v13 = vpop.f32.mrb[37].mxu1 }
 0x7aa   : > { %v5428_v50 = vadd.f32 %v5427_v13, %v5426_v27  ;;  %v5429_v1 = vpop.f32.mrb[38].mxu1  ;;  %v8271_v13 = vld [vmem:[#allocation31_spill] sm:$0xff] }
 0x7ab   : > { %v5430_v35 = vpop.f32.mrb[39].mxu1 }
 0x7ac   : > { %v5431_v19 = vadd.f32 %v5430_v35, %v5429_v1  ;;  %v6118_v35 = vpack.c.bf16 %v4637_v6, %v4636_v10 }
 0x7ae   : > { %6119 = vmatprep.subr.bf16.mxu1 %v6118_v35 }
 0x7af   : > { %v5794_v51 = vpop.f32.mrb[64].mxu0  ;;  %6121 = vmatpush3.bf16.msra.mxu1 %v6118_v35 }
 0x7b0   : > { %v5432_v37 = vpop.f32.mrb[40].mxu1  ;;  %v4378_v40 = vpop.f32.mrb[65].mxu0 }
 0x7b1   : > { %v4379_v53 = vadd.f32 %v5428_v50, %v4378_v40  ;;  %v5433_v23 = vpop.f32.mrb[41].mxu1  ;;  %v5795_v42 = vpop.f32.mrb[66].mxu0 }
 0x7b2   : > { %v5434_v17 = vadd.f32 %v5433_v23, %v5432_v37  ;;  %v5435_v58 = vpop.f32.mrb[42].mxu1  ;;  %v4381_v20 = vpop.f32.mrb[67].mxu0  ;;  %v8272_v37 = vld [vmem:[#allocation30_spill] sm:$0xff] }
 0x7b3   : > { %v7979_v3 = vmul.f32 %v4379_v53, %v8265_v44  ;;  %v4382_v47 = vadd.f32 %v5431_v19, %v4381_v20  ;;  %v5436_v49 = vpop.f32.mrb[43].mxu1 }
 0x7b4   : > { %v4387_v9 = vadd.f32 %v5794_v51, %v5434_v17  ;;  %v5437_v60 = vadd.f32 %v5436_v49, %v5435_v58  ;;  %v4639_v51 = vld [vmem:[#allocation7 + $0x48] sm:$0xff]  ;;  %v4641_v49 = vld [vmem:[#allocation7 + $0x58] sm:$0xff] }
 0x7b5   : > { %v7982_v22 = vmul.f32 %v8266_v57, %v4382_v47  ;;  %v6122_v20 = vpack.c.bf16 %v4639_v51, %v4638_v14  ;;  %v4640_v47 = vld [vmem:[#allocation7 + $0x50] sm:$0xff] }
 0x7b6   : > { %v7985_v12 = vmul.f32 %v4387_v9, %v8267_v59  ;;  %v4390_v0 = vadd.f32 %v5795_v42, %v5437_v60  ;;  %v6126_v60 = vpack.c.bf16 %v4641_v49, %v4640_v47  ;;  %v4642_v59 = vld [vmem:[#allocation7 + $0x60] sm:$0xff] }
 0x7b7   : > { %v6076_v25 = vpack.c.bf16 %v7982_v22, %v7979_v3  ;;  %6123 = vmatprep.subr.bf16.mxu1 %v6122_v20 }
 0x7b8   : > { %v7990_v16 = vmul.f32 %v8268_v62, %v4390_v0  ;;  %v5438_v24 = vpop.f32.mrb[44].mxu1  ;;  %v4643_v0 = vld [vmem:[#allocation7 + $0x68] sm:$0xff]  ;;  %6125 = vmatpush3.bf16.msra.mxu1 %v6122_v20 }
 0x7b9   : > { %v5439_v36 = vpop.f32.mrb[45].mxu1  ;;  %6127 = vmatprep.subr.bf16.mxu1 %v6126_v60  ;;  %v6130_v28 = vpack.c.bf16 %v4643_v0, %v4642_v59  ;;  %v8279_v59 = vld [vmem:[#allocation39_spill] sm:$0xff] }
 0x7ba   : > { %v6080_v21 = vpack.c.bf16 %v7990_v16, %v7985_v12  ;;  %v5440_v61 = vadd.f32 %v5439_v36, %v5438_v24  ;;  %v5441_v11 = vpop.f32.mrb[46].mxu1 }
 0x7bb   : > { %v5442_v63 = vpop.f32.mrb[47].mxu1 }
 0x7bc   : > { %v5443_v15 = vadd.f32 %v5442_v63, %v5441_v11  ;;  %6129 = vmatpush3.bf16.msra.mxu1 %v6126_v60  ;;  %v8278_v60 = vld [vmem:[#allocation36_spill] sm:$0xff] }
 0x7bd   : > { %6131 = vmatprep.subr.bf16.mxu1 %v6130_v28 }
 0x7bf   : > { %v5798_v52 = vpop.f32.mrb[68].mxu0 }
 0x7c0   : > { %v5444_v18 = vpop.f32.mrb[48].mxu1  ;;  %v4394_v41 = vpop.f32.mrb[69].mxu0  ;;  %6133 = vmatpush3.bf16.msra.mxu1 %v6130_v28 }
 0x7c1   : > { %v4395_v43 = vadd.f32 %v5440_v61, %v4394_v41  ;;  %v5445_v7 = vpop.f32.mrb[49].mxu1  ;;  %v5799_v4 = vpop.f32.mrb[70].mxu0  ;;  %v8274_v41 = vld [vmem:[#allocation32_spill] sm:$0xff] }
 0x7c2   : > { %v5446_v55 = vadd.f32 %v5445_v7, %v5444_v18  ;;  %v5447_v32 = vpop.f32.mrb[50].mxu1  ;;  %v4397_v45 = vpop.f32.mrb[71].mxu0  ;;  %v8275_v7 = vld [vmem:[#allocation35_spill] sm:$0xff] }
 0x7c3   : > { %v7995_v56 = vmul.f32 %v4395_v43, %v8269_v26  ;;  %v4398_v31 = vadd.f32 %v5443_v15, %v4397_v45  ;;  %v5448_v8 = vpop.f32.mrb[51].mxu1 }
 0x7c4   : > { %v4403_v46 = vadd.f32 %v5798_v52, %v5446_v55  ;;  %v5449_v34 = vadd.f32 %v5448_v8, %v5447_v32  ;;  %v6134_v32 = vpack.c.bf16 %v4645_v5, %v4644_v54 }
 0x7c5   : > { %v7998_v27 = vmul.f32 %v8270_v30, %v4398_v31 }
 0x7c6   : > { %v8001_v50 = vmul.f32 %v4403_v46, %v8271_v13  ;;  %v4406_v1 = vadd.f32 %v5799_v4, %v5449_v34  ;;  %6135 = vmatprep.subr.bf16.mxu1 %v6134_v32 }
 0x7c7   : > { %v6084_v19 = vpack.c.bf16 %v7998_v27, %v7995_v56  ;;  %6137 = vmatpush3.bf16.msra.mxu1 %v6134_v32 }
 0x7c8   : > { %v8006_v40 = vmul.f32 %v8272_v37, %v4406_v1  ;;  %v5450_v53 = vpop.f32.mrb[52].mxu1 }
 0x7c9   : > { %v5451_v23 = vpop.f32.mrb[53].mxu1 }
 0x7ca   : > { %v6088_v42 = vpack.c.bf16 %v8006_v40, %v8001_v50  ;;  %v5452_v17 = vadd.f32 %v5451_v23, %v5450_v53  ;;  %v5453_v58 = vpop.f32.mrb[54].mxu1 }
 0x7cb   : > { %v5454_v44 = vpop.f32.mrb[55].mxu1 }
 0x7cc   : > { %v5455_v9 = vadd.f32 %v5454_v44, %v5453_v58  ;;  %v8277_v58 = vld [vmem:[#allocation37_spill] sm:$0xff] }
 0x7cf   : > { %v5802_v57 = vpop.f32.mrb[72].mxu0 }
 0x7d0   : > { %v5456_v62 = vpop.f32.mrb[56].mxu1  ;;  %v4410_v24 = vpop.f32.mrb[73].mxu0 }
 0x7d1   : > { %v4411_v36 = vadd.f32 %v5452_v17, %v4410_v24  ;;  %v5457_v61 = vpop.f32.mrb[57].mxu1  ;;  %v5803_v11 = vpop.f32.mrb[74].mxu0 }
 0x7d2   : > { %v5458_v63 = vadd.f32 %v5457_v61, %v5456_v62  ;;  %v5459_v15 = vpop.f32.mrb[58].mxu1  ;;  %v4413_v2 = vpop.f32.mrb[75].mxu0 }
 0x7d3   : > { %v8011_v29 = vmul.f32 %v4411_v36, %v8273_v33  ;;  %v4414_v38 = vadd.f32 %v5455_v9, %v4413_v2  ;;  %v5460_v52 = vpop.f32.mrb[59].mxu1  ;;  %v8280_v36 = vld [vmem:[#allocation38_spill] sm:$0xff] }
 0x7d4   : > { %v4419_v39 = vadd.f32 %v5802_v57, %v5458_v63  ;;  %v5461_v18 = vadd.f32 %v5460_v52, %v5459_v15 }
 0x7d5   : > { %v8014_v43 = vmul.f32 %v8274_v41, %v4414_v38 }
 0x7d6   : > { %v8017_v4 = vmul.f32 %v4419_v39, %v8275_v7  ;;  %v4422_v55 = vadd.f32 %v5803_v11, %v5461_v18 }
 0x7d7   : > { %v6092_v45 = vpack.c.bf16 %v8014_v43, %v8011_v29 }
 0x7d8   : > { %v8022_v26 = vmul.f32 %v8276_v48, %v4422_v55  ;;  %v5462_v31 = vpop.f32.mrb[60].mxu1  ;;  %v8281_v48 = vld [vmem:[#allocation41_spill] sm:$0xff] }
 0x7d9   : > { %v5463_v8 = vpop.f32.mrb[61].mxu1 }
 0x7da   : > { %v6096_v10 = vpack.c.bf16 %v8022_v26, %v8017_v4  ;;  %v5464_v6 = vadd.f32 %v5463_v8, %v5462_v31  ;;  %v5465_v46 = vpop.f32.mrb[62].mxu1  ;;  %v8294_v4 = vld [vmem:[#allocation61_spill] sm:$0xff] }
 0x7db   : > { %v5466_v34 = vpop.f32.mrb[63].mxu1 }
 0x7dc   : > { %v5467_v30 = vadd.f32 %v5466_v34, %v5465_v46 }
 0x7df   : > { %v5806_v13 = vpop.f32.mrb[76].mxu0 }
 0x7e0   : > { %v5468_v1 = vpop.f32.mrb[64].mxu1  ;;  %v4426_v35 = vpop.f32.mrb[77].mxu0 }
 0x7e1   : > { %v4427_v14 = vadd.f32 %v5464_v6, %v4426_v35  ;;  %v5469_v51 = vpop.f32.mrb[65].mxu1  ;;  %v5807_v37 = vpop.f32.mrb[78].mxu0 }
 0x7e2   : > { %v5470_v53 = vadd.f32 %v5469_v51, %v5468_v1  ;;  %v5471_v23 = vpop.f32.mrb[66].mxu1  ;;  %v4429_v17 = vpop.f32.mrb[79].mxu0  ;;  %v8283_v1 = vld [vmem:[#allocation43_spill] sm:$0xff] }
 0x7e3   : > { %v8027_v20 = vmul.f32 %v4427_v14, %v8277_v58  ;;  %v4430_v44 = vadd.f32 %v5467_v30, %v4429_v17  ;;  %v5472_v47 = vpop.f32.mrb[67].mxu1  ;;  %v8282_v30 = vld [vmem:[#allocation40_spill] sm:$0xff] }
 0x7e4   : > { %v4435_v49 = vadd.f32 %v5806_v13, %v5470_v53  ;;  %v5473_v9 = vadd.f32 %v5472_v47, %v5471_v23 }
 0x7e5   : > { %v8030_v57 = vmul.f32 %v8278_v60, %v4430_v44 }
 0x7e6   : > { %v8033_v0 = vmul.f32 %v4435_v49, %v8279_v59  ;;  %v4438_v62 = vadd.f32 %v5807_v37, %v5473_v9  ;;  %v8284_v37 = vld [vmem:[#allocation42_spill] sm:$0xff] }
 0x7e7   : > { %v6100_v24 = vpack.c.bf16 %v8030_v57, %v8027_v20  ;;  %v4543_v20 = vld [vmem:[%s6977_s23 + $0x30] sm:$0xff] }
 0x7e8   : > { %v8038_v61 = vmul.f32 %v8280_v36, %v4438_v62  ;;  %v5474_v11 = vpop.f32.mrb[68].mxu1 }
 0x7e9   : > { %v5475_v63 = vpop.f32.mrb[69].mxu1 }
 0x7ea   : > { %v6104_v15 = vpack.c.bf16 %v8038_v61, %v8033_v0  ;;  %v5476_v2 = vadd.f32 %v5475_v63, %v5474_v11  ;;  %v5477_v28 = vpop.f32.mrb[70].mxu1 }
 0x7eb   : > { %v5478_v33 = vpop.f32.mrb[71].mxu1 }
 0x7ec   : > { %v5479_v38 = vadd.f32 %v5478_v33, %v5477_v28 }
 0x7ef   : > { %v5810_v52 = vpop.f32.mrb[80].mxu0 }
 0x7f0   : > { %v5480_v54 = vpop.f32.mrb[72].mxu1  ;;  %v4442_v5 = vpop.f32.mrb[81].mxu0 }
 0x7f1   : > { %v4443_v39 = vadd.f32 %v5476_v2, %v4442_v5  ;;  %v5481_v18 = vpop.f32.mrb[73].mxu1  ;;  %v5811_v41 = vpop.f32.mrb[82].mxu0  ;;  %v8286_v5 = vld [vmem:[#allocation44_spill] sm:$0xff] }
 0x7f2   : > { %v5482_v7 = vadd.f32 %v5481_v18, %v5480_v54  ;;  %v5483_v55 = vpop.f32.mrb[74].mxu1  ;;  %v4445_v32 = vpop.f32.mrb[83].mxu0  ;;  %v8287_v18 = vld [vmem:[#allocation47_spill] sm:$0xff] }
 0x7f3   : > { %v4521_v31 = vmul.f32 %v4443_v39, %v8281_v48  ;;  %v4446_v8 = vadd.f32 %v5479_v38, %v4445_v32  ;;  %v5484_v6 = vpop.f32.mrb[75].mxu1  ;;  %v8285_v38 = vld [vmem:[#allocation45_spill] sm:$0xff] }
 0x7f4   : > { %v4451_v46 = vadd.f32 %v5810_v52, %v5482_v7  ;;  %v5485_v34 = vadd.f32 %v5484_v6, %v5483_v55 }
 0x7f5   : > { %v4522_v13 = vmul.f32 %v8282_v30, %v4446_v8 }
 0x7f6   : > { %v4523_v35 = vmul.f32 %v4451_v46, %v8283_v1  ;;  %v4454_v14 = vadd.f32 %v5811_v41, %v5485_v34  ;;  %v8288_v41 = vld [vmem:[#allocation46_spill] sm:$0xff] }
 0x7f7   : > { %v6074_v51 = vpack.c.bf16 %v4522_v13, %v4521_v31 }
 0x7f8   : > { %v4524_v53 = vmul.f32 %v8284_v37, %v4454_v14  ;;  %v5486_v23 = vpop.f32.mrb[76].mxu1 }
 0x7f9   : > { %v5487_v17 = vpop.f32.mrb[77].mxu1  ;;  %6075 = vmatprep.subr.bf16.mxu0 %v6074_v51 }
 0x7fa   : > { %v5488_v58 = vadd.f32 %v5487_v17, %v5486_v23  ;;  %v5489_v44 = vpop.f32.mrb[78].mxu1  ;;  %6077 = vmatpush3.bf16.msra.mxu0 %v6076_v25  ;;  %v6078_v47 = vpack.c.bf16 %v4524_v53, %v4523_v35  ;;  %v8289_v23 = vld [vmem:[#allocation50_spill] sm:$0xff] }
 0x7fb   : > { %v5490_v49 = vpop.f32.mrb[79].mxu1 }
 0x7fc   : > { %v5491_v9 = vadd.f32 %v5490_v49, %v5489_v44  ;;  %6079 = vmatprep.subr.bf16.mxu0 %v6078_v47  ;;  %v8290_v44 = vld [vmem:[#allocation49_spill] sm:$0xff]  ;;  %v8291_v49 = vld [vmem:[#allocation56_spill] sm:$0xff] }
 0x7fe   : > { %6081 = vmatpush3.bf16.msra.mxu0 %v6080_v21 }
 0x7ff   : > { %v5814_v60 = vpop.f32.mrb[84].mxu0 }
 0x800   : > { %v5492_v59 = vpop.f32.mrb[80].mxu1  ;;  %v4458_v62 = vpop.f32.mrb[85].mxu0 }
 0x801   : > { %v4459_v36 = vadd.f32 %v5488_v58, %v4458_v62  ;;  %v5493_v11 = vpop.f32.mrb[81].mxu1  ;;  %v5815_v63 = vpop.f32.mrb[86].mxu0 }
 0x802   : > { %v5494_v2 = vadd.f32 %v5493_v11, %v5492_v59  ;;  %v5495_v28 = vpop.f32.mrb[82].mxu1  ;;  %v4461_v33 = vpop.f32.mrb[87].mxu0 }
 0x803   : > { %v4525_v3 = vmul.f32 %v4459_v36, %v8285_v38  ;;  %v4462_v22 = vadd.f32 %v5491_v9, %v4461_v33  ;;  %v5496_v25 = vpop.f32.mrb[83].mxu1  ;;  %v8292_v9 = vld [vmem:[#allocation55_spill] sm:$0xff] }
 0x804   : > { %v4467_v52 = vadd.f32 %v5814_v60, %v5494_v2  ;;  %v5497_v54 = vadd.f32 %v5496_v25, %v5495_v28 }
 0x805   : > { %v4526_v39 = vmul.f32 %v8286_v5, %v4462_v22 }
 0x806   : > { %v4527_v12 = vmul.f32 %v4467_v52, %v8287_v18  ;;  %v4470_v16 = vadd.f32 %v5815_v63, %v5497_v54  ;;  %v8293_v18 = vld [vmem:[#allocation62_spill] sm:$0xff] }
 0x807   : > { %v6082_v21 = vpack.c.bf16 %v4526_v39, %v4525_v3 }
 0x808   : > { %v4528_v7 = vmul.f32 %v8288_v41, %v4470_v16  ;;  %v5498_v55 = vpop.f32.mrb[84].mxu1 }
 0x809   : > { %v5499_v32 = vpop.f32.mrb[85].mxu1  ;;  %6083 = vmatprep.subr.bf16.mxu0 %v6082_v21 }
 0x80a   : > { %v5500_v48 = vadd.f32 %v5499_v32, %v5498_v55  ;;  %v5501_v31 = vpop.f32.mrb[86].mxu1  ;;  %6085 = vmatpush3.bf16.msra.mxu0 %v6084_v19  ;;  %v6086_v8 = vpack.c.bf16 %v4528_v7, %v4527_v12  ;;  %v8296_v55 = vld [vmem:[#allocation65_spill] sm:$0xff] }
 0x80b   : > { %v5502_v6 = vpop.f32.mrb[87].mxu1 }
 0x80c   : > { %v5503_v46 = vadd.f32 %v5502_v6, %v5501_v31  ;;  %6087 = vmatprep.subr.bf16.mxu0 %v6086_v8  ;;  %v4537_v31 = vld [vmem:[%s6977_s23] sm:$0xff]  ;;  %v4540_v8 = vld [vmem:[%s6977_s23 + $0x18] sm:$0xff]  ;;  %v4539_v6 = vld [vmem:[%s6977_s23 + $0x10] sm:$0xff] }
 0x80e   : > { %6089 = vmatpush3.bf16.msra.mxu0 %v6088_v42 }
 0x80f   : > { %v5818_v34 = vpop.f32.mrb[88].mxu0 }
 0x810   : > { %v5504_v30 = vpop.f32.mrb[88].mxu1  ;;  %v4474_v13 = vpop.f32.mrb[89].mxu0 }
 0x811   : > { %v4475_v1 = vadd.f32 %v5500_v48, %v4474_v13  ;;  %v5505_v35 = vpop.f32.mrb[89].mxu1  ;;  %v5819_v14 = vpop.f32.mrb[90].mxu0 }
 0x812   : > { %v5506_v51 = vadd.f32 %v5505_v35, %v5504_v30  ;;  %v5507_v37 = vpop.f32.mrb[90].mxu1  ;;  %v4477_v53 = vpop.f32.mrb[91].mxu0  ;;  %v4544_v30 = vld [vmem:[%s6977_s23 + $0x38] sm:$0xff] }
 0x813   : > { %v4529_v56 = vmul.f32 %v4475_v1, %v8289_v23  ;;  %v4478_v27 = vadd.f32 %v5503_v46, %v4477_v53  ;;  %v5508_v19 = vpop.f32.mrb[91].mxu1  ;;  %v4542_v46 = vld [vmem:[%s6977_s23 + $0x28] sm:$0xff] }
 0x814   : > { %v4483_v17 = vadd.f32 %v5818_v34, %v5506_v51  ;;  %v5509_v58 = vadd.f32 %v5508_v19, %v5507_v37  ;;  %v4541_v34 = vld [vmem:[%s6977_s23 + $0x20] sm:$0xff]  ;;  %s4913_s23 = sshll.u32 %s403_s12, 5 }
 0x815   : > { %v4530_v47 = vmul.f32 %v8290_v44, %v4478_v27  ;;  %s405_s16 = scalar_lea.vmem [#allocation11], %s4913_s23 }
 0x816   : > { %v4531_v50 = vmul.f32 %v4483_v17, %v8291_v49  ;;  %v4486_v40 = vadd.f32 %v5819_v14, %v5509_v58  ;;  %s4749_s24 = sshll.u32 %s405_s16, 4  ;;  %s8091_s24 = int_to_ptr.vmem [resolvable:$true] %s4749_s24 }
 0x817   : > { %v6090_v42 = vpack.c.bf16 %v4530_v47, %v4529_v56  ;;  %s6555_s7 = scalar_lea.vmem %s8091_s24, 512  ;;  %p6562_p7 = scmp.lt.s32.totalorder %s8091_s24, %s6560_s19 }
 0x818   : > { %v4532_v60 = vmul.f32 %v8292_v9, %v4486_v40  ;;  %v5510_v59 = vpop.f32.mrb[92].mxu1  ;;  %p6556_p6 = scmp.ne.s32.totalorder %s8091_s24, %s6555_s7  ;;  %p6563_p11 = scmp.lt.s32.totalorder %s6561_s17, %s6555_s7 }
 0x819   : > { %v5511_v62 = vpop.f32.mrb[93].mxu1  ;;  %6091 = vmatprep.subr.bf16.mxu0 %v6090_v42 }
 0x81a   : > { %v5512_v36 = vadd.f32 %v5511_v62, %v5510_v59  ;;  %v5513_v11 = vpop.f32.mrb[94].mxu1  ;;  %6093 = vmatpush3.bf16.msra.mxu0 %v6092_v45  ;;  %v6094_v63 = vpack.c.bf16 %v4532_v60, %v4531_v50  ;;  %p6557_p2 = pnand %p6556_p6, %p8300_p1  ;;  %p6564_p0 = por %p6563_p11, %p6562_p7 }
 0x81b   : > { %v5514_v2 = vpop.f32.mrb[95].mxu1 }
 0x81c   : > { %v5515_v28 = vadd.f32 %v5514_v2, %v5513_v11  ;;  %6095 = vmatprep.subr.bf16.mxu0 %v6094_v63  ;;  %p6558_p13 = pneg %p6557_p2 }
 0x81e   : > { %6097 = vmatpush3.bf16.msra.mxu0 %v6096_v10  ;;  %v8295_v10 = vld [vmem:[#allocation66_spill] sm:$0xff]  ;;  %p6565_p5 = pnand %p6564_p0, %p6558_p13 }
 0x81f   : > { %v5822_v33 = vpop.f32.mrb[92].mxu0 }
 0x820   : > { %v5516_v38 = vpop.f32.mrb[96].mxu1  ;;  %v4490_v3 = vpop.f32.mrb[93].mxu0 }
 0x821   : > { %v4491_v22 = vadd.f32 %v5512_v36, %v4490_v3  ;;  %v5517_v25 = vpop.f32.mrb[97].mxu1  ;;  %v5823_v52 = vpop.f32.mrb[94].mxu0 }
 0x822   : > { %v5518_v54 = vadd.f32 %v5517_v25, %v5516_v38  ;;  %v5519_v5 = vpop.f32.mrb[98].mxu1  ;;  %v4493_v39 = vpop.f32.mrb[95].mxu0 }
 0x823   : > { %v4533_v29 = vmul.f32 %v4491_v22, %v8293_v18  ;;  %v4494_v43 = vadd.f32 %v5515_v28, %v4493_v39  ;;  %v5520_v45 = vpop.f32.mrb[99].mxu1 }
 0x824   : > { %v4499_v12 = vadd.f32 %v5822_v33, %v5518_v54  ;;  %v5521_v16 = vadd.f32 %v5520_v45, %v5519_v5 }
 0x825   : > { %v4534_v26 = vmul.f32 %v8294_v4, %v4494_v43 }
 0x826   : > { %v4535_v21 = vmul.f32 %v4499_v12, %v8295_v10  ;;  %v4502_v41 = vadd.f32 %v5823_v52, %v5521_v16 }
 0x827   : > { %v6098_v7 = vpack.c.bf16 %v4534_v26, %v4533_v29 }
 0x828   : > { %v4536_v32 = vmul.f32 %v8296_v55, %v4502_v41 }
 0x829   : > { %6099 = vmatprep.subr.bf16.mxu0 %v6098_v7 }
 0x82a   : > { %6101 = vmatpush3.bf16.msra.mxu0 %v6100_v24  ;;  %v6102_v48 = vpack.c.bf16 %v4536_v32, %v4535_v21 }
 0x82c   : > { %6103 = vmatprep.subr.bf16.mxu0 %v6102_v48 }
 0x82e   : > { %6105 = vmatpush3.bf16.msra.mxu0 %v6104_v15 }
 0x831   : > { %4610 = vmatmul.mubr.f32.vlgmr.msra.gmra.mrb[62].mxu0 %v4537_v31 }
 0x832   : > { %4614 = vmatprep.mubr.f32.mxu0 %v4540_v8 }
 0x835   : > { %4615 = vmatmul.mubr.f32.gmra.mrb[96].mxu0 %v4539_v6 }
 0x836   : > { %4619 = vmatprep.mubr.f32.mxu0 %v4542_v46 }
 0x839   : > { %4620 = vmatmul.mubr.f32.gmra.mrb[98].mxu0 %v4541_v34 }
 0x83a   : > { %4624 = vmatprep.mubr.f32.mxu0 %v4544_v30 }
 0x83d   : > { %4625 = vmatmul.mubr.f32.gmra.mrb[100].mxu0 %v4543_v20 }
 0x904   : > { %v5578_v57 = vpop.f32.mrb[62].mxu0 }
 0x905   : > { %v5579_v24 = vpop.f32.mrb[63].mxu0 }
 0x906   : > { %v5580_v13 = vadd.f32 %v5579_v24, %v5578_v57 }
 0x908   : > { %v5581_v0 = vpop.f32.mrb[96].mxu0  ;;  %5856 = vmatprep.mubr.f32.mxu1 %v5580_v13 }
 0x909   : > { %v5582_v61 = vpop.f32.mrb[97].mxu0 }
 0x90a   : > { %v5583_v15 = vadd.f32 %v5582_v61, %v5581_v0 }
 0x90c   : > { %5857 = vmatmul.mubr.f32.vlgmr.msra.gmra.mrb[34].mxu1 %v5583_v15  ;;  %v5584_v1 = vpop.f32.mrb[98].mxu0 }
 0x90d   : > { %v5585_v35 = vpop.f32.mrb[99].mxu0 }
 0x90e   : > { %v5586_v14 = vadd.f32 %v5585_v35, %v5584_v1 }
 0x910   : > { %v5587_v51 = vpop.f32.mrb[100].mxu0  ;;  %5859 = vmatprep.mubr.f32.mxu1 %v5586_v14 }
 0x911   : > { %v5588_v37 = vpop.f32.mrb[101].mxu0 }
 0x912   : > { %v5589_v53 = vadd.f32 %v5588_v37, %v5587_v51 }
 0x914   : > { %5860 = vmatmul.mubr.f32.gmra.mrb[100].mxu1 %v5589_v53 }
 0x9df   : > { %v5858_v23 = vpop.f32.mrb[34].mxu1 }
 0x9e0   : > { %4732 = vst [vmem:[%s405_s16 + $0x8] sm:$0xff] %v5858_v23  ;;  %v4712_v56 = vpop.f32.mrb[35].mxu1 }
 0x9e1   : > { %4731 = vst [vmem:[%s405_s16] sm:$0xff] %v4712_v56 }
 0x9e7   : > { %v5861_v27 = vpop.f32.mrb[100].mxu1 }
 0x9e8   : > { %4734 = vst [vmem:[%s405_s16 + $0x18] sm:$0xff] %v5861_v27  ;;  %v4722_v19 = vpop.f32.mrb[101].mxu1 }
 0x9e9   : > { %4733 = vst [vmem:[%s405_s16 + $0x10] sm:$0xff] %v4722_v19 }
 0x9ea   : > { %6568 = shalt.err (!%p6565_p5)
}
 0x9eb   : > { %s6569_s13 = scalar_lea.hbm %s8096_s26, 512  ;;  %s6573_s9 = scalar_lea.hbm %s8299_s20, 1024 }
 0x9ec   : > { %p6570_p10 = scmp.ne.s32.totalorder %s8096_s26, %s6569_s13  ;;  %p6574_p3 = scmp.lt.u32.totalorder %s8096_s26, %s8299_s20 }
 0x9ed   : > { %p6575_p9 = scmp.lt.u32.totalorder %s6573_s9, %s6569_s13  ;;  %p6577_p6 = scmp.lt.u32.totalorder %s6569_s13, %s8096_s26 }
 0x9ee   : > { %p6571_p12 = pnand %p6570_p10, %p8300_p1 }
 0x9ef   : > { %p6576_p8 = por %p6575_p9, %p6574_p3 }
 0x9f0   : > { %p6572_p4 = pneg %p6571_p12 }
 0x9f1   : > { %p6578_p2 = por %p6577_p6, %p6576_p8 }
 0x9f3   : > { %p6579_p13 = pnand %p6578_p2, %p6572_p4 }
 0x9f5   : > { %6582 = shalt.err (!%p6579_p13)
}
 0x9f6   : > { %s6676_s12 = smov 128   ;;  %s6677_s23 = smov 8  }
 0x9f7   : > { %6156 = dma.vmem_to_hbm [thread:$0]  (%p8300_p1), %s8091_s24, 512, %s8096_s26, %s8098_s15, %s6676_s12, %s6676_s12, %s6677_s23  }
 0x9f8 PF: > { %s8301_s16 = sld [smem:[#allocation17_spill]]  ;;  %s8302_s4 = sld [smem:[#allocation23_spill]] }
 0x9f9   : > { %p8304_p11 = scmp.ge.s32.totalorder %s6657_s30, 2 }
 0x9fe   : > { %s4764_s22 = sand.u32 1, %s8301_s16   ;;  %p8303_p7 = scmp.ne.s32.totalorder %s8302_s4, 0 }
 0x9ff   : > { %s4765_s18 = scalar_lea.sflag [#allocation4], %s4764_s22 }
 0xa00   : > { %p6176_p0 = pnand %p8304_p11, %p8303_p7 }
 0xa02   : > { %6628 = dma.done.wait (!%p6176_p0), %s4765_s18, 512  }
 0xa03   : > { %6630 = vsyncadd (!%p6176_p0), %s4765_s18, 4294966784  ;;  %s8305_s30 = sld [smem:[#allocation19_spill]]  ;;  %s8306_s27 = sld [smem:[#allocation18_spill]] }
 0xa04   : > { %s8307_s26 = sld [smem:[#allocation21_spill]]  ;;  %s8308_s7 = sld [smem:[#allocation20_spill]] }
 0xa05   : > { %s8309_s24 = smov %s6637_s25 }
 0xa09   : > { %p24_p1 = scmp.ge.s32.totalorder %s8305_s30, 4   ;;  %s8310_s25 = smov %s8306_s27 }
 0xa0a   : > { %s8311_s27 = smov %s6649_s28  ;;  %s8312_s28 = smov %s6653_s29 }
 0xa0b   : > { %s8313_s29 = smov %s8308_s7  ;;  %26 = sbr.rel (!%p24_p1) target bundleno = 14 (0xe), region = 121 }
 0xa12   :  { %4770 = vsyncpa [#allocation3], 1 }
 0xa13   :  { %4772 = vsyncpa [#allocation3 + $0x1], 1 }
 0xa14   :  { %4773 = vsyncpa [#allocation6], 1 }
 0xa15   :  { %4775 = vsyncpa [#allocation6 + $0x1], 1 }
 0xa16   :  { %4776 = vsyncpa [#allocation9], 1 }
 0xa17   :  { %4777 = vsyncpa [#allocation4], 1 }
 0xa18   :  { %4779 = vsyncpa [#allocation4 + $0x1], 1 }

</bundles_post_ra>
